<compile_context>
chip_gen: v7x
topology: tpu7x:2x2x1
jax: 0.10.0
libtpu: 0.0.40
codegen_flags: <defaults>
</compile_context>

<pallas_src>
import jax
import jax.numpy as jnp
from jax.experimental import pallas as pl
from jax.experimental.pallas import tpu as pltpu


# ---------------------------------------------------------------------------
# VMEM budget: generation-aware (v5e/v6e have 128 MiB physical, v7x has 64).
# ---------------------------------------------------------------------------
def _vmem_limit_bytes():
    try:
        cap = int(pltpu.get_tpu_info().vmem_capacity_bytes)
    except Exception:
        cap = 64 * 1024 * 1024  # conservative (v7x) fallback
    return min((cap * 3) // 4, 112 * 1024 * 1024)


# ---------------------------------------------------------------------------
# Fused MLP kernel: one (batch tile i, hidden tile j) step per grid point.
# ---------------------------------------------------------------------------
def _mlp_kernel(x_ref, w1_ref, b1_ref, w2_ref, b2_ref, o_ref, acc_ref):
    j = pl.program_id(1)

    @pl.when(j == 0)
    def _():
        acc_ref[...] = jnp.zeros_like(acc_ref)

    # Cast x -> bf16 inside the kernel (removes the wrapper-side convert pass).
    x = x_ref[...].astype(jnp.bfloat16)                       # (tm, D_in)
    # dot1 on the MXU, f32 accumulate; bias/GELU elementwise math in f32.
    h = jnp.dot(x, w1_ref[...], preferred_element_type=jnp.float32)
    h = h + b1_ref[...]                                       # (1, tkh) broadcast
    # tanh GELU -> EUP slot (deliberate: == torch.nn.GELU(approximate='tanh')).
    h = jax.nn.gelu(h, approximate=True)
    # dot2 partial product over this hidden tile, accumulated in f32.
    acc_ref[...] += jnp.dot(h.astype(jnp.bfloat16), w2_ref[...],
                            preferred_element_type=jnp.float32)

    @pl.when(j == pl.num_programs(1) - 1)
    def _():
        # Lane-dense (multiple-of-128) store: unmasked vst.
        o_ref[...] = (acc_ref[...] + b2_ref[...]).astype(o_ref.dtype)


def _mlp_pallas(x, w1, b1, w2, b2, *, tm=256, tkh=None, out_dtype=None):
    """Fused MLP forward. x:(B,D_in) f32; w1/w2 bf16; b1/b2 f32."""
    B, D_in = x.shape
    D_h = w1.shape[1]
    D_out = w2.shape[1]
    out_dtype = x.dtype if out_dtype is None else out_dtype

    # Full MXU tiles / unmasked stores need lane-aligned feature dims
    # (multiples of 256 preferred on v6e/v7x's 2x256x256 MXU).
    assert D_in % 128 == 0 and D_h % 128 == 0 and D_out % 128 == 0

    if tkh is None:
        tkh = min(D_h, 512)        # 2 MXU tiles wide; bounds the f32 h temporary
    assert D_h % tkh == 0

    tm = min(tm, B)
    if B % tm != 0:
        # TODO(synk): replace pad/slice with grid=pl.cdiv(B,tm) + a masked
        # final-row store (pltpu.store with a row mask) to avoid the extra
        # HBM copies of x and out in the ragged-batch case.
        B_pad = pl.cdiv(B, tm) * tm
        x = jnp.pad(x, ((0, B_pad - B), (0, 0)))
    else:
        B_pad = B

    nb, nj = B_pad // tm, D_h // tkh
    # NOTE: on v7x megacore keep nb >= ~8 (>=4 steps/TensorCore) so the x/out
    # DMAs pipeline; this demo is intentionally tiny.

    weight_passes = nb if nj > 1 else 1  # constant-index blocks are fetched once
    cost = pl.CostEstimate(
        flops=2 * B_pad * (D_in * D_h + D_h * D_out),
        transcendentals=B_pad * D_h,     # tanh inside GELU
        bytes_accessed=(x.size * x.dtype.itemsize
                        + weight_passes * (w1.size * w1.dtype.itemsize
                                           + w2.size * w2.dtype.itemsize
                                           + b1.size * b1.dtype.itemsize
                                           + b2.size * b2.dtype.itemsize)
                        + B_pad * D_out * jnp.dtype(out_dtype).itemsize),
    )

    out = pl.pallas_call(
        _mlp_kernel,
        out_shape=jax.ShapeDtypeStruct((B_pad, D_out), out_dtype),
        grid=(nb, nj),
        in_specs=[
            pl.BlockSpec((tm, D_in), lambda i, j: (i, 0)),     # x row tile (f32)
            pl.BlockSpec((D_in, tkh), lambda i, j: (0, j)),    # W1 column block
            pl.BlockSpec((1, tkh), lambda i, j: (0, j)),       # b1 block
            pl.BlockSpec((tkh, D_out), lambda i, j: (j, 0)),   # W2 row block
            pl.BlockSpec((1, D_out), lambda i, j: (0, 0)),     # b2 (resident)
        ],
        out_specs=pl.BlockSpec((tm, D_out), lambda i, j: (i, 0)),
        scratch_shapes=[pltpu.VMEM((tm, D_out), jnp.float32)],
        compiler_params=pltpu.CompilerParams(
            # batch axis shards across v7x's 2 TensorCores; the hidden axis is
            # a reduction into the accumulator -> must be "arbitrary".
            dimension_semantics=("parallel", "arbitrary"),
            vmem_limit_bytes=_vmem_limit_bytes(),
        ),
        cost_estimate=cost,
    )(x, w1, b1, w2, b2)
    return out[:B] if B_pad != B else out


# ---------------------------------------------------------------------------
# Checkpoint semantics: save only inputs, recompute activations in backward.
# ---------------------------------------------------------------------------
def _module_math(x, w1, b1, w2, b2):
    """Plain-JAX math of the wrapped module (same bf16-operand / f32-acc
    recipe as the kernel).  Used only to RECOMPUTE activations in backward."""
    h = jnp.dot(x.astype(jnp.bfloat16), w1.astype(jnp.bfloat16),
                preferred_element_type=jnp.float32) + b1.astype(jnp.float32)
    h = jax.nn.gelu(h, approximate=True)
    return jnp.dot(h.astype(jnp.bfloat16), w2.astype(jnp.bfloat16),
                   preferred_element_type=jnp.float32) + b2.astype(jnp.float32)


@jax.custom_vjp
def _checkpointed_module(x, w1, b1, w2, b2):
    return _mlp_pallas(x, w1, b1, w2, b2)


def _ckpt_fwd(x, w1, b1, w2, b2):
    # Save ONLY the inputs -- no intermediate activations (checkpoint semantics).
    return _mlp_pallas(x, w1, b1, w2, b2), (x, w1, b1, w2, b2)


def _ckpt_bwd(residuals, g):
    # use_reentrant=False behaviour: recompute the forward during backward.
    # TODO(synk): fuse recompute + (dX, dW1, db1, dW2, db2) into a tile-wise
    # Pallas backward kernel so the hidden activation never round-trips to HBM.
    x, w1, b1, w2, b2 = residuals
    _, pullback = jax.vjp(_module_math, x, w1, b1, w2, b2)
    grads = pullback(g.astype(jnp.float32))
    return tuple(gr.astype(r.dtype) for gr, r in zip(grads, residuals))


_checkpointed_module.defvjp(_ckpt_fwd, _ckpt_bwd)


def prepare_params(w1, b1, w2, b2):
    """One-time param prep: bf16 MXU weights (cast hoisted out of the per-call
    path), f32 biases."""
    return (w1.astype(jnp.bfloat16), b1.astype(jnp.float32),
            w2.astype(jnp.bfloat16), b2.astype(jnp.float32))


def checkpoint_wrapper_forward(x, params):
    """Equivalent of CheckpointWrapper(module).forward(x)."""
    w1, b1, w2, b2 = params
    return _checkpointed_module(x, w1, b1, w2, b2)


# ---------------------------------------------------------------------------
if __name__ == "__main__":
    key = jax.random.PRNGKey(0)
    k_x, k_w1, k_b1, k_w2, k_b2 = jax.random.split(key, 5)

    # Small but MXU-friendly shapes: feature dims multiples of 256, tm | B,
    # D_h/tkh = 2 so the hidden-tile accumulation path is exercised.
    B, D_in, D_h, D_out = 512, 256, 1024, 256
    x = jax.random.normal(k_x, (B, D_in), dtype=jnp.float32)
    w1 = jax.random.normal(k_w1, (D_in, D_h), dtype=jnp.float32) * 0.1
    b1 = jax.random.normal(k_b1, (1, D_h), dtype=jnp.float32) * 0.1
    w2 = jax.random.normal(k_w2, (D_h, D_out), dtype=jnp.float32) * 0.1
    b2 = jax.random.normal(k_b2, (1, D_out), dtype=jnp.float32) * 0.1

    # One-time parameter prep (bf16 weight cast hoisted out of every call).
    params = prepare_params(w1, b1, w2, b2)

    # Forward (the checkpointed module's forward is just module(x)).
    y = jax.jit(checkpoint_wrapper_forward)(x, params)
    jax.block_until_ready(y)
    assert y.shape == (B, D_out) and y.dtype == jnp.float32

    # Reference uses the identical bf16-operand / f32-accumulate recipe.
    y_ref = _module_math(x, *params)
    assert jnp.allclose(y, y_ref, atol=2e-2, rtol=2e-2), "mismatch vs reference"

    # Gradients flow; backward recomputes activations (checkpoint behaviour).
    loss = lambda x_, p_: jnp.sum(checkpoint_wrapper_forward(x_, p_))
    gx = jax.jit(jax.grad(loss))(x, params)
    jax.block_until_ready(gx)
    assert gx.shape == x.shape and gx.dtype == x.dtype

    print("KERNEL_OK")
</pallas_src>

<mosaic_0001>
module attributes {stable_mosaic.version = 11 : i64} {
  func.func @_mlp_kernel(%arg0: i32, %arg1: i32, %arg2: memref<256x256xf32, #tpu.memory_space<vmem>>, %arg3: memref<256x512xbf16, #tpu.memory_space<vmem>>, %arg4: memref<1x512xf32, #tpu.memory_space<vmem>>, %arg5: memref<512x256xbf16, #tpu.memory_space<vmem>>, %arg6: memref<1x256xf32, #tpu.memory_space<vmem>>, %arg7: memref<256x256xf32, #tpu.memory_space<vmem>>, %arg8: memref<256x256xf32, #tpu.memory_space<vmem>>) attributes {dimension_semantics = [#tpu.dimension_semantics<parallel>, #tpu.dimension_semantics<arbitrary>], iteration_bounds = array<i64: 2, 2>, scalar_prefetch = 0 : i64, scratch_operands = 1 : i64, tpu.core_type = #tpu.core_type<tc>, window_params = [{transform_indices = @transform_0, window_bounds = array<i64: 256, 256>}, {transform_indices = @transform_1, window_bounds = array<i64: 256, 512>}, {transform_indices = @transform_2, window_bounds = array<i64: 1, 512>}, {transform_indices = @transform_3, window_bounds = array<i64: 512, 256>}, {pipeline_mode = #tpu.pipeline_mode<synchronous>, transform_indices = @transform_4, window_bounds = array<i64: 1, 256>}, {transform_indices = @transform_5, window_bounds = array<i64: 256, 256>}]} {
    %c0_i32 = arith.constant 0 : i32
    %0 = arith.cmpi eq, %arg1, %c0_i32 : i32
    %1 = arith.extui %0 : i1 to i32
    %c0_i32_0 = arith.constant 0 : i32
    %2 = arith.cmpi ne, %1, %c0_i32_0 : i32
    scf.if %2 {
      %cst_18 = arith.constant 0.000000e+00 : f32
      %32 = vector.broadcast %cst_18 : f32 to vector<256x256xf32>
      %c0_19 = arith.constant 0 : index
      %c0_20 = arith.constant 0 : index
      %33 = vector.load %arg8[%c0_19, %c0_20] : memref<256x256xf32, #tpu.memory_space<vmem>>, vector<256x256xf32>
      tpu.vector_store %arg8[%c0_19, %c0_20], %32 {strides = array<i32>} : memref<256x256xf32, #tpu.memory_space<vmem>>, vector<256x256xf32>,
    } else {
    }
    %c0 = arith.constant 0 : index
    %c0_1 = arith.constant 0 : index
    %3 = vector.load %arg2[%c0, %c0_1] : memref<256x256xf32, #tpu.memory_space<vmem>>, vector<256x256xf32>
    %4 = arith.truncf %3 : vector<256x256xf32> to vector<256x256xbf16>
    %c0_2 = arith.constant 0 : index
    %c0_3 = arith.constant 0 : index
    %5 = vector.load %arg3[%c0_2, %c0_3] : memref<256x512xbf16, #tpu.memory_space<vmem>>, vector<256x512xbf16>
    %cst = arith.constant dense<0.000000e+00> : vector<256x512xf32>
    %6 = tpu.matmul %4, %5, %cst {dimension_numbers = #tpu.dot_dimension_numbers<[1], [0], [0], [1], [0, 0, 1, 1], [], []>} : vector<256x256xbf16>, vector<256x512xbf16>, vector<256x512xf32> -> vector<256x512xf32>
    %c0_4 = arith.constant 0 : index
    %c0_5 = arith.constant 0 : index
    %7 = vector.load %arg4[%c0_4, %c0_5] : memref<1x512xf32, #tpu.memory_space<vmem>>, vector<1x512xf32>
    %8 = vector.broadcast %7 : vector<1x512xf32> to vector<256x512xf32>
    %9 = arith.addf %6, %8 : vector<256x512xf32>
    %10 = arith.mulf %9, %9 : vector<256x512xf32>
    %11 = arith.mulf %9, %10 : vector<256x512xf32>
    %cst_6 = arith.constant 4.471500e-02 : f32
    %12 = vector.broadcast %cst_6 : f32 to vector<256x512xf32>
    %13 = arith.mulf %12, %11 : vector<256x512xf32>
    %14 = arith.addf %9, %13 : vector<256x512xf32>
    %cst_7 = arith.constant 0.797884583 : f32
    %15 = vector.broadcast %cst_7 : f32 to vector<256x512xf32>
    %16 = arith.mulf %15, %14 : vector<256x512xf32>
    %17 = math.tanh %16 : vector<256x512xf32>
    %cst_8 = arith.constant 1.000000e+00 : f32
    %18 = vector.broadcast %cst_8 : f32 to vector<256x512xf32>
    %19 = arith.addf %18, %17 : vector<256x512xf32>
    %cst_9 = arith.constant 5.000000e-01 : f32
    %20 = vector.broadcast %cst_9 : f32 to vector<256x512xf32>
    %21 = arith.mulf %20, %19 : vector<256x512xf32>
    %22 = arith.mulf %9, %21 : vector<256x512xf32>
    %c0_10 = arith.constant 0 : index
    %c0_11 = arith.constant 0 : index
    %23 = vector.load %arg8[%c0_10, %c0_11] : memref<256x256xf32, #tpu.memory_space<vmem>>, vector<256x256xf32>
    %24 = arith.truncf %22 : vector<256x512xf32> to vector<256x512xbf16>
    %c0_12 = arith.constant 0 : index
    %c0_13 = arith.constant 0 : index
    %25 = vector.load %arg5[%c0_12, %c0_13] : memref<512x256xbf16, #tpu.memory_space<vmem>>, vector<512x256xbf16>
    %cst_14 = arith.constant dense<0.000000e+00> : vector<256x256xf32>
    %26 = tpu.matmul %24, %25, %cst_14 {dimension_numbers = #tpu.dot_dimension_numbers<[1], [0], [0], [1], [0, 0, 1, 1], [], []>} : vector<256x512xbf16>, vector<512x256xbf16>, vector<256x256xf32> -> vector<256x256xf32>
    %27 = arith.addf %23, %26 : vector<256x256xf32>
    %c0_15 = arith.constant 0 : index
    %c0_16 = arith.constant 0 : index
    %28 = vector.load %arg8[%c0_15, %c0_16] : memref<256x256xf32, #tpu.memory_space<vmem>>, vector<256x256xf32>
    tpu.vector_store %arg8[%c0_15, %c0_16], %27 {strides = array<i32>} : memref<256x256xf32, #tpu.memory_space<vmem>>, vector<256x256xf32>,
    %c1_i32 = arith.constant 1 : i32
    %29 = arith.cmpi eq, %arg1, %c1_i32 : i32
    %30 = arith.extui %29 : i1 to i32
    %c0_i32_17 = arith.constant 0 : i32
    %31 = arith.cmpi ne, %30, %c0_i32_17 : i32
    scf.if %31 {
      %c0_18 = arith.constant 0 : index
      %c0_19 = arith.constant 0 : index
      %32 = vector.load %arg8[%c0_18, %c0_19] : memref<256x256xf32, #tpu.memory_space<vmem>>, vector<256x256xf32>
      %c0_20 = arith.constant 0 : index
      %c0_21 = arith.constant 0 : index
      %33 = vector.load %arg6[%c0_20, %c0_21] : memref<1x256xf32, #tpu.memory_space<vmem>>, vector<1x256xf32>
      %34 = vector.broadcast %33 : vector<1x256xf32> to vector<256x256xf32>
      %35 = arith.addf %32, %34 : vector<256x256xf32>
      %c0_22 = arith.constant 0 : index
      %c0_23 = arith.constant 0 : index
      %36 = vector.load %arg7[%c0_22, %c0_23] : memref<256x256xf32, #tpu.memory_space<vmem>>, vector<256x256xf32>
      tpu.vector_store %arg7[%c0_22, %c0_23], %35 {strides = array<i32>} : memref<256x256xf32, #tpu.memory_space<vmem>>, vector<256x256xf32>,
    } else {
    }
    return
  }
  func.func @transform_0(%arg0: i32, %arg1: i32) -> (i32, i32) {
    %c0_i32 = arith.constant 0 : i32
    %c0_i32_0 = arith.constant 0 : i32
    return %arg0, %c0_i32 : i32, i32
  }
  func.func @transform_1(%arg0: i32, %arg1: i32) -> (i32, i32) {
    %c0_i32 = arith.constant 0 : i32
    %c0_i32_0 = arith.constant 0 : i32
    return %c0_i32, %arg1 : i32, i32
  }
  func.func @transform_2(%arg0: i32, %arg1: i32) -> (i32, i32) {
    %c0_i32 = arith.constant 0 : i32
    %c0_i32_0 = arith.constant 0 : i32
    return %c0_i32, %arg1 : i32, i32
  }
  func.func @transform_3(%arg0: i32, %arg1: i32) -> (i32, i32) {
    %c0_i32 = arith.constant 0 : i32
    %c0_i32_0 = arith.constant 0 : i32
    return %arg1, %c0_i32 : i32, i32
  }
  func.func @transform_4(%arg0: i32, %arg1: i32) -> (i32, i32) {
    %c0_i32 = arith.constant 0 : i32
    %c0_i32_0 = arith.constant 0 : i32
    %c0_i32_1 = arith.constant 0 : i32
    return %c0_i32, %c0_i32_0 : i32, i32
  }
  func.func @transform_5(%arg0: i32, %arg1: i32) -> (i32, i32) {
    %c0_i32 = arith.constant 0 : i32
    %c0_i32_0 = arith.constant 0 : i32
    return %arg0, %c0_i32 : i32, i32
  }
}

</mosaic_0001>

<bundles_post_ra>
// kernel: checkpoint_wrapper_forward.1
= control target key start
LH: loop header
LB: loop body
LE: loop exit
PB: predicated region body
PF: predicated region fallthrough
CT: control target
= control target key end

     0   :  { %s7588_s0 = inlined_call_operand.hbm [shape: f32[512,256], index: 0, kind: input, shape index: {}]   ;;  %s7589_s1 = inlined_call_operand.hbm [shape: bf16[256,1024], index: 1, kind: input, shape index: {}]   ;;  %s7590_s2 = inlined_call_operand.hbm [shape: f32[1,1024], index: 2, kind: input, shape index: {}]   ;;  %s7591_s3 = inlined_call_operand.hbm [shape: bf16[1024,256], index: 3, kind: input, shape index: {}]   ;;  %s7592_s4 = inlined_call_operand.vmem [shape: f32[1,256], index: 4, kind: input, shape index: {}]   ;;  %s7593_s5 = inlined_call_operand.hbm [shape: f32[512,256], index: 5, kind: output, shape index: {}]  }
   0x1   :  { %7620 = sst [smem:[#allocation40_spill]] %s7589_s1 }
   0x2   :  { %7621 = sst [smem:[#allocation41_spill]] %s7592_s4 }
   0x3   :  { %7622 = sst [smem:[#allocation42_spill]] %s7593_s5 }
   0x4   :  { %10 = vsyncpa [#allocation4], 0 }
   0x5   :  { %12 = vsyncpa [#allocation4 + $0x1], 0 }
   0x6   :  { %13 = vsyncpa [#allocation7], 0 }
   0x7   :  { %15 = vsyncpa [#allocation7 + $0x1], 0 }
   0x8   :  { %16 = vsyncpa [#allocation10], 0 }
   0x9   :  { %18 = vsyncpa [#allocation10 + $0x1], 0 }
   0xa   :  { %19 = vsyncpa [#allocation5], 0 }
   0xb   :  { %21 = vsyncpa [#allocation5 + $0x1], 0  ;;  %s4985_s18 = smov 0   ;;  %s4987_s19 = smov 0  }
   0xc   :  { %s4989_s20 = smov 0   ;;  %s4991_s21 = smov 0  }
   0xd   :  { %s4993_s22 = smov 0   ;;  %s4995_s23 = smov 0  }
   0xe   :  { %s4997_s24 = smov 0   ;;  %s4999_s25 = smov 0  }
   0xf   :  { %s5001_s26 = smov 0   ;;  %s5003_s27 = smov 0  }
  0x10   :  { %s5005_s28 = smov 0  }
  0x11 LB: > { %7623 = sst [smem:[#allocation16_spill]] %s4908_s20  ;;  %p7596_p0 = scmp.eq.s32.totalorder %s4940_s28, 0  ;;  %s4940_s28 = sphi %s5005_s28, %s27_s28   ;;  %s4936_s27 = sphi %s5003_s27, %s7715_s27   ;;  %s4932_s26 = sphi %s5001_s26, %s7722_s26   ;;  %s4928_s25 = sphi %s4999_s25, %s7713_s25   ;;  %s4924_s24 = sphi %s4997_s24, %s7721_s24   ;;  %s4920_s23 = sphi %s4995_s23, %s7712_s23   ;;  %s4916_s22 = sphi %s4993_s22, %s7720_s22   ;;  %s4912_s21 = sphi %s4991_s21, %s7719_s21   ;;  %s4908_s20 = sphi %s4989_s20, %s7718_s20   ;;  %s4904_s19 = sphi %s4987_s19, %s7717_s19   ;;  %s4900_s18 = sphi %s4985_s18, %s7716_s18  }
  0x12   : > { %7624 = sst [smem:[#allocation17_spill]] %s4920_s23  ;;  %p79_p1 = scmp.ne.s32.totalorder %s4908_s20, %s4904_s19 }
  0x13   : > { %7625 = sst [smem:[#allocation18_spill]] %s4928_s25  ;;  %p7595_p3 = scmp.lt.s32.totalorder %s4940_s28, 4 }
  0x14   : > { %7626 = sst [smem:[#allocation19_spill]] %s4936_s27  ;;  %p81_p4 = por %p79_p1, %p7596_p0 }
  0x15   : > { %s233_s30 = sand.u32 1, %s4940_s28   ;;  %s5051_s6 = sand.u32 1, %s4908_s20  }
  0x16   : > { %s7594_s7 = sshll.u32 %s5051_s6, 9  ;;  %s4046_s8 = sshll.u32 %s4932_s26, 8 }
  0x17   : > { %s7627_s1 = sld [smem:[#allocation40_spill]]  ;;  %s237_s12 = scalar_lea.vmem [#allocation6], %s7594_s7 }
  0x18   : > { %s244_s13 = sshll.u32 %s237_s12, 4  ;;  %p5064_p5 = pnand %p7595_p3, %p81_p4  ;;  %s5068_s13 = int_to_ptr.vmem [resolvable:$true] %s244_s13 }
  0x19   : > { %s5071_s15 = scalar_lea.sflag [#allocation7], %s233_s30 }
  0x1a   : > { %s7628_s14 = scalar_select %p5064_p5, 1, 0 }
  0x1b   : > { %p5077_p8 = pneg %p5064_p5 }
  0x1d   : > { %s5058_s11 = scalar_lea.hbm %s7627_s1, %s4046_s8  ;;  %s4695_s10 = scalar_lea.hbm %s7627_s1, 16384 }
  0x1e   : > { %s4690_s16 = scalar_lea.hbm %s5058_s11, 8192  ;;  %p4696_p11 = scmp.lt.u32.totalorder %s5058_s11, %s7627_s1 }
  0x1f   : > { %p4691_p7 = scmp.ne.s32.totalorder %s5058_s11, %s4690_s16  ;;  %p4697_p12 = scmp.lt.u32.totalorder %s4695_s10, %s4690_s16 }
  0x20   : > { %p4699_p1 = scmp.lt.u32.totalorder %s4690_s16, %s5058_s11 }
  0x21   : > { %p4693_p9 = pnand %p5077_p8, %p4691_p7  ;;  %p4698_p13 = por %p4697_p12, %p4696_p11 }
  0x23   : > { %p4694_p10 = pneg %p4693_p9  ;;  %p4700_p4 = por %p4699_p1, %p4698_p13 }
  0x25   : > { %p4701_p3 = pnand %p4700_p4, %p4694_p10 }
  0x27   : > { %4704 = shalt.err (!%p4701_p3)
}
  0x28   : > { %s4705_s30 = scalar_lea.vmem %s5068_s13, 8192  ;;  %s4942_s8 = smov [#allocation6]  }
  0x29   : > { %p4706_p7 = scmp.ne.s32.totalorder %s5068_s13, %s4705_s30  ;;  %s4710_s9 = sshll.u32 %s4942_s8, 4  ;;  %s4711_s9 = int_to_ptr.vmem [resolvable:$false] %s4710_s9 }
  0x2a   : > { %s4712_s7 = scalar_lea.vmem %s4711_s9, 16384  ;;  %p4713_p0 = scmp.lt.s32.totalorder %s5068_s13, %s4711_s9 }
  0x2b   : > { %p4708_p9 = pnand %p4706_p7, %p5077_p8  ;;  %p4714_p6 = scmp.lt.s32.totalorder %s4712_s7, %s4705_s30 }
  0x2d   : > { %p4709_p2 = pneg %p4708_p9  ;;  %p4715_p11 = por %p4714_p6, %p4713_p0 }
  0x2f   : > { %p4716_p12 = pnand %p4715_p11, %p4709_p2 }
  0x31   : > { %4719 = shalt.err (!%p4716_p12)
}
  0x32   : > { %s4943_s16 = smov 512   ;;  %s7597_s10 = smov 256  }
  0x33   : > { %s7598_s12 = smov 16   ;;  %p293_p0 = scmp.lt.s32.totalorder %s4940_s28, 5 }
  0x34   : > { %4132 = dma.hbm_to_vmem [thread:$0]  (!%p5064_p5), %s5058_s11, 8192, %s5068_s13, %s5071_s15, %s4943_s16, %s7597_s10, %s7598_s12  }
  0x35   : > { %p7630_p2 = scmp.ge.s32.totalorder %s4940_s28, 1  ;;  %s5111_s8 = sadd.s32 4294967295, %s4940_s28  }
  0x36   : > { %s3885_s9 = sadd.s32 4294967294, %s4940_s28   ;;  %s36_s7 = sadd.s32 1, %s4932_s26 }
  0x37   : > { %p5106_p3 = pnand %p7630_p2, %p293_p0  ;;  %s39_s29 = sadd.s32 1, %s4936_s27 }
  0x38   : > { %p37_p6 = scmp.ge.s32.totalorder %s36_s7, 2  ;;  %s46_s11 = sadd.s32 1, %s4920_s23 }
  0x39   : > { %s7631_s30 = scalar_select %p5106_p3, 1, 0 }
  0x3a   : > { %p53_p10 = scmp.ne.s32.totalorder %s4920_s23, %s4916_s22  ;;  %p7600_p13 = scmp.ne.s32.totalorder %s4916_s22, %s4912_s21 }
  0x3b   : > { %s7724_s7 = smov (%p37_p6, %s36_s7), 0  ;;  %s7726_s29 = smov (!%p37_p6, %s39_s29), %s4936_s27 }
  0x3c   : > { %7632 = sst [smem:[#allocation20_spill]] %s7724_s7  ;;  %p7633_p1 = scmp.eq.s32.totalorder %s4940_s28, 0 }
  0x3d   : > { %p60_p7 = scmp.eq.s32.totalorder %s5111_s8, 0  ;;  %p41_p9 = scmp.ge.s32.totalorder %s7726_s29, 2 }
  0x3e   : > { %p5129_p4 = por %p7633_p1, %p53_p10  ;;  %s69_s16 = ssub.s32 %s4932_s26, %s7724_s7 }
  0x3f   : > { %p5139_p11 = por %p60_p7, %p7600_p13  ;;  %p70_p12 = scmp.eq.s32.totalorder %s69_s16, 0 }
  0x40   : > { %s7728_s29 = smov (%p41_p9, %s7726_s29), 0  ;;  %s7637_s12 = sadd.s32 1, %s4908_s20 }
  0x41   : > { %s7635_s10 = scalar_select %p5139_p11, 1, 0 }
  0x42   : > { %7636 = sst [smem:[#allocation21_spill]] %s7728_s29  ;;  %s43_s5 = ssub.s32 %s4936_s27, %s7728_s29 }
  0x43   : > { %s5148_s1 = scalar_select %p70_p12, %s4908_s20, %s7637_s12  }
  0x44   : > { %p7639_p0 = scmp.ne.s32.totalorder %s4904_s19, %s4900_s18  ;;  %p44_p6 = scmp.eq.s32.totalorder %s43_s5, 0 }
  0x45   : > { %7638 = sst [smem:[#allocation22_spill]] %s5148_s1  ;;  %p182_p1 = scmp.eq.s32.totalorder %s5111_s8, 3 }
  0x46   : > { %p5155_p2 = por %p7639_p0, %p60_p7  ;;  %p188_p13 = scmp.eq.s32.totalorder %s3885_s9, 3 }
  0x47   : > { %s211_s16 = sand.u32 1, %s4920_s23   ;;  %p5167_p9 = por %p182_p1, %p53_p10 }
  0x48   : > { %s7640_s25 = scalar_select %p5155_p2, 1, 0 }
  0x49   : > { %s5162_s7 = scalar_select %p44_p6, %s4920_s23, %s46_s11  }
  0x4a   : > { %s7642_s12 = scalar_select %p5167_p9, 1, 0 }
  0x4b   : > { %7641 = sst [smem:[#allocation23_spill]] %s5162_s7  ;;  %p7643_p12 = scmp.ne.s32.totalorder %s4916_s22, %s4912_s21 }
  0x4c   : > { %s3888_s29 = sshll.u32 %s211_s16, 9  ;;  %s4045_s1 = sshll.u32 %s4936_s27, 13 }
  0x4d   : > { %p5174_p11 = por %p188_p13, %p7643_p12  ;;  %s5182_s5 = scalar_lea.hbm %s7588_s0, %s4045_s1 }
  0x4e   : > { %s215_s9 = scalar_lea.vmem [#allocation3], %s3888_s29  ;;  %p7646_p10 = scmp.lt.s32.totalorder %s4940_s28, 4 }
  0x4f   : > { %s7644_s18 = scalar_select %p5174_p11, 1, 0 }
  0x50   : > { %s223_s11 = sshll.u32 %s215_s9, 4  ;;  %p5190_p13 = pnand %p7646_p10, %p5129_p4  ;;  %s5184_s11 = int_to_ptr.vmem [resolvable:$true] %s223_s11 }
  0x51   : > { %7645 = sst [smem:[#allocation24_spill]] %s7644_s18  ;;  %s3895_s27 = sshll.u32 %s5051_s6, 2 }
  0x52   : > { %s4047_s4 = sshll.u32 %s4932_s26, 6  ;;  %s5196_s1 = scalar_lea.sflag [#allocation4], %s211_s16 }
  0x53   : > { %s4720_s20 = scalar_lea.hbm %s5182_s5, 8192  ;;  %p4722_p0 = pneg %p5190_p13 }
  0x54   : > { %p4721_p7 = scmp.ne.s32.totalorder %s5182_s5, %s4720_s20  ;;  %s4725_s9 = scalar_lea.hbm %s7588_s0, 16384 }
  0x55   : > { %p4726_p4 = scmp.lt.u32.totalorder %s5182_s5, %s7588_s0  ;;  %p4727_p12 = scmp.lt.u32.totalorder %s4725_s9, %s4720_s20 }
  0x56   : > { %p4723_p6 = pnand %p4722_p0, %p4721_p7  ;;  %p4729_p11 = scmp.lt.u32.totalorder %s4720_s20, %s5182_s5 }
  0x57   : > { %p4728_p10 = por %p4727_p12, %p4726_p4 }
  0x58   : > { %p4724_p1 = pneg %p4723_p6 }
  0x59   : > { %p4730_p9 = por %p4729_p11, %p4728_p10 }
  0x5b   : > { %p4731_p2 = pnand %p4730_p9, %p4724_p1 }
  0x5d   : > { %4734 = shalt.err (!%p4731_p2)
}
  0x5e   : > { %s4735_s16 = scalar_lea.vmem %s5184_s11, 8192  ;;  %s4946_s29 = smov [#allocation3]  }
  0x5f   : > { %p4736_p7 = scmp.ne.s32.totalorder %s5184_s11, %s4735_s16  ;;  %s4740_s13 = sshll.u32 %s4946_s29, 4  ;;  %s4741_s13 = int_to_ptr.vmem [resolvable:$false] %s4740_s13 }
  0x60   : > { %s4742_s23 = scalar_lea.vmem %s4741_s13, 16384  ;;  %p4743_p5 = scmp.lt.s32.totalorder %s5184_s11, %s4741_s13 }
  0x61   : > { %p4738_p6 = pnand %p4736_p7, %p4722_p0  ;;  %p4744_p4 = scmp.lt.s32.totalorder %s4742_s23, %s4735_s16 }
  0x63   : > { %p4739_p3 = pneg %p4738_p6  ;;  %p4745_p12 = por %p4744_p4, %p4743_p5 }
  0x65   : > { %p4746_p11 = pnand %p4745_p12, %p4739_p3 }
  0x67   : > { %4749 = shalt.err (!%p4746_p11)
}
  0x68   : > { %s7648_s18 = smov 16   ;;  %s7649_s20 = smov 256  }
  0x69   : > { %4129 = dma.hbm_to_vmem [thread:$0]  (!%p5190_p13), %s5182_s5, 8192, %s5184_s11, %s5196_s1, %s7649_s20, %s7649_s20, %s7648_s18  }
  0x6a   : > { %s5232_s16 = scalar_lea.hbm %s7590_s2, %s4047_s4  ;;  %s258_s7 = scalar_lea.vmem [#allocation8], %s3895_s27 }
  0x6b   : > { %s266_s13 = sshll.u32 %s258_s7, 4  ;;  %s4750_s23 = scalar_lea.hbm %s5232_s16, 64  ;;  %s267_s13 = int_to_ptr.vmem [resolvable:$true] %s266_s13 }
  0x6c   : > { %p4751_p5 = scmp.ne.s32.totalorder %s5232_s16, %s4750_s23  ;;  %s4755_s1 = scalar_lea.hbm %s7590_s2, 128 }
  0x6d   : > { %p4756_p9 = scmp.lt.u32.totalorder %s5232_s16, %s7590_s2  ;;  %p4757_p13 = scmp.lt.u32.totalorder %s4755_s1, %s4750_s23 }
  0x6e   : > { %p4753_p3 = pnand %p4751_p5, %p5077_p8  ;;  %p4759_p1 = scmp.lt.u32.totalorder %s4750_s23, %s5232_s16 }
  0x6f   : > { %p4758_p0 = por %p4757_p13, %p4756_p9 }
  0x70   : > { %p4754_p2 = pneg %p4753_p3 }
  0x71   : > { %p4760_p10 = por %p4759_p1, %p4758_p0 }
  0x73   : > { %p4761_p7 = pnand %p4760_p10, %p4754_p2 }
  0x75   : > { %4764 = shalt.err (!%p4761_p7)
}
  0x76   : > { %s4765_s27 = scalar_lea.vmem %s267_s13, 64  ;;  %s4947_s20 = smov [#allocation8]  }
  0x77   : > { %p4766_p6 = scmp.ne.s32.totalorder %s267_s13, %s4765_s27  ;;  %s4770_s9 = sshll.u32 %s4947_s20, 4  ;;  %s4771_s9 = int_to_ptr.vmem [resolvable:$false] %s4770_s9 }
  0x78   : > { %s4772_s29 = scalar_lea.vmem %s4771_s9, 128  ;;  %p4773_p11 = scmp.lt.s32.totalorder %s267_s13, %s4771_s9 }
  0x79   : > { %p4768_p4 = pnand %p4766_p6, %p5077_p8  ;;  %p4774_p5 = scmp.lt.s32.totalorder %s4772_s29, %s4765_s27 }
  0x7b   : > { %p4769_p12 = pneg %p4768_p4  ;;  %p4775_p3 = por %p4774_p5, %p4773_p11 }
  0x7d   : > { %p4776_p9 = pnand %p4775_p3, %p4769_p12 }
  0x7f   : > { %4779 = shalt.err (!%p4776_p9)
}
  0x80   : > { %p7650_p13 = scmp.ne.s32.totalorder %s7628_s14, 0  ;;  %s4049_s7 = sshll.u32 %s4932_s26, 13 }
  0x81   : > { %s5258_s11 = scalar_lea.hbm %s7591_s3, %s4049_s7  ;;  %s7651_s1 = sshll.u32 %s5051_s6, 9 }
  0x82   : > { %4135 = dma.hbm_to_vmem [thread:$0]  (!%p7650_p13), %s5232_s16, 64, %s267_s13, %s5071_s15  }
  0x83   : > { %s277_s18 = scalar_lea.vmem [#allocation9], %s7651_s1  ;;  %s274_s27 = scalar_lea.sflag [#allocation10], %s5051_s6 }
  0x84   : > { %s285_s4 = sshll.u32 %s277_s18, 4  ;;  %s4780_s20 = scalar_lea.hbm %s5258_s11, 8192  ;;  %s5262_s4 = int_to_ptr.vmem [resolvable:$true] %s285_s4 }
  0x85   : > { %p4781_p2 = scmp.ne.s32.totalorder %s5258_s11, %s4780_s20  ;;  %s4785_s13 = scalar_lea.hbm %s7591_s3, 16384 }
  0x86   : > { %p4786_p10 = scmp.lt.u32.totalorder %s5258_s11, %s7591_s3  ;;  %p4787_p7 = scmp.lt.u32.totalorder %s4785_s13, %s4780_s20 }
  0x87   : > { %p4783_p0 = pnand %p4781_p2, %p5077_p8  ;;  %p4789_p4 = scmp.lt.u32.totalorder %s4780_s20, %s5258_s11 }
  0x88   : > { %p4788_p6 = por %p4787_p7, %p4786_p10 }
  0x89   : > { %p4784_p1 = pneg %p4783_p0 }
  0x8a   : > { %p4790_p12 = por %p4789_p4, %p4788_p6 }
  0x8c   : > { %p4791_p11 = pnand %p4790_p12, %p4784_p1 }
  0x8e   : > { %4794 = shalt.err (!%p4791_p11)
}
  0x8f   : > { %s4795_s7 = scalar_lea.vmem %s5262_s4, 8192  ;;  %s4948_s23 = smov [#allocation9]  }
  0x90   : > { %p4796_p5 = scmp.ne.s32.totalorder %s5262_s4, %s4795_s7  ;;  %s4800_s5 = sshll.u32 %s4948_s23, 4  ;;  %s4801_s5 = int_to_ptr.vmem [resolvable:$false] %s4800_s5 }
  0x91   : > { %s4802_s1 = scalar_lea.vmem %s4801_s5, 16384  ;;  %p4803_p2 = scmp.lt.s32.totalorder %s5262_s4, %s4801_s5 }
  0x92   : > { %p4798_p3 = pnand %p4796_p5, %p5077_p8  ;;  %p4804_p0 = scmp.lt.s32.totalorder %s4802_s1, %s4795_s7 }
  0x94   : > { %p4799_p9 = pneg %p4798_p3  ;;  %p4805_p10 = por %p4804_p0, %p4803_p2 }
  0x96   : > { %p4806_p7 = pnand %p4805_p10, %p4799_p9 }
  0x98   : > { %4809 = shalt.err (!%p4806_p7)
}
  0x99   : > { %s4949_s18 = smov 128   ;;  %s4950_s20 = smov 8  }
  0x9a   : > { %4138 = dma.hbm_to_vmem [thread:$0]  (!%p7650_p13), %s5258_s11, 8192, %s5262_s4, %s274_s27, %s4949_s18, %s4949_s18, %s4950_s20  }
  0x9b   : > { %p7652_p8 = scmp.ne.s32.totalorder %s7631_s30, 0 }
  0x9d   : > { %297 = sbr.rel (%p7652_p8) target bundleno = 1107 (0x453), region = 40 }
  0xa4   : > { %s5291_s17 = sand.u32 1, %s4916_s22   ;;  %p7653_p1 = scmp.ne.s32.totalorder %s7635_s10, 0 }
  0xa5   : > { %s3903_s15 = sshll.u32 %s5291_s17, 9  ;;  %s300_s16 = scalar_lea.sflag [#allocation4], %s5291_s17 }
  0xa6   : > { %s5295_s13 = scalar_lea.vmem [#allocation3], %s3903_s15 }
  0xa7   : > { %4883 = dma.done.wait (%p7653_p1), %s300_s16, 8192  }
  0xa8   : > { %4885 = vsyncadd (%p7653_p1), %s300_s16, 4294959104  ;;  %s308_s6 = sand.u32 1, %s5111_s8   ;;  %s310_s14 = sand.u32 1, %s4904_s19  }
  0xa9   : > { %s3904_s30 = sshll.u32 %s310_s14, 9  ;;  %s309_s11 = scalar_lea.sflag [#allocation7], %s308_s6 }
  0xaa   : > { %s5303_s4 = scalar_lea.vmem [#allocation6], %s3904_s30  ;;  %p7654_p13 = scmp.ne.s32.totalorder %s7640_s25, 0 }
  0xac   : > { %4887 = dma.done.wait (%p7654_p13), %s309_s11, 8256  }
  0xad   : > { %4889 = vsyncadd (%p7654_p13), %s309_s11, 4294959040  ;;  %s3905_s27 = sshll.u32 %s310_s14, 2  ;;  %s327_s10 = scalar_lea.sflag [#allocation10], %s310_s14 }
  0xae   : > { %s5309_s9 = scalar_lea.vmem [#allocation8], %s3905_s27  ;;  %s5311_s29 = scalar_lea.vmem [#allocation9], %s3904_s30 }
  0xaf   : > { %4891 = dma.done.wait (%p7654_p13), %s327_s10, 8192  }
  0xb0   : > { %4893 = vsyncadd (%p7654_p13), %s327_s10, 4294959104  ;;  %s5317_s8 = scalar_lea.vmem [#allocation11], %s3903_s15  ;;  %p3908_p6 = scmp.ne.s32.totalorder %s4924_s24, 0 }
  0xb1   : > { %v4951_v0 = vmov (!%p3908_p6), 0.0  }
  0xb2   : > { %380 = sbr.rel (%p3908_p6) target bundleno = 210 (0xd2), region = 60  ;;  %381 = vst [vmem:[#allocation2] sm:$0xff] (!%p3908_p6), %v4951_v0  ;;  %382 = vst [vmem:[#allocation2 + $0x8] sm:$0xff] (!%p3908_p6), %v4951_v0 }
  0xb3   : > { %383 = vst [vmem:[#allocation2 + $0x10] sm:$0xff] (!%p3908_p6), %v4951_v0  ;;  %384 = vst [vmem:[#allocation2 + $0x18] sm:$0xff] (!%p3908_p6), %v4951_v0 }
  0xb4   : > { %385 = vst [vmem:[#allocation2 + $0x20] sm:$0xff] (!%p3908_p6), %v4951_v0  ;;  %386 = vst [vmem:[#allocation2 + $0x28] sm:$0xff] (!%p3908_p6), %v4951_v0 }
  0xb5   : > { %387 = vst [vmem:[#allocation2 + $0x30] sm:$0xff] (!%p3908_p6), %v4951_v0  ;;  %388 = vst [vmem:[#allocation2 + $0x38] sm:$0xff] (!%p3908_p6), %v4951_v0 }
  0xb6   : > { %389 = vst [vmem:[#allocation2 + $0x40] sm:$0xff] (!%p3908_p6), %v4951_v0  ;;  %390 = vst [vmem:[#allocation2 + $0x48] sm:$0xff] (!%p3908_p6), %v4951_v0 }
  0xb7   : > { %391 = vst [vmem:[#allocation2 + $0x50] sm:$0xff] (!%p3908_p6), %v4951_v0  ;;  %392 = vst [vmem:[#allocation2 + $0x58] sm:$0xff] (!%p3908_p6), %v4951_v0 }
  0xb8   : > { %393 = vst [vmem:[#allocation2 + $0x60] sm:$0xff] (!%p3908_p6), %v4951_v0  ;;  %394 = vst [vmem:[#allocation2 + $0x68] sm:$0xff] (!%p3908_p6), %v4951_v0 }
  0xb9   : > { %395 = vst [vmem:[#allocation2 + $0x70] sm:$0xff] %v4951_v0  ;;  %396 = vst [vmem:[#allocation2 + $0x78] sm:$0xff] %v4951_v0 }
  0xba   : > { %397 = vst [vmem:[#allocation2 + $0x80] sm:$0xff] %v4951_v0  ;;  %398 = vst [vmem:[#allocation2 + $0x88] sm:$0xff] %v4951_v0 }
  0xbb   : > { %399 = vst [vmem:[#allocation2 + $0x90] sm:$0xff] %v4951_v0  ;;  %400 = vst [vmem:[#allocation2 + $0x98] sm:$0xff] %v4951_v0 }
  0xbc   : > { %401 = vst [vmem:[#allocation2 + $0xa0] sm:$0xff] %v4951_v0  ;;  %402 = vst [vmem:[#allocation2 + $0xa8] sm:$0xff] %v4951_v0 }
  0xbd   : > { %403 = vst [vmem:[#allocation2 + $0xb0] sm:$0xff] %v4951_v0  ;;  %404 = vst [vmem:[#allocation2 + $0xb8] sm:$0xff] %v4951_v0 }
  0xbe   : > { %405 = vst [vmem:[#allocation2 + $0xc0] sm:$0xff] %v4951_v0  ;;  %406 = vst [vmem:[#allocation2 + $0xc8] sm:$0xff] %v4951_v0 }
  0xbf   : > { %407 = vst [vmem:[#allocation2 + $0xd0] sm:$0xff] %v4951_v0  ;;  %408 = vst [vmem:[#allocation2 + $0xd8] sm:$0xff] %v4951_v0 }
  0xc0   : > { %409 = vst [vmem:[#allocation2 + $0xe0] sm:$0xff] %v4951_v0  ;;  %410 = vst [vmem:[#allocation2 + $0xe8] sm:$0xff] %v4951_v0 }
  0xc1   : > { %411 = vst [vmem:[#allocation2 + $0xf0] sm:$0xff] %v4951_v0  ;;  %412 = vst [vmem:[#allocation2 + $0xf8] sm:$0xff] %v4951_v0 }
  0xc2   : > { %413 = vst [vmem:[#allocation2 + $0x100] sm:$0xff] %v4951_v0  ;;  %414 = vst [vmem:[#allocation2 + $0x108] sm:$0xff] %v4951_v0 }
  0xc3   : > { %415 = vst [vmem:[#allocation2 + $0x110] sm:$0xff] %v4951_v0  ;;  %416 = vst [vmem:[#allocation2 + $0x118] sm:$0xff] %v4951_v0 }
  0xc4   : > { %417 = vst [vmem:[#allocation2 + $0x120] sm:$0xff] %v4951_v0  ;;  %418 = vst [vmem:[#allocation2 + $0x128] sm:$0xff] %v4951_v0 }
  0xc5   : > { %419 = vst [vmem:[#allocation2 + $0x130] sm:$0xff] %v4951_v0  ;;  %420 = vst [vmem:[#allocation2 + $0x138] sm:$0xff] %v4951_v0 }
  0xc6   : > { %421 = vst [vmem:[#allocation2 + $0x140] sm:$0xff] %v4951_v0  ;;  %422 = vst [vmem:[#allocation2 + $0x148] sm:$0xff] %v4951_v0 }
  0xc7   : > { %423 = vst [vmem:[#allocation2 + $0x150] sm:$0xff] %v4951_v0  ;;  %424 = vst [vmem:[#allocation2 + $0x158] sm:$0xff] %v4951_v0 }
  0xc8   : > { %425 = vst [vmem:[#allocation2 + $0x160] sm:$0xff] %v4951_v0  ;;  %426 = vst [vmem:[#allocation2 + $0x168] sm:$0xff] %v4951_v0 }
  0xc9   : > { %427 = vst [vmem:[#allocation2 + $0x170] sm:$0xff] %v4951_v0  ;;  %428 = vst [vmem:[#allocation2 + $0x178] sm:$0xff] %v4951_v0 }
  0xca   : > { %429 = vst [vmem:[#allocation2 + $0x180] sm:$0xff] %v4951_v0  ;;  %430 = vst [vmem:[#allocation2 + $0x188] sm:$0xff] %v4951_v0 }
  0xcb   : > { %431 = vst [vmem:[#allocation2 + $0x190] sm:$0xff] %v4951_v0  ;;  %432 = vst [vmem:[#allocation2 + $0x198] sm:$0xff] %v4951_v0 }
  0xcc   : > { %433 = vst [vmem:[#allocation2 + $0x1a0] sm:$0xff] %v4951_v0  ;;  %434 = vst [vmem:[#allocation2 + $0x1a8] sm:$0xff] %v4951_v0 }
  0xcd   : > { %435 = vst [vmem:[#allocation2 + $0x1b0] sm:$0xff] %v4951_v0  ;;  %436 = vst [vmem:[#allocation2 + $0x1b8] sm:$0xff] %v4951_v0 }
  0xce   : > { %437 = vst [vmem:[#allocation2 + $0x1c0] sm:$0xff] %v4951_v0  ;;  %438 = vst [vmem:[#allocation2 + $0x1c8] sm:$0xff] %v4951_v0 }
  0xcf   : > { %439 = vst [vmem:[#allocation2 + $0x1d0] sm:$0xff] %v4951_v0  ;;  %440 = vst [vmem:[#allocation2 + $0x1d8] sm:$0xff] %v4951_v0 }
  0xd0   : > { %441 = vst [vmem:[#allocation2 + $0x1e0] sm:$0xff] %v4951_v0  ;;  %442 = vst [vmem:[#allocation2 + $0x1e8] sm:$0xff] %v4951_v0 }
  0xd1   : > { %443 = vst [vmem:[#allocation2 + $0x1f0] sm:$0xff] %v4951_v0  ;;  %444 = vst [vmem:[#allocation2 + $0x1f8] sm:$0xff] %v4951_v0 }
  0xd2 PF: > { %v4241_v1 = vld [vmem:[%s5303_s4 + $0x4] ss:$16 sps:$4 sm:$0xff]   ;;  %v4243_v2 = vld [vmem:[%s5303_s4] ss:$16 sps:$4 sm:$0xff]   ;;  %v446_v14 = vld [vmem:[%s5295_s13 + $0x8] sm:$0xff]  ;;  %p4037_p4 = scmp.ne.s32.totalorder %s4924_s24, 1 }
  0xd3   : > { %947 = vmatprep.subr.bf16.mxu1 %v4241_v1  ;;  %v4244_v3 = vld [vmem:[%s5303_s4 + $0x24] ss:$16 sps:$4 sm:$0xff]   ;;  %v4246_v4 = vld [vmem:[%s5303_s4 + $0x20] ss:$16 sps:$4 sm:$0xff]   ;;  %v448_v15 = vld [vmem:[%s5295_s13 + $0x18] sm:$0xff]  ;;  %s7699_s23 = sld [smem:[#allocation41_spill]] (!%p4037_p4) }
  0xd4   : > { %948 = vmatpush1.bf16.msra.mxu1 %v4243_v2  ;;  %v4247_v5 = vld [vmem:[%s5303_s4 + $0x44] ss:$16 sps:$4 sm:$0xff]   ;;  %v4249_v6 = vld [vmem:[%s5303_s4 + $0x40] ss:$16 sps:$4 sm:$0xff]   ;;  %v5399_v16 = vpack.c.bf16 %v448_v15, %v446_v14  ;;  %v4291_v38 = vld [vmem:[%s5303_s4 + $0xc] ss:$16 sps:$4 sm:$0xff]  }
  0xd5   : > { %949 = vmatprep.subr.bf16.mxu1 %v4244_v3  ;;  %v4250_v7 = vld [vmem:[%s5303_s4 + $0x64] ss:$16 sps:$4 sm:$0xff]   ;;  %v4252_v8 = vld [vmem:[%s5303_s4 + $0x60] ss:$16 sps:$4 sm:$0xff]   ;;  %v450_v39 = vld [vmem:[%s5295_s13 + $0x28] sm:$0xff] }
  0xd6   : > { %v4253_v9 = vld [vmem:[%s5303_s4 + $0x84] ss:$16 sps:$4 sm:$0xff]   ;;  %v4255_v10 = vld [vmem:[%s5303_s4 + $0x80] ss:$16 sps:$4 sm:$0xff]   ;;  %979 = vmatprep.mubr.bf16.mxu1 %v5399_v16  ;;  %v452_v40 = vld [vmem:[%s5295_s13 + $0x38] sm:$0xff] }
  0xd7   : > { %v4256_v11 = vld [vmem:[%s5303_s4 + $0xa4] ss:$16 sps:$4 sm:$0xff]   ;;  %v4258_v12 = vld [vmem:[%s5303_s4 + $0xa0] ss:$16 sps:$4 sm:$0xff]   ;;  %v4289_v42 = vld [vmem:[%s5303_s4 + $0x8] ss:$16 sps:$4 sm:$0xff]   ;;  %v5429_v43 = vpack.c.bf16 %v452_v40, %v450_v39 }
  0xd8   : > { %950 = vmatpush1.bf16.msra.mxu1 %v4246_v4  ;;  %v4259_v13 = vld [vmem:[%s5303_s4 + $0xc4] ss:$16 sps:$4 sm:$0xff]   ;;  %v4261_v17 = vld [vmem:[%s5303_s4 + $0xc0] ss:$16 sps:$4 sm:$0xff]   ;;  %v4294_v44 = vld [vmem:[%s5303_s4 + $0x2c] ss:$16 sps:$4 sm:$0xff]  }
  0xd9   : > { %951 = vmatprep.subr.bf16.mxu1 %v4247_v5  ;;  %v4262_v18 = vld [vmem:[%s5303_s4 + $0xe4] ss:$16 sps:$4 sm:$0xff]   ;;  %v4264_v19 = vld [vmem:[%s5303_s4 + $0xe0] ss:$16 sps:$4 sm:$0xff]   ;;  %v4292_v47 = vld [vmem:[%s5303_s4 + $0x28] ss:$16 sps:$4 sm:$0xff]  }
  0xda   : > { %v4265_v20 = vld [vmem:[%s5303_s4 + $0x104] ss:$16 sps:$4 sm:$0xff]   ;;  %v4267_v21 = vld [vmem:[%s5303_s4 + $0x100] ss:$16 sps:$4 sm:$0xff]   ;;  %v454_v48 = vld [vmem:[%s5295_s13 + $0x48] sm:$0xff] }
  0xdb   : > { %v4268_v22 = vld [vmem:[%s5303_s4 + $0x124] ss:$16 sps:$4 sm:$0xff]   ;;  %v4270_v23 = vld [vmem:[%s5303_s4 + $0x120] ss:$16 sps:$4 sm:$0xff]   ;;  %v456_v49 = vld [vmem:[%s5295_s13 + $0x58] sm:$0xff] }
  0xdc   : > { %952 = vmatpush1.bf16.msra.mxu1 %v4249_v6  ;;  %v4271_v24 = vld [vmem:[%s5303_s4 + $0x144] ss:$16 sps:$4 sm:$0xff]   ;;  %v4273_v25 = vld [vmem:[%s5303_s4 + $0x140] ss:$16 sps:$4 sm:$0xff]   ;;  %v4297_v50 = vld [vmem:[%s5303_s4 + $0x4c] ss:$16 sps:$4 sm:$0xff]   ;;  %v5444_v54 = vpack.c.bf16 %v456_v49, %v454_v48 }
  0xdd   : > { %953 = vmatprep.subr.bf16.mxu1 %v4250_v7  ;;  %v4274_v26 = vld [vmem:[%s5303_s4 + $0x164] ss:$16 sps:$4 sm:$0xff]   ;;  %v4276_v27 = vld [vmem:[%s5303_s4 + $0x160] ss:$16 sps:$4 sm:$0xff]   ;;  %v4295_v51 = vld [vmem:[%s5303_s4 + $0x48] ss:$16 sps:$4 sm:$0xff]  }
  0xde   : > { %v4277_v28 = vld [vmem:[%s5303_s4 + $0x184] ss:$16 sps:$4 sm:$0xff]   ;;  %v4279_v29 = vld [vmem:[%s5303_s4 + $0x180] ss:$16 sps:$4 sm:$0xff]   ;;  %v4300_v53 = vld [vmem:[%s5303_s4 + $0x6c] ss:$16 sps:$4 sm:$0xff]  }
  0xdf   : > { %v4280_v30 = vld [vmem:[%s5303_s4 + $0x1a4] ss:$16 sps:$4 sm:$0xff]   ;;  %v4282_v31 = vld [vmem:[%s5303_s4 + $0x1a0] ss:$16 sps:$4 sm:$0xff]   ;;  %v4298_v57 = vld [vmem:[%s5303_s4 + $0x68] ss:$16 sps:$4 sm:$0xff]  }
  0xe0   : > { %954 = vmatpush1.bf16.msra.mxu1 %v4252_v8  ;;  %v4283_v32 = vld [vmem:[%s5303_s4 + $0x1c4] ss:$16 sps:$4 sm:$0xff]   ;;  %v4285_v33 = vld [vmem:[%s5303_s4 + $0x1c0] ss:$16 sps:$4 sm:$0xff]   ;;  %v458_v58 = vld [vmem:[%s5295_s13 + $0x68] sm:$0xff] }
  0xe1   : > { %955 = vmatprep.subr.bf16.mxu1 %v4253_v9  ;;  %v4286_v34 = vld [vmem:[%s5303_s4 + $0x1e4] ss:$16 sps:$4 sm:$0xff]   ;;  %v4288_v35 = vld [vmem:[%s5303_s4 + $0x1e0] ss:$16 sps:$4 sm:$0xff]   ;;  %v460_v59 = vld [vmem:[%s5295_s13 + $0x78] sm:$0xff] }
  0xe2   : > { %v445_v36 = vld [vmem:[%s5295_s13] sm:$0xff]  ;;  %v447_v37 = vld [vmem:[%s5295_s13 + $0x10] sm:$0xff]  ;;  %v4303_v60 = vld [vmem:[%s5303_s4 + $0x8c] ss:$16 sps:$4 sm:$0xff]   ;;  %v5458_v0 = vpack.c.bf16 %v460_v59, %v458_v58 }
  0xe3   : > { %v5426_v41 = vpack.c.bf16 %v447_v37, %v445_v36  ;;  %v449_v45 = vld [vmem:[%s5295_s13 + $0x20] sm:$0xff]  ;;  %v451_v46 = vld [vmem:[%s5295_s13 + $0x30] sm:$0xff]  ;;  %v4301_v61 = vld [vmem:[%s5303_s4 + $0x88] ss:$16 sps:$4 sm:$0xff]  }
  0xe4   : > { %956 = vmatpush1.bf16.msra.mxu1 %v4255_v10  ;;  %v5441_v52 = vpack.c.bf16 %v451_v46, %v449_v45  ;;  %v453_v55 = vld [vmem:[%s5295_s13 + $0x40] sm:$0xff]  ;;  %v455_v56 = vld [vmem:[%s5295_s13 + $0x50] sm:$0xff]  ;;  %v4306_v63 = vld [vmem:[%s5303_s4 + $0xac] ss:$16 sps:$4 sm:$0xff]  }
  0xe5   : > { %957 = vmatprep.subr.bf16.mxu1 %v4256_v11  ;;  %v5455_v62 = vpack.c.bf16 %v455_v56, %v453_v55  ;;  %v457_v1 = vld [vmem:[%s5295_s13 + $0x60] sm:$0xff]  ;;  %v459_v2 = vld [vmem:[%s5295_s13 + $0x70] sm:$0xff]  ;;  %v4304_v3 = vld [vmem:[%s5303_s4 + $0xa8] ss:$16 sps:$4 sm:$0xff]  }
  0xe6   : > { %v462_v4 = vld [vmem:[%s5295_s13 + $0x88] sm:$0xff]  ;;  %v464_v5 = vld [vmem:[%s5295_s13 + $0x98] sm:$0xff]  ;;  %v5468_v7 = vpack.c.bf16 %v459_v2, %v457_v1  ;;  %v461_v11 = vld [vmem:[%s5295_s13 + $0x80] sm:$0xff] }
  0xe7   : > { %v4309_v6 = vld [vmem:[%s5303_s4 + $0xcc] ss:$16 sps:$4 sm:$0xff]   ;;  %v5470_v8 = vpack.c.bf16 %v464_v5, %v462_v4  ;;  %v4307_v9 = vld [vmem:[%s5303_s4 + $0xc8] ss:$16 sps:$4 sm:$0xff]   ;;  %v475_v45 = vld [vmem:[%s5295_s13 + $0xf0] sm:$0xff] }
  0xe8   : > { %958 = vmatpush1.bf16.msra.mxu1 %v4258_v12  ;;  %v4312_v10 = vld [vmem:[%s5303_s4 + $0xec] ss:$16 sps:$4 sm:$0xff]   ;;  %v463_v12 = vld [vmem:[%s5295_s13 + $0x90] sm:$0xff]  ;;  %v4325_v40 = vld [vmem:[%s5303_s4 + $0x188] ss:$16 sps:$4 sm:$0xff]  }
  0xe9   : > { %959 = vmatprep.subr.bf16.mxu1 %v4259_v13  ;;  %v4310_v13 = vld [vmem:[%s5303_s4 + $0xe8] ss:$16 sps:$4 sm:$0xff]   ;;  %v4327_v37 = vld [vmem:[%s5303_s4 + $0x18c] ss:$16 sps:$4 sm:$0xff]   ;;  %v477_v58 = vld [vmem:[%s5295_s13 + $0x100] sm:$0xff] }
  0xea   : > { %v466_v14 = vld [vmem:[%s5295_s13 + $0xa8] sm:$0xff]  ;;  %v468_v15 = vld [vmem:[%s5295_s13 + $0xb8] sm:$0xff] }
  0xeb   : > { %v476_v36 = vld [vmem:[%s5295_s13 + $0xf8] sm:$0xff]  ;;  %v478_v48 = vld [vmem:[%s5295_s13 + $0x108] sm:$0xff] }
  0xec   : > { %960 = vmatpush1.bf16.msra.mxu1 %v4261_v17  ;;  %v4315_v17 = vld [vmem:[%s5303_s4 + $0x10c] ss:$16 sps:$4 sm:$0xff]   ;;  %v4328_v46 = vld [vmem:[%s5303_s4 + $0x1a8] ss:$16 sps:$4 sm:$0xff]  }
  0xed   : > { %961 = vmatprep.subr.bf16.mxu1 %v4262_v18  ;;  %v5482_v18 = vpack.c.bf16 %v463_v12, %v461_v11  ;;  %v480_v49 = vld [vmem:[%s5295_s13 + $0x118] sm:$0xff]  ;;  %v4343_v1 = vld [vmem:[%s5311_s29 + $0x24] ss:$8 sps:$4 sm:$0xff]   ;;  %v481_v11 = vld [vmem:[%s5295_s13 + $0x120] sm:$0xff] }
  0xee   : > { %v4331_v55 = vld [vmem:[%s5303_s4 + $0x1c8] ss:$16 sps:$4 sm:$0xff]   ;;  %v4336_v56 = vld [vmem:[%s5303_s4 + $0x1ec] ss:$16 sps:$4 sm:$0xff]   ;;  %v483_v12 = vld [vmem:[%s5295_s13 + $0x130] sm:$0xff] }
  0xef   : > { %v4340_v59 = vld [vmem:[%s5311_s29 + $0x14] ss:$8 sps:$4 sm:$0xff]   ;;  %v482_v2 = vld [vmem:[%s5295_s13 + $0x128] sm:$0xff] }
  0xf0   : > { %962 = vmatpush1.bf16.msra.mxu1 %v4264_v19  ;;  %v5484_v19 = vpack.c.bf16 %v468_v15, %v466_v14  ;;  %v486_v14 = vld [vmem:[%s5295_s13 + $0x148] sm:$0xff]  ;;  %v488_v15 = vld [vmem:[%s5295_s13 + $0x158] sm:$0xff] }
  0xf1   : > { %963 = vmatprep.subr.bf16.mxu1 %v4265_v20  ;;  %v4313_v20 = vld [vmem:[%s5303_s4 + $0x108] ss:$16 sps:$4 sm:$0xff]  }
  0xf4   : > { %964 = vmatpush1.bf16.msra.mxu1 %v4267_v21  ;;  %v4318_v21 = vld [vmem:[%s5303_s4 + $0x12c] ss:$16 sps:$4 sm:$0xff]  }
  0xf5   : > { %965 = vmatprep.subr.bf16.mxu1 %v4268_v22  ;;  %v465_v22 = vld [vmem:[%s5295_s13 + $0xa0] sm:$0xff] }
  0xf8   : > { %966 = vmatpush1.bf16.msra.mxu1 %v4270_v23  ;;  %v467_v23 = vld [vmem:[%s5295_s13 + $0xb0] sm:$0xff] }
  0xf9   : > { %967 = vmatprep.subr.bf16.mxu1 %v4271_v24  ;;  %v4316_v24 = vld [vmem:[%s5303_s4 + $0x128] ss:$16 sps:$4 sm:$0xff]  }
  0xfc   : > { %968 = vmatpush1.bf16.msra.mxu1 %v4273_v25  ;;  %v470_v25 = vld [vmem:[%s5295_s13 + $0xc8] sm:$0xff] }
  0xfd   : > { %969 = vmatprep.subr.bf16.mxu1 %v4274_v26  ;;  %v472_v26 = vld [vmem:[%s5295_s13 + $0xd8] sm:$0xff] }
 0x100   : > { %970 = vmatpush1.bf16.msra.mxu1 %v4276_v27  ;;  %v4321_v27 = vld [vmem:[%s5303_s4 + $0x14c] ss:$16 sps:$4 sm:$0xff]  }
 0x101   : > { %971 = vmatprep.subr.bf16.mxu1 %v4277_v28  ;;  %v5496_v28 = vpack.c.bf16 %v467_v23, %v465_v22  ;;  %v4352_v22 = vld [vmem:[%s5311_s29 + $0x54] ss:$8 sps:$4 sm:$0xff]   ;;  %v4354_v23 = vld [vmem:[%s5311_s29 + $0x50] ss:$8 sps:$4 sm:$0xff]  }
 0x104   : > { %972 = vmatpush1.bf16.msra.mxu1 %v4279_v29  ;;  %v5498_v29 = vpack.c.bf16 %v472_v26, %v470_v25  ;;  %v487_v25 = vld [vmem:[%s5295_s13 + $0x150] sm:$0xff] }
 0x105   : > { %973 = vmatprep.subr.bf16.mxu1 %v4280_v30  ;;  %v4319_v30 = vld [vmem:[%s5303_s4 + $0x148] ss:$16 sps:$4 sm:$0xff]   ;;  %v4355_v26 = vld [vmem:[%s5311_s29 + $0x64] ss:$8 sps:$4 sm:$0xff]  }
 0x108   : > { %974 = vmatpush1.bf16.msra.mxu1 %v4282_v31  ;;  %v4324_v31 = vld [vmem:[%s5303_s4 + $0x16c] ss:$16 sps:$4 sm:$0xff]  }
 0x109   : > { %975 = vmatprep.subr.bf16.mxu1 %v4283_v32  ;;  %v469_v32 = vld [vmem:[%s5295_s13 + $0xc0] sm:$0xff] }
 0x10c   : > { %976 = vmatpush1.bf16.msra.mxu1 %v4285_v33  ;;  %v471_v33 = vld [vmem:[%s5295_s13 + $0xd0] sm:$0xff] }
 0x10d   : > { %977 = vmatprep.subr.bf16.mxu1 %v4286_v34  ;;  %v4322_v34 = vld [vmem:[%s5303_s4 + $0x168] ss:$16 sps:$4 sm:$0xff]  }
 0x110   : > { %978 = vmatpush1.bf16.msra.mxu1 %v4288_v35  ;;  %v474_v35 = vld [vmem:[%s5295_s13 + $0xe8] sm:$0xff] }
 0x111   : > { %1140 = vmatprep.subr.bf16.mxu1 %v4291_v38  ;;  %v5510_v38 = vpack.c.bf16 %v471_v33, %v469_v32  ;;  %v5512_v39 = vpack.c.bf16 %v476_v36, %v474_v35  ;;  %v4357_v33 = vld [vmem:[%s5311_s29 + $0x60] ss:$8 sps:$4 sm:$0xff]   ;;  %v4358_v36 = vld [vmem:[%s5311_s29 + $0x74] ss:$8 sps:$4 sm:$0xff]  }
 0x112   : > { %v491_v35 = vld [vmem:[%s5295_s13 + $0x170] sm:$0xff] }
 0x113   : > { %980 = vmatmul.mubr.bf16.vlgmr.msra.gmra.mrb[0].mxu1 %v5426_v41 }
 0x114   : > { %1141 = vmatpush1.bf16.msra.mxu1 %v4289_v42  ;;  %989 = vmatprep.mubr.bf16.mxu1 %v5429_v43  ;;  %v4330_v42 = vld [vmem:[%s5303_s4 + $0x1ac] ss:$16 sps:$4 sm:$0xff]  }
 0x115   : > { %1142 = vmatprep.subr.bf16.mxu1 %v4294_v44  ;;  %v473_v44 = vld [vmem:[%s5295_s13 + $0xe0] sm:$0xff] }
 0x118   : > { %1143 = vmatpush1.bf16.msra.mxu1 %v4292_v47  ;;  %v4337_v47 = vld [vmem:[%s5311_s29 + $0x4] ss:$8 sps:$4 sm:$0xff]  }
 0x119   : > { %1144 = vmatprep.subr.bf16.mxu1 %v4297_v50  ;;  %v4333_v50 = vld [vmem:[%s5303_s4 + $0x1cc] ss:$16 sps:$4 sm:$0xff]   ;;  %2997 = vmatprep.subr.bf16.mxu0 %v4337_v47  ;;  %v4363_v47 = vld [vmem:[%s5311_s29 + $0x80] ss:$8 sps:$4 sm:$0xff]  }
 0x11b   : > { %990 = vmatmul.mubr.bf16.gmra.mrb[4].mxu1 %v5441_v52 }
 0x11c   : > { %999 = vmatprep.mubr.bf16.mxu1 %v5444_v54  ;;  %1145 = vmatpush1.bf16.msra.mxu1 %v4295_v51  ;;  %v5525_v51 = vpack.c.bf16 %v475_v45, %v473_v44 }
 0x11d   : > { %1146 = vmatprep.subr.bf16.mxu1 %v4300_v53  ;;  %v5527_v53 = vpack.c.bf16 %v480_v49, %v478_v48  ;;  %v493_v48 = vld [vmem:[%s5295_s13 + $0x180] sm:$0xff]  ;;  %v495_v49 = vld [vmem:[%s5295_s13 + $0x190] sm:$0xff] }
 0x120   : > { %1147 = vmatpush1.bf16.msra.mxu1 %v4298_v57  ;;  %v4339_v57 = vld [vmem:[%s5311_s29] ss:$8 sps:$4 sm:$0xff]  }
 0x121   : > { %1148 = vmatprep.subr.bf16.mxu1 %v4303_v60  ;;  %2998 = vmatpush1.bf16.msra.mxu0 %v4339_v57  ;;  %v4342_v60 = vld [vmem:[%s5311_s29 + $0x10] ss:$8 sps:$4 sm:$0xff]  }
 0x122   : > { %2999 = vmatprep.subr.bf16.mxu0 %v4340_v59  ;;  %v4366_v57 = vld [vmem:[%s5311_s29 + $0x90] ss:$8 sps:$4 sm:$0xff]  }
 0x123   : > { %1000 = vmatmul.mubr.bf16.gmra.mrb[8].mxu1 %v5455_v62 }
 0x124   : > { %1009 = vmatprep.mubr.bf16.mxu1 %v5458_v0  ;;  %1149 = vmatpush1.bf16.msra.mxu1 %v4301_v61  ;;  %v479_v61 = vld [vmem:[%s5295_s13 + $0x110] sm:$0xff] }
 0x125   : > { %1150 = vmatprep.subr.bf16.mxu1 %v4306_v63  ;;  %v4334_v63 = vld [vmem:[%s5303_s4 + $0x1e8] ss:$16 sps:$4 sm:$0xff]   ;;  %v5542_v4 = vpack.c.bf16 %v479_v61, %v477_v58  ;;  %3000 = vmatpush1.bf16.msra.mxu0 %v4342_v60  ;;  %v5597_v58 = vpack.c.bf16 %v495_v49, %v493_v48  ;;  %v4367_v60 = vld [vmem:[%s5311_s29 + $0xa4] ss:$8 sps:$4 sm:$0xff]  }
 0x126   : > { %3001 = vmatprep.subr.bf16.mxu0 %v4343_v1  ;;  %v4369_v61 = vld [vmem:[%s5311_s29 + $0xa0] ss:$8 sps:$4 sm:$0xff]  }
 0x127   : > { %v499_v1 = vld [vmem:[%s5295_s13 + $0x1b0] sm:$0xff] }
 0x128   : > { %1151 = vmatpush1.bf16.msra.mxu1 %v4304_v3  ;;  %v484_v3 = vld [vmem:[%s5295_s13 + $0x138] sm:$0xff] }
 0x129   : > { %1152 = vmatprep.subr.bf16.mxu1 %v4309_v6  ;;  %v5544_v5 = vpack.c.bf16 %v484_v3, %v482_v2  ;;  %v4345_v6 = vld [vmem:[%s5311_s29 + $0x20] ss:$8 sps:$4 sm:$0xff]   ;;  %v4370_v2 = vld [vmem:[%s5311_s29 + $0xb4] ss:$8 sps:$4 sm:$0xff]  }
 0x12a   : > { %3002 = vmatpush1.bf16.msra.mxu0 %v4345_v6  ;;  %v502_v3 = vld [vmem:[%s5295_s13 + $0x1c8] sm:$0xff]  ;;  %v504_v6 = vld [vmem:[%s5295_s13 + $0x1d8] sm:$0xff] }
 0x12b   : > { %1010 = vmatmul.mubr.bf16.gmra.mrb[12].mxu1 %v5468_v7 }
 0x12c   : > { %1019 = vmatprep.mubr.bf16.mxu1 %v5470_v8  ;;  %1153 = vmatpush1.bf16.msra.mxu1 %v4307_v9  ;;  %v4346_v9 = vld [vmem:[%s5311_s29 + $0x34] ss:$8 sps:$4 sm:$0xff]  }
 0x12d   : > { %1154 = vmatprep.subr.bf16.mxu1 %v4312_v10  ;;  %v4348_v10 = vld [vmem:[%s5311_s29 + $0x30] ss:$8 sps:$4 sm:$0xff]   ;;  %3003 = vmatprep.subr.bf16.mxu0 %v4346_v9 }
 0x12e   : > { %3004 = vmatpush1.bf16.msra.mxu0 %v4348_v10  ;;  %v4372_v9 = vld [vmem:[%s5311_s29 + $0xb0] ss:$8 sps:$4 sm:$0xff]  }
 0x130   : > { %1155 = vmatpush1.bf16.msra.mxu1 %v4310_v13  ;;  %v4349_v13 = vld [vmem:[%s5311_s29 + $0x44] ss:$8 sps:$4 sm:$0xff]  }
 0x131   : > { %1156 = vmatprep.subr.bf16.mxu1 %v4315_v17  ;;  %v5556_v17 = vpack.c.bf16 %v483_v12, %v481_v11  ;;  %3005 = vmatprep.subr.bf16.mxu0 %v4349_v13  ;;  %v5613_v11 = vpack.c.bf16 %v504_v6, %v502_v3  ;;  %v4373_v12 = vld [vmem:[%s5311_s29 + $0xc4] ss:$8 sps:$4 sm:$0xff]   ;;  %v4375_v13 = vld [vmem:[%s5311_s29 + $0xc0] ss:$8 sps:$4 sm:$0xff]  }
 0x133   : > { %1020 = vmatmul.mubr.bf16.gmra.mrb[16].mxu1 %v5482_v18 }
 0x134   : > { %1029 = vmatprep.mubr.bf16.mxu1 %v5484_v19  ;;  %1157 = vmatpush1.bf16.msra.mxu1 %v4313_v20  ;;  %v5558_v20 = vpack.c.bf16 %v488_v15, %v486_v14  ;;  %v501_v14 = vld [vmem:[%s5295_s13 + $0x1c0] sm:$0xff]  ;;  %v503_v15 = vld [vmem:[%s5295_s13 + $0x1d0] sm:$0xff] }
 0x135   : > { %1158 = vmatprep.subr.bf16.mxu1 %v4318_v21  ;;  %v4351_v21 = vld [vmem:[%s5311_s29 + $0x40] ss:$8 sps:$4 sm:$0xff]  }
 0x136   : > { %3006 = vmatpush1.bf16.msra.mxu0 %v4351_v21  ;;  %v4376_v21 = vld [vmem:[%s5311_s29 + $0xd4] ss:$8 sps:$4 sm:$0xff]  }
 0x137   : > { %3007 = vmatprep.subr.bf16.mxu0 %v4352_v22  ;;  %v506_v22 = vld [vmem:[%s5295_s13 + $0x1e8] sm:$0xff] }
 0x138   : > { %1159 = vmatpush1.bf16.msra.mxu1 %v4316_v24  ;;  %v485_v24 = vld [vmem:[%s5295_s13 + $0x140] sm:$0xff] }
 0x139   : > { %1160 = vmatprep.subr.bf16.mxu1 %v4321_v27  ;;  %v490_v27 = vld [vmem:[%s5295_s13 + $0x168] sm:$0xff] }
 0x13a   : > { %3008 = vmatpush1.bf16.msra.mxu0 %v4354_v23  ;;  %v508_v23 = vld [vmem:[%s5295_s13 + $0x1f8] sm:$0xff] }
 0x13b   : > { %1030 = vmatmul.mubr.bf16.gmra.mrb[20].mxu1 %v5496_v28  ;;  %3009 = vmatprep.subr.bf16.mxu0 %v4355_v26  ;;  %v5627_v26 = vpack.c.bf16 %v508_v23, %v506_v22 }
 0x13c   : > { %1039 = vmatprep.mubr.bf16.mxu1 %v5498_v29  ;;  %1161 = vmatpush1.bf16.msra.mxu1 %v4319_v30  ;;  %v492_v30 = vld [vmem:[%s5295_s13 + $0x178] sm:$0xff] }
 0x13d   : > { %1162 = vmatprep.subr.bf16.mxu1 %v4324_v31  ;;  %v5570_v31 = vpack.c.bf16 %v487_v25, %v485_v24  ;;  %v5572_v32 = vpack.c.bf16 %v492_v30, %v490_v27  ;;  %v4378_v24 = vld [vmem:[%s5311_s29 + $0xd0] ss:$8 sps:$4 sm:$0xff]   ;;  %v5625_v25 = vpack.c.bf16 %v503_v15, %v501_v14  ;;  %v4379_v27 = vld [vmem:[%s5311_s29 + $0xe4] ss:$8 sps:$4 sm:$0xff]   ;;  %v4381_v30 = vld [vmem:[%s5311_s29 + $0xe0] ss:$8 sps:$4 sm:$0xff]  }
 0x13e   : > { %3010 = vmatpush1.bf16.msra.mxu0 %v4357_v33  ;;  %v505_v33 = vld [vmem:[%s5295_s13 + $0x1e0] sm:$0xff] }
 0x13f   : > { %3011 = vmatprep.subr.bf16.mxu0 %v4358_v36  ;;  %v4384_v36 = vld [vmem:[%s5311_s29 + $0xf0] ss:$8 sps:$4 sm:$0xff]  }
 0x140   : > { %1163 = vmatpush1.bf16.msra.mxu1 %v4322_v34  ;;  %v489_v34 = vld [vmem:[%s5295_s13 + $0x160] sm:$0xff] }
 0x141   : > { %1164 = vmatprep.subr.bf16.mxu1 %v4327_v37  ;;  %v494_v37 = vld [vmem:[%s5295_s13 + $0x188] sm:$0xff]  ;;  %v5583_v44 = vpack.c.bf16 %v491_v35, %v489_v34  ;;  %v507_v34 = vld [vmem:[%s5295_s13 + $0x1f0] sm:$0xff]  ;;  %v4382_v35 = vld [vmem:[%s5311_s29 + $0xf4] ss:$8 sps:$4 sm:$0xff]  }
 0x143   : > { %1040 = vmatmul.mubr.bf16.gmra.mrb[24].mxu1 %v5510_v38 }
 0x144   : > { %1049 = vmatprep.mubr.bf16.mxu1 %v5512_v39  ;;  %1165 = vmatpush1.bf16.msra.mxu1 %v4325_v40  ;;  %v496_v40 = vld [vmem:[%s5295_s13 + $0x198] sm:$0xff] }
 0x145   : > { %1166 = vmatprep.subr.bf16.mxu1 %v4330_v42  ;;  %v4360_v42 = vld [vmem:[%s5311_s29 + $0x70] ss:$8 sps:$4 sm:$0xff]   ;;  %v5585_v45 = vpack.c.bf16 %v496_v40, %v494_v37  ;;  %v5637_v37 = vpack.c.bf16 %v507_v34, %v505_v33  ;;  %v4387_v40 = vld [vmem:[%s5311_s29 + $0x104] ss:$8 sps:$4 sm:$0xff]  }
 0x146   : > { %3012 = vmatpush1.bf16.msra.mxu0 %v4360_v42 }
 0x148   : > { %1167 = vmatpush1.bf16.msra.mxu1 %v4328_v46  ;;  %v4361_v46 = vld [vmem:[%s5311_s29 + $0x84] ss:$8 sps:$4 sm:$0xff]  }
 0x149   : > { %1168 = vmatprep.subr.bf16.mxu1 %v4333_v50  ;;  %3013 = vmatprep.subr.bf16.mxu0 %v4361_v46  ;;  %v4364_v50 = vld [vmem:[%s5311_s29 + $0x94] ss:$8 sps:$4 sm:$0xff]  }
 0x14a   : > { %3014 = vmatpush1.bf16.msra.mxu0 %v4363_v47 }
 0x14b   : > { %1050 = vmatmul.mubr.bf16.gmra.mrb[28].mxu1 %v5525_v51  ;;  %3015 = vmatprep.subr.bf16.mxu0 %v4364_v50 }
 0x14c   : > { %1059 = vmatprep.mubr.bf16.mxu1 %v5527_v53  ;;  %1169 = vmatpush1.bf16.msra.mxu1 %v4331_v55  ;;  %v498_v55 = vld [vmem:[%s5295_s13 + $0x1a8] sm:$0xff] }
 0x14d   : > { %1170 = vmatprep.subr.bf16.mxu1 %v4336_v56  ;;  %v500_v56 = vld [vmem:[%s5295_s13 + $0x1b8] sm:$0xff] }
 0x14e   : > { %3016 = vmatpush1.bf16.msra.mxu0 %v4366_v57  ;;  %v5599_v59 = vpack.c.bf16 %v500_v56, %v498_v55 }
 0x14f   : > { %3017 = vmatprep.subr.bf16.mxu0 %v4367_v60 }
 0x150   : > { %1171 = vmatpush1.bf16.msra.mxu1 %v4334_v63  ;;  %v497_v63 = vld [vmem:[%s5295_s13 + $0x1a0] sm:$0xff] }
 0x151   : > { %v5611_v10 = vpack.c.bf16 %v499_v1, %v497_v63 }
 0x152   : > { %3018 = vmatpush1.bf16.msra.mxu0 %v4369_v61 }
 0x153   : > { %1060 = vmatmul.mubr.bf16.gmra.mrb[32].mxu1 %v5542_v4  ;;  %3019 = vmatprep.subr.bf16.mxu0 %v4370_v2 }
 0x154   : > { %1069 = vmatprep.mubr.bf16.mxu1 %v5544_v5 }
 0x156   : > { %3020 = vmatpush1.bf16.msra.mxu0 %v4372_v9 }
 0x157   : > { %3021 = vmatprep.subr.bf16.mxu0 %v4373_v12 }
 0x15a   : > { %3022 = vmatpush1.bf16.msra.mxu0 %v4375_v13 }
 0x15b   : > { %1070 = vmatmul.mubr.bf16.gmra.mrb[36].mxu1 %v5556_v17  ;;  %3023 = vmatprep.subr.bf16.mxu0 %v4376_v21 }
 0x15c   : > { %1079 = vmatprep.mubr.bf16.mxu1 %v5558_v20 }
 0x15e   : > { %3024 = vmatpush1.bf16.msra.mxu0 %v4378_v24 }
 0x15f   : > { %3025 = vmatprep.subr.bf16.mxu0 %v4379_v27 }
 0x162   : > { %3026 = vmatpush1.bf16.msra.mxu0 %v4381_v30 }
 0x163   : > { %1080 = vmatmul.mubr.bf16.gmra.mrb[40].mxu1 %v5570_v31  ;;  %3027 = vmatprep.subr.bf16.mxu0 %v4382_v35 }
 0x164   : > { %1089 = vmatprep.mubr.bf16.mxu1 %v5572_v32 }
 0x166   : > { %3028 = vmatpush1.bf16.msra.mxu0 %v4384_v36 }
 0x167   : > { %3190 = vmatprep.subr.bf16.mxu0 %v4387_v40 }
 0x16b   : > { %1090 = vmatmul.mubr.bf16.gmra.mrb[44].mxu1 %v5583_v44 }
 0x16c   : > { %1099 = vmatprep.mubr.bf16.mxu1 %v5585_v45 }
 0x173   : > { %1100 = vmatmul.mubr.bf16.gmra.mrb[48].mxu1 %v5597_v58 }
 0x174   : > { %1109 = vmatprep.mubr.bf16.mxu1 %v5599_v59 }
 0x17b   : > { %1110 = vmatmul.mubr.bf16.gmra.mrb[52].mxu1 %v5611_v10 }
 0x17c   : > { %1119 = vmatprep.mubr.bf16.mxu1 %v5613_v11 }
 0x183   : > { %1120 = vmatmul.mubr.bf16.gmra.mrb[56].mxu1 %v5625_v25 }
 0x184   : > { %1129 = vmatprep.mubr.bf16.mxu1 %v5627_v26 }
 0x18b   : > { %1130 = vmatmul.mubr.bf16.gmra.mrb[60].mxu1 %v5637_v37 }
 0x18c   : > { %1172 = vmatprep.mubr.bf16.mxu1 %v5399_v16  ;;  %v607_v16 = vlaneseq }
 0x193   : > { %1173 = vmatmul.mubr.bf16.vlgmr.msra.gmra.mrb[64].mxu1 %v5426_v41  ;;  %v5661_v41 = vshrl.u32 %v607_v16, 7 }
 0x194   : > { %1182 = vmatprep.mubr.bf16.mxu1 %v5429_v43 }
 0x195   : > { %7655 = vst [vmem:[#allocation25_spill] sm:$0xff] %v5661_v41  ;;  %v7613_v43 = vsub.s32 0, %v5661_v41 }
 0x19b   : > { %1183 = vmatmul.mubr.bf16.gmra.mrb[68].mxu1 %v5441_v52  ;;  %v605_v52 = vld [vmem:[%s5309_s9] sm:$0xf] }
 0x19c   : > { %1192 = vmatprep.mubr.bf16.mxu1 %v5444_v54  ;;  %v7612_v54 = vsub.s32 1, %v5661_v41 }
 0x1a3   : > { %1193 = vmatmul.mubr.bf16.gmra.mrb[72].mxu1 %v5455_v62  ;;  %v5670_v62 = vrot.slane %v605_v52, %v7613_v43 }
 0x1a4   : > { %1202 = vmatprep.mubr.bf16.mxu1 %v5458_v0  ;;  %v5674_v0 = vrot.slane %v605_v52, %v7612_v54 }
 0x1ab   : > { %1203 = vmatmul.mubr.bf16.gmra.mrb[76].mxu1 %v5468_v7 }
 0x1ac   : > { %1212 = vmatprep.mubr.bf16.mxu1 %v5470_v8 }
 0x1b3   : > { %1213 = vmatmul.mubr.bf16.gmra.mrb[80].mxu1 %v5482_v18 }
 0x1b4   : > { %1222 = vmatprep.mubr.bf16.mxu1 %v5484_v19 }
 0x1bb   : > { %1223 = vmatmul.mubr.bf16.gmra.mrb[84].mxu1 %v5496_v28 }
 0x1bc   : > { %1232 = vmatprep.mubr.bf16.mxu1 %v5498_v29 }
 0x1c3   : > { %1233 = vmatmul.mubr.bf16.gmra.mrb[88].mxu1 %v5510_v38 }
 0x1c4   : > { %1242 = vmatprep.mubr.bf16.mxu1 %v5512_v39 }
 0x1cb   : > { %1243 = vmatmul.mubr.bf16.gmra.mrb[92].mxu1 %v5525_v51 }
 0x1cc   : > { %1252 = vmatprep.mubr.bf16.mxu1 %v5527_v53 }
 0x1d3   : > { %1253 = vmatmul.mubr.bf16.gmra.mrb[96].mxu1 %v5542_v4 }
 0x1d4   : > { %1262 = vmatprep.mubr.bf16.mxu1 %v5544_v5 }
 0x1db   : > { %1263 = vmatmul.mubr.bf16.gmra.mrb[100].mxu1 %v5556_v17 }
 0x1dc   : > { %1272 = vmatprep.mubr.bf16.mxu1 %v5558_v20 }
 0x1e3   : > { %1273 = vmatmul.mubr.bf16.gmra.mrb[104].mxu1 %v5570_v31 }
 0x1e4   : > { %1282 = vmatprep.mubr.bf16.mxu1 %v5572_v32 }
 0x1e6   : > { %v981_v7 = vpop.f32.mrb[0].mxu1 }
 0x1e7   : > { %v5678_v8 = vadd.f32 %v981_v7, %v5670_v62  ;;  %v983_v18 = vpop.f32.mrb[1].mxu1 }
 0x1e8   : > { %v5681_v19 = vadd.f32 %v983_v18, %v5674_v0  ;;  %v985_v28 = vpop.f32.mrb[2].mxu1 }
 0x1e9   : > { %v1333_v29 = vmul.f32 %v5678_v8, %v5678_v8  ;;  %v5686_v38 = vadd.f32 %v985_v28, %v5670_v62  ;;  %v987_v39 = vpop.f32.mrb[3].mxu1 }
 0x1ea   : > { %v1334_v51 = vmul.f32 %v5681_v19, %v5681_v19  ;;  %v5691_v53 = vadd.f32 %v987_v39, %v5674_v0 }
 0x1eb   : > { %v1461_v4 = vmul.f32 %v1333_v29, %v5678_v8  ;;  %v1337_v5 = vmul.f32 %v5686_v38, %v5686_v38  ;;  %1283 = vmatmul.mubr.bf16.gmra.mrb[108].mxu1 %v5583_v44 }
 0x1ec   : > { %v1462_v17 = vmul.f32 %v1334_v51, %v5681_v19  ;;  %v1338_v20 = vmul.f32 %v5691_v53, %v5691_v53  ;;  %1292 = vmatprep.mubr.bf16.mxu1 %v5585_v45 }
 0x1ed   : > { %v1589_v31 = vmul.f32 0.044715, %v1461_v4  ;;  %v1465_v32 = vmul.f32 %v1337_v5, %v5686_v38 }
 0x1ee   : > { %v1590_v42 = vmul.f32 0.044715, %v1462_v17  ;;  %v1466_v46 = vmul.f32 %v1338_v20, %v5691_v53  ;;  %v991_v47 = vpop.f32.mrb[4].mxu1 }
 0x1ef   : > { %v1717_v48 = vadd.f32 %v1589_v31, %v5678_v8  ;;  %v1593_v49 = vmul.f32 0.044715, %v1465_v32  ;;  %v5705_v50 = vadd.f32 %v991_v47, %v5670_v62  ;;  %v993_v44 = vpop.f32.mrb[5].mxu1 }
 0x1f0   : > { %v1594_v55 = vmul.f32 0.044715, %v1466_v46  ;;  %v5708_v56 = vadd.f32 %v993_v44, %v5674_v0  ;;  %v995_v57 = vpop.f32.mrb[6].mxu1  ;;  %v1718_v45 = vadd.f32 %v1590_v42, %v5681_v19 }
 0x1f1   : > { %v1845_v60 = vmul.f32 0.7978846, %v1717_v48  ;;  %v1721_v61 = vadd.f32 %v1593_v49, %v5686_v38  ;;  %v1341_v63 = vmul.f32 %v5705_v50, %v5705_v50  ;;  %v5715_v1 = vadd.f32 %v995_v57, %v5670_v62  ;;  %v997_v2 = vpop.f32.mrb[7].mxu1 }
 0x1f2   : > { %v1342_v3 = vmul.f32 %v5708_v56, %v5708_v56  ;;  %v5720_v6 = vadd.f32 %v997_v2, %v5674_v0  ;;  %v1722_v9 = vadd.f32 %v1594_v55, %v5691_v53  ;;  %v1846_v12 = vmul.f32 0.7978846, %v1718_v45 }
 0x1f3   : > { %4433 = vtanh.f32 %v1845_v60  ;;  %v1849_v13 = vmul.f32 0.7978846, %v1721_v61  ;;  %v1469_v14 = vmul.f32 %v1341_v63, %v5705_v50  ;;  %v1345_v15 = vmul.f32 %v5715_v1, %v5715_v1  ;;  %1293 = vmatmul.mubr.bf16.gmra.mrb[112].mxu1 %v5597_v58 }
 0x1f4   : > { %v1470_v21 = vmul.f32 %v1342_v3, %v5708_v56  ;;  %v1346_v22 = vmul.f32 %v5720_v6, %v5720_v6  ;;  %1302 = vmatprep.mubr.bf16.mxu1 %v5599_v59  ;;  %v1850_v23 = vmul.f32 0.7978846, %v1722_v9  ;;  %4435 = vtanh.f32 %v1846_v12 }
 0x1f5   : > { %4437 = vtanh.f32 %v1849_v13  ;;  %v1597_v24 = vmul.f32 0.044715, %v1469_v14  ;;  %v1473_v27 = vmul.f32 %v1345_v15, %v5715_v1 }
 0x1f6   : > { %v1598_v30 = vmul.f32 0.044715, %v1470_v21  ;;  %v1474_v33 = vmul.f32 %v1346_v22, %v5720_v6  ;;  %v1001_v34 = vpop.f32.mrb[8].mxu1  ;;  %4439 = vtanh.f32 %v1850_v23 }
 0x1f7   : > { %v1725_v35 = vadd.f32 %v1597_v24, %v5705_v50  ;;  %v1601_v58 = vmul.f32 0.044715, %v1473_v27  ;;  %v5735_v36 = vadd.f32 %v1001_v34, %v5670_v62  ;;  %v1003_v40 = vpop.f32.mrb[9].mxu1 }
 0x1f8   : > { %v1726_v16 = vadd.f32 %v1598_v30, %v5708_v56  ;;  %v1602_v59 = vmul.f32 0.044715, %v1474_v33  ;;  %v5739_v52 = vadd.f32 %v1003_v40, %v5674_v0  ;;  %v1005_v7 = vpop.f32.mrb[10].mxu1 }
 0x1f9   : > { %v1853_v18 = vmul.f32 0.7978846, %v1725_v35  ;;  %v1729_v28 = vadd.f32 %v1601_v58, %v5715_v1  ;;  %v1349_v29 = vmul.f32 %v5735_v36, %v5735_v36  ;;  %v5745_v39 = vadd.f32 %v1005_v7, %v5670_v62  ;;  %v1007_v51 = vpop.f32.mrb[11].mxu1 }
 0x1fa   : > { %v1854_v4 = vmul.f32 0.7978846, %v1726_v16  ;;  %v1730_v5 = vadd.f32 %v1602_v59, %v5720_v6  ;;  %v1350_v17 = vmul.f32 %v5739_v52, %v5739_v52  ;;  %v5751_v20 = vadd.f32 %v1007_v51, %v5674_v0 }
 0x1fb   : > { %4441 = vtanh.f32 %v1853_v18  ;;  %v1857_v31 = vmul.f32 0.7978846, %v1729_v28  ;;  %v1477_v32 = vmul.f32 %v1349_v29, %v5735_v36  ;;  %v1353_v42 = vmul.f32 %v5745_v39, %v5745_v39  ;;  %1303 = vmatmul.mubr.bf16.gmra.mrb[116].mxu1 %v5611_v10 }
 0x1fc   : > { %4443 = vtanh.f32 %v1854_v4  ;;  %v1858_v46 = vmul.f32 0.7978846, %v1730_v5  ;;  %v1478_v47 = vmul.f32 %v1350_v17, %v5739_v52  ;;  %v1354_v48 = vmul.f32 %v5751_v20, %v5751_v20  ;;  %1312 = vmatprep.mubr.bf16.mxu1 %v5613_v11 }
 0x1fd   : > { %v4434_v49 = vpop.eup %4433  ;;  %4445 = vtanh.f32 %v1857_v31  ;;  %v1605_v44 = vmul.f32 0.044715, %v1477_v32  ;;  %v1481_v55 = vmul.f32 %v1353_v42, %v5745_v39 }
 0x1fe   : > { %v4436_v57 = vpop.eup %4435  ;;  %4447 = vtanh.f32 %v1858_v46  ;;  %v1606_v45 = vmul.f32 0.044715, %v1478_v47  ;;  %v1482_v60 = vmul.f32 %v1354_v48, %v5751_v20  ;;  %v1011_v10 = vpop.f32.mrb[12].mxu1  ;;  %v5763_v61 = vadd.f32 1.0, %v4434_v49 }
 0x1ff   : > { %v4438_v63 = vpop.eup %4437  ;;  %v1733_v2 = vadd.f32 %v1605_v44, %v5735_v36  ;;  %v1609_v3 = vmul.f32 0.044715, %v1481_v55  ;;  %v5767_v9 = vadd.f32 %v1011_v10, %v5670_v62  ;;  %v1013_v11 = vpop.f32.mrb[13].mxu1  ;;  %v2102_v12 = vadd.f32 1.0, %v4436_v57 }
 0x200   : > { %v1734_v13 = vadd.f32 %v1606_v45, %v5739_v52  ;;  %v1610_v14 = vmul.f32 0.044715, %v1482_v60  ;;  %v5771_v15 = vadd.f32 %v1013_v11, %v5674_v0  ;;  %v1015_v21 = vpop.f32.mrb[14].mxu1  ;;  %v5773_v22 = vadd.f32 1.0, %v4438_v63  ;;  %v4440_v34 = vpop.eup %4439 }
 0x201   : > { %v1861_v23 = vmul.f32 0.7978846, %v1733_v2  ;;  %v1737_v24 = vadd.f32 %v1609_v3, %v5745_v39  ;;  %v1357_v27 = vmul.f32 %v5767_v9, %v5767_v9  ;;  %v5779_v30 = vadd.f32 %v1015_v21, %v5670_v62  ;;  %v1017_v33 = vpop.f32.mrb[15].mxu1 }
 0x202   : > { %v1862_v35 = vmul.f32 0.7978846, %v1734_v13  ;;  %v1738_v58 = vadd.f32 %v1610_v14, %v5751_v20  ;;  %v1358_v40 = vmul.f32 %v5771_v15, %v5771_v15  ;;  %v5785_v16 = vadd.f32 %v1017_v33, %v5674_v0 }
 0x203   : > { %4449 = vtanh.f32 %v1861_v23  ;;  %v1865_v59 = vmul.f32 0.7978846, %v1737_v24  ;;  %v1485_v7 = vmul.f32 %v1357_v27, %v5767_v9  ;;  %v1361_v18 = vmul.f32 %v5779_v30, %v5779_v30  ;;  %1313 = vmatmul.mubr.bf16.gmra.mrb[120].mxu1 %v5625_v25 }
 0x204   : > { %4451 = vtanh.f32 %v1862_v35  ;;  %v1866_v28 = vmul.f32 0.7978846, %v1738_v58  ;;  %v1486_v29 = vmul.f32 %v1358_v40, %v5771_v15  ;;  %v1362_v51 = vmul.f32 %v5785_v16, %v5785_v16  ;;  %1322 = vmatprep.mubr.bf16.mxu1 %v5627_v26 }
 0x205   : > { %v5795_v4 = vpop.eup %4441  ;;  %4453 = vtanh.f32 %v1865_v59  ;;  %v1613_v5 = vmul.f32 0.044715, %v1485_v7  ;;  %v1489_v17 = vmul.f32 %v1361_v18, %v5779_v30  ;;  %v2106_v31 = vadd.f32 1.0, %v4440_v34 }
 0x206   : > { %v5798_v32 = vpop.eup %4443  ;;  %4455 = vtanh.f32 %v1866_v28  ;;  %v1614_v25 = vmul.f32 0.044715, %v1486_v29  ;;  %v1490_v42 = vmul.f32 %v1362_v51, %v5785_v16  ;;  %v1021_v46 = vpop.f32.mrb[16].mxu1  ;;  %v2230_v47 = vmul.f32 0.5, %v2102_v12 }
 0x207   : > { %v5801_v48 = vpop.eup %4445  ;;  %v1741_v49 = vadd.f32 %v1613_v5, %v5767_v9  ;;  %v1617_v26 = vmul.f32 0.044715, %v1489_v17  ;;  %v5805_v44 = vadd.f32 %v1021_v46, %v5670_v62  ;;  %v1023_v55 = vpop.f32.mrb[17].mxu1  ;;  %v2234_v57 = vmul.f32 0.5, %v2106_v31 }
 0x208   : > { %v5807_v45 = vpop.eup %4447  ;;  %v1742_v60 = vadd.f32 %v1614_v25, %v5771_v15  ;;  %v1618_v10 = vmul.f32 0.044715, %v1490_v42  ;;  %v5811_v63 = vadd.f32 %v1023_v55, %v5674_v0  ;;  %v1025_v2 = vpop.f32.mrb[18].mxu1  ;;  %v2358_v3 = vmul.f32 %v2230_v47, %v5681_v19 }
 0x209   : > { %v1869_v11 = vmul.f32 0.7978846, %v1741_v49  ;;  %v1745_v12 = vadd.f32 %v1617_v26, %v5779_v30  ;;  %v1365_v13 = vmul.f32 %v5805_v44, %v5805_v44  ;;  %v5818_v14 = vadd.f32 %v1025_v2, %v5670_v62  ;;  %v1027_v21 = vpop.f32.mrb[19].mxu1 }
 0x20a   : > { %v1870_v23 = vmul.f32 0.7978846, %v1742_v60  ;;  %v1746_v24 = vadd.f32 %v1618_v10, %v5785_v16  ;;  %v1366_v27 = vmul.f32 %v5811_v63, %v5811_v63  ;;  %v5824_v33 = vadd.f32 %v1027_v21, %v5674_v0 }
 0x20b   : > { %4457 = vtanh.f32 %v1869_v11  ;;  %v1873_v19 = vmul.f32 0.7978846, %v1745_v12  ;;  %v1493_v34 = vmul.f32 %v1365_v13, %v5805_v44  ;;  %v1369_v35 = vmul.f32 %v5818_v14, %v5818_v14  ;;  %1323 = vmatmul.mubr.bf16.gmra.mrb[124].mxu1 %v5637_v37 }
 0x20c   : > { %4459 = vtanh.f32 %v1870_v23  ;;  %v1874_v58 = vmul.f32 0.7978846, %v1746_v24  ;;  %v1494_v40 = vmul.f32 %v1366_v27, %v5811_v63  ;;  %v1370_v59 = vmul.f32 %v5824_v33, %v5824_v33  ;;  %v4385_v23 = vld [vmem:[%s5311_s29 + $0x100] ss:$8 sps:$4 sm:$0xff]  }
 0x20d   : > { %v5833_v7 = vpop.eup %4449  ;;  %4461 = vtanh.f32 %v1873_v19  ;;  %v1621_v18 = vmul.f32 0.044715, %v1493_v34  ;;  %v1497_v28 = vmul.f32 %v1369_v35, %v5818_v14  ;;  %v2362_v29 = vmul.f32 %v2234_v57, %v5691_v53  ;;  %v4390_v34 = vld [vmem:[%s5311_s29 + $0x114] ss:$8 sps:$4 sm:$0xff]  }
 0x20e   : > { %v5837_v51 = vpop.eup %4451  ;;  %4463 = vtanh.f32 %v1874_v58  ;;  %v1622_v5 = vmul.f32 0.044715, %v1494_v40  ;;  %v1498_v37 = vmul.f32 %v1370_v59, %v5824_v33  ;;  %v2229_v17 = vmul.f32 0.5, %v5763_v61  ;;  %v1031_v31 = vpop.f32.mrb[20].mxu1 }
 0x20f   : > { %v5841_v25 = vpop.eup %4453  ;;  %v1749_v42 = vadd.f32 %v1621_v18, %v5805_v44  ;;  %v1625_v46 = vmul.f32 0.044715, %v1497_v28  ;;  %v2550_v47 = vpack.c.bf16 %v2362_v29, %v2358_v3  ;;  %v2233_v49 = vmul.f32 0.5, %v5773_v22  ;;  %v1033_v26 = vpop.f32.mrb[21].mxu1 }
 0x210   : > { %v5845_v53 = vpop.eup %4455  ;;  %v1750_v55 = vadd.f32 %v1622_v5, %v5811_v63  ;;  %v1626_v57 = vmul.f32 0.044715, %v1498_v37  ;;  %v2357_v60 = vmul.f32 %v2229_v17, %v5678_v8  ;;  %v5850_v61 = vadd.f32 %v1031_v31, %v5670_v62  ;;  %v1035_v10 = vpop.f32.mrb[22].mxu1  ;;  %v4388_v5 = vld [vmem:[%s5311_s29 + $0x110] ss:$8 sps:$4 sm:$0xff]  }
 0x211   : > { %v1877_v2 = vmul.f32 0.7978846, %v1749_v42  ;;  %v1753_v11 = vadd.f32 %v1625_v46, %v5818_v14  ;;  %3029 = vmatprep.mubr.bf16.mxu0 %v2550_v47  ;;  %v2361_v22 = vmul.f32 %v2233_v49, %v5686_v38  ;;  %v5855_v3 = vadd.f32 %v1033_v26, %v5674_v0  ;;  %v1037_v12 = vpop.f32.mrb[23].mxu1  ;;  %v4393_v47 = vld [vmem:[%s5311_s29 + $0x124] ss:$8 sps:$4 sm:$0xff]  }
 0x212   : > { %v1878_v13 = vmul.f32 0.7978846, %v1750_v55  ;;  %v1754_v21 = vadd.f32 %v1626_v57, %v5824_v33  ;;  %v1373_v8 = vmul.f32 %v5850_v61, %v5850_v61  ;;  %v5862_v24 = vadd.f32 %v1035_v10, %v5670_v62 }
 0x213   : > { %4465 = vtanh.f32 %v1877_v2  ;;  %v1881_v27 = vmul.f32 0.7978846, %v1753_v11  ;;  %v2549_v19 = vpack.c.bf16 %v2361_v22, %v2357_v60  ;;  %v1374_v38 = vmul.f32 %v5855_v3, %v5855_v3 }
 0x214   : > { %4467 = vtanh.f32 %v1878_v13  ;;  %v1882_v35 = vmul.f32 0.7978846, %v1754_v21  ;;  %v1501_v58 = vmul.f32 %v1373_v8, %v5850_v61  ;;  %v1377_v40 = vmul.f32 %v5862_v24, %v5862_v24 }
 0x215   : > { %v5870_v59 = vpop.eup %4457  ;;  %4469 = vtanh.f32 %v1881_v27  ;;  %3030 = vmatmul.mubr.bf16.vlgmr.msra.gmra.mrb[0].mxu0 %v2549_v19  ;;  %v1502_v18 = vmul.f32 %v1374_v38, %v5855_v3  ;;  %v5874_v28 = vadd.f32 %v1037_v12, %v5674_v0  ;;  %v2110_v29 = vadd.f32 1.0, %v5798_v32 }
 0x216   : > { %v5878_v37 = vpop.eup %4459  ;;  %4471 = vtanh.f32 %v1882_v35  ;;  %3191 = vmatpush1.bf16.msra.mxu0 %v4385_v23  ;;  %v1629_v17 = vmul.f32 0.044715, %v1501_v58  ;;  %v1505_v31 = vmul.f32 %v1377_v40, %v5862_v24  ;;  %v2114_v42 = vadd.f32 1.0, %v5807_v45  ;;  %v1041_v46 = vpop.f32.mrb[24].mxu1  ;;  %v4391_v35 = vld [vmem:[%s5311_s29 + $0x120] ss:$8 sps:$4 sm:$0xff]  }
 0x217   : > { %v5883_v49 = vpop.eup %4461  ;;  %v1630_v26 = vmul.f32 0.044715, %v1502_v18  ;;  %v1378_v55 = vmul.f32 %v5874_v28, %v5874_v28  ;;  %v2238_v57 = vmul.f32 0.5, %v2110_v29  ;;  %v2109_v32 = vadd.f32 1.0, %v5795_v4  ;;  %3192 = vmatprep.subr.bf16.mxu0 %v4390_v34  ;;  %v1043_v60 = vpop.f32.mrb[25].mxu1 }
 0x218   : > { %v5888_v10 = vpop.eup %4463  ;;  %v1757_v2 = vadd.f32 %v1629_v17, %v5850_v61  ;;  %v1633_v11 = vmul.f32 0.044715, %v1505_v31  ;;  %v2242_v45 = vmul.f32 0.5, %v2114_v42  ;;  %v2113_v22 = vadd.f32 1.0, %v5801_v48  ;;  %v1045_v12 = vpop.f32.mrb[26].mxu1 }
 0x219   : > { %v1758_v13 = vadd.f32 %v1630_v26, %v5855_v3  ;;  %v1506_v21 = vmul.f32 %v1378_v55, %v5874_v28  ;;  %v2366_v23 = vmul.f32 %v2238_v57, %v5708_v56  ;;  %v2237_v4 = vmul.f32 0.5, %v2109_v32  ;;  %v1047_v8 = vpop.f32.mrb[27].mxu1  ;;  %v4396_v29 = vld [vmem:[%s5311_s29 + $0x134] ss:$8 sps:$4 sm:$0xff]   ;;  %v4394_v57 = vld [vmem:[%s5311_s29 + $0x130] ss:$8 sps:$4 sm:$0xff]  }
 0x21a   : > { %v1885_v27 = vmul.f32 0.7978846, %v1757_v2  ;;  %v1761_v19 = vadd.f32 %v1633_v11, %v5862_v24  ;;  %v2370_v38 = vmul.f32 %v2242_v45, %v5720_v6  ;;  %v2241_v34 = vmul.f32 0.5, %v2113_v22  ;;  %3193 = vmatpush1.bf16.msra.mxu0 %v4388_v5 }
 0x21b   : > { %v1886_v58 = vmul.f32 0.7978846, %v1758_v13  ;;  %v1634_v48 = vmul.f32 0.044715, %v1506_v21  ;;  %v2365_v40 = vmul.f32 %v2237_v4, %v5705_v50  ;;  %v5900_v18 = vadd.f32 %v1041_v46, %v5670_v62  ;;  %3194 = vmatprep.subr.bf16.mxu0 %v4393_v47 }
 0x21c   : > { %4473 = vtanh.f32 %v1885_v27  ;;  %v1889_v56 = vmul.f32 0.7978846, %v1761_v19  ;;  %v2554_v17 = vpack.c.bf16 %v2370_v38, %v2366_v23  ;;  %v2369_v31 = vmul.f32 %v2241_v34, %v5715_v1 }
 0x21d   : > { %v5904_v42 = vpop.eup %4465  ;;  %4475 = vtanh.f32 %v1886_v58  ;;  %v1762_v6 = vadd.f32 %v1634_v48, %v5874_v28  ;;  %v1381_v5 = vmul.f32 %v5900_v18, %v5900_v18  ;;  %v5910_v50 = vadd.f32 %v1043_v60, %v5674_v0 }
 0x21e   : > { %v5912_v46 = vpop.eup %4467  ;;  %4477 = vtanh.f32 %v1889_v56  ;;  %3039 = vmatprep.mubr.bf16.mxu0 %v2554_v17  ;;  %v2553_v47 = vpack.c.bf16 %v2369_v31, %v2365_v40  ;;  %v5915_v26 = vadd.f32 %v1045_v12, %v5670_v62  ;;  %v5918_v1 = vadd.f32 %v1047_v8, %v5674_v0  ;;  %3195 = vmatpush1.bf16.msra.mxu0 %v4391_v35  ;;  %v1051_v55 = vpop.f32.mrb[28].mxu1  ;;  %v4399_v12 = vld [vmem:[%s5311_s29 + $0x144] ss:$8 sps:$4 sm:$0xff]   ;;  %v4402_v31 = vld [vmem:[%s5311_s29 + $0x154] ss:$8 sps:$4 sm:$0xff]  }
 0x21f   : > { %v5921_v32 = vpop.eup %4469  ;;  %v1890_v2 = vmul.f32 0.7978846, %v1762_v6  ;;  %v1509_v60 = vmul.f32 %v1381_v5, %v5900_v18  ;;  %v1382_v11 = vmul.f32 %v5910_v50, %v5910_v50  ;;  %v2118_v45 = vadd.f32 1.0, %v5837_v51  ;;  %v1053_v22 = vpop.f32.mrb[29].mxu1  ;;  %3196 = vmatprep.subr.bf16.mxu0 %v4396_v29  ;;  %v4397_v29 = vld [vmem:[%s5311_s29 + $0x140] ss:$8 sps:$4 sm:$0xff]  }
 0x220   : > { %v5928_v13 = vpop.eup %4471  ;;  %3040 = vmatmul.mubr.bf16.gmra.mrb[4].mxu0 %v2553_v47  ;;  %v1385_v21 = vmul.f32 %v5915_v26, %v5915_v26  ;;  %v1386_v23 = vmul.f32 %v5918_v1, %v5918_v1  ;;  %v2122_v4 = vadd.f32 1.0, %v5845_v53  ;;  %v2117_v8 = vadd.f32 1.0, %v5833_v7  ;;  %v1055_v27 = vpop.f32.mrb[30].mxu1 }
 0x221   : > { %4479 = vtanh.f32 %v1890_v2  ;;  %v1637_v51 = vmul.f32 0.044715, %v1509_v60  ;;  %v1510_v19 = vmul.f32 %v1382_v11, %v5910_v50  ;;  %v2246_v38 = vmul.f32 0.5, %v2118_v45  ;;  %v1057_v34 = vpop.f32.mrb[31].mxu1 }
 0x222   : > { %v1513_v35 = vmul.f32 %v1385_v21, %v5915_v26  ;;  %v1514_v58 = vmul.f32 %v1386_v23, %v5918_v1  ;;  %v2250_v48 = vmul.f32 0.5, %v2122_v4  ;;  %v2121_v40 = vadd.f32 1.0, %v5841_v25  ;;  %3197 = vmatpush1.bf16.msra.mxu0 %v4394_v57  ;;  %v4400_v4 = vld [vmem:[%s5311_s29 + $0x150] ss:$8 sps:$4 sm:$0xff]  }
 0x223   : > { %v1765_v53 = vadd.f32 %v1637_v51, %v5900_v18  ;;  %v1638_v7 = vmul.f32 0.044715, %v1510_v19  ;;  %v2374_v56 = vmul.f32 %v2246_v38, %v5739_v52  ;;  %v2245_v17 = vmul.f32 0.5, %v2117_v8  ;;  %3198 = vmatprep.subr.bf16.mxu0 %v4399_v12  ;;  %v4405_v38 = vld [vmem:[%s5311_s29 + $0x164] ss:$8 sps:$4 sm:$0xff]  }
 0x224   : > { %v1641_v6 = vmul.f32 0.044715, %v1513_v35  ;;  %v1642_v5 = vmul.f32 0.044715, %v1514_v58  ;;  %v2378_v47 = vmul.f32 %v2250_v48, %v5751_v20  ;;  %v2249_v2 = vmul.f32 0.5, %v2121_v40 }
 0x225   : > { %v1893_v60 = vmul.f32 0.7978846, %v1765_v53  ;;  %v1766_v11 = vadd.f32 %v1638_v7, %v5910_v50  ;;  %v2373_v25 = vmul.f32 %v2245_v17, %v5735_v36  ;;  %v5948_v57 = vadd.f32 %v1051_v55, %v5670_v62 }
 0x226   : > { %v5950_v45 = vpop.eup %4473  ;;  %v1769_v52 = vadd.f32 %v1641_v6, %v5915_v26  ;;  %v1770_v12 = vadd.f32 %v1642_v5, %v5918_v1  ;;  %v2558_v21 = vpack.c.bf16 %v2378_v47, %v2374_v56  ;;  %v2377_v23 = vmul.f32 %v2249_v2, %v5745_v39  ;;  %v1061_v20 = vpop.f32.mrb[32].mxu1  ;;  %3199 = vmatpush1.bf16.msra.mxu0 %v4397_v29  ;;  %v4403_v2 = vld [vmem:[%s5311_s29 + $0x160] ss:$8 sps:$4 sm:$0xff]  }
 0x227   : > { %v5956_v8 = vpop.eup %4475  ;;  %4481 = vtanh.f32 %v1893_v60  ;;  %v1894_v36 = vmul.f32 0.7978846, %v1766_v11  ;;  %v1389_v55 = vmul.f32 %v5948_v57, %v5948_v57  ;;  %v5961_v51 = vadd.f32 %v1053_v22, %v5674_v0  ;;  %v5963_v19 = vpop.f32.mrb[33].mxu1  ;;  %3200 = vmatprep.subr.bf16.mxu0 %v4402_v31 }
 0x228   : > { %v5966_v35 = vpop.eup %4477  ;;  %v1897_v39 = vmul.f32 0.7978846, %v1769_v52  ;;  %v1898_v58 = vmul.f32 0.7978846, %v1770_v12  ;;  %3049 = vmatprep.mubr.bf16.mxu0 %v2558_v21  ;;  %v2557_v48 = vpack.c.bf16 %v2377_v23, %v2373_v25  ;;  %v5969_v40 = vadd.f32 %v1055_v27, %v5670_v62  ;;  %v1065_v29 = vpop.f32.mrb[34].mxu1 }
 0x229   : > { %4483 = vtanh.f32 %v1894_v36  ;;  %v1517_v53 = vmul.f32 %v1389_v55, %v5948_v57  ;;  %v1390_v22 = vmul.f32 %v5961_v51, %v5961_v51  ;;  %v5975_v7 = vadd.f32 %v1057_v34, %v5674_v0  ;;  %v1067_v56 = vpop.f32.mrb[35].mxu1 }
 0x22a   : > { %4485 = vtanh.f32 %v1897_v39  ;;  %3050 = vmatmul.mubr.bf16.gmra.mrb[8].mxu0 %v2557_v48  ;;  %v1393_v17 = vmul.f32 %v5969_v40, %v5969_v40  ;;  %v2126_v27 = vadd.f32 1.0, %v5878_v37  ;;  %v2130_v31 = vadd.f32 1.0, %v5888_v10  ;;  %v4408_v10 = vld [vmem:[%s5311_s29 + $0x174] ss:$8 sps:$4 sm:$0xff]   ;;  %v4406_v48 = vld [vmem:[%s5311_s29 + $0x170] ss:$8 sps:$4 sm:$0xff]  }
 0x22b   : > { %v5981_v6 = vpop.eup %4479  ;;  %4487 = vtanh.f32 %v1898_v58  ;;  %v1645_v5 = vmul.f32 0.044715, %v1517_v53  ;;  %v1518_v47 = vmul.f32 %v1390_v22, %v5961_v51  ;;  %v1394_v34 = vmul.f32 %v5975_v7, %v5975_v7  ;;  %3201 = vmatpush1.bf16.msra.mxu0 %v4400_v4 }
 0x22c   : > { %v1521_v60 = vmul.f32 %v1393_v17, %v5969_v40  ;;  %v2254_v11 = vmul.f32 0.5, %v2126_v27  ;;  %v2258_v25 = vmul.f32 0.5, %v2130_v31  ;;  %v2125_v37 = vadd.f32 1.0, %v5870_v59  ;;  %3202 = vmatprep.subr.bf16.mxu0 %v4405_v38 }
 0x22d   : > { %v1773_v52 = vadd.f32 %v1645_v5, %v5948_v57  ;;  %v1646_v12 = vmul.f32 0.044715, %v1518_v47  ;;  %v1522_v21 = vmul.f32 %v1394_v34, %v5975_v7  ;;  %v2129_v23 = vadd.f32 1.0, %v5883_v49  ;;  %v4411_v5 = vld [vmem:[%s5311_s29 + $0x184] ss:$8 sps:$4 sm:$0xff]  }
 0x22e   : > { %v1649_v36 = vmul.f32 0.044715, %v1521_v60  ;;  %v2382_v4 = vmul.f32 %v2254_v11, %v5771_v15  ;;  %v2386_v55 = vmul.f32 %v2258_v25, %v5785_v16  ;;  %v2253_v39 = vmul.f32 0.5, %v2125_v37  ;;  %v5995_v58 = vpop.f32.mrb[36].mxu1 }
 0x22f   : > { %v1901_v59 = vmul.f32 0.7978846, %v1773_v52  ;;  %v1774_v38 = vadd.f32 %v1646_v12, %v5961_v51  ;;  %v1650_v53 = vmul.f32 0.044715, %v1522_v21  ;;  %v2257_v22 = vmul.f32 0.5, %v2129_v23  ;;  %v5999_v17 = vpop.f32.mrb[37].mxu1  ;;  %3203 = vmatpush1.bf16.msra.mxu0 %v4403_v2 }
 0x230   : > { %v1777_v49 = vadd.f32 %v1649_v36, %v5969_v40  ;;  %v2562_v27 = vpack.c.bf16 %v2386_v55, %v2382_v4  ;;  %v2381_v15 = vmul.f32 %v2253_v39, %v5767_v9  ;;  %v6004_v16 = vadd.f32 %v1061_v20, %v5670_v62  ;;  %v6006_v31 = vpop.f32.mrb[38].mxu1  ;;  %3204 = vmatprep.subr.bf16.mxu0 %v4408_v10  ;;  %v4409_v21 = vld [vmem:[%s5311_s29 + $0x180] ss:$8 sps:$4 sm:$0xff]   ;;  %v4414_v4 = vld [vmem:[%s5311_s29 + $0x194] ss:$8 sps:$4 sm:$0xff]  }
 0x231   : > { %v6009_v47 = vpop.eup %4481  ;;  %4489 = vtanh.f32 %v1901_v59  ;;  %v1902_v34 = vmul.f32 0.7978846, %v1774_v38  ;;  %v1778_v60 = vadd.f32 %v1650_v53, %v5975_v7  ;;  %v2385_v2 = vmul.f32 %v2257_v22, %v5779_v30  ;;  %v6013_v11 = vpop.f32.mrb[39].mxu1 }
 0x232   : > { %v1905_v25 = vmul.f32 0.7978846, %v1777_v49  ;;  %3059 = vmatprep.mubr.bf16.mxu0 %v2562_v27  ;;  %v1397_v9 = vmul.f32 %v6004_v16, %v6004_v16  ;;  %v6019_v20 = vadd.f32 %v5963_v19, %v5674_v0  ;;  %v6022_v37 = vadd.f32 %v1065_v29, %v5670_v62  ;;  %v4412_v27 = vld [vmem:[%s5311_s29 + $0x190] ss:$8 sps:$4 sm:$0xff]  }
 0x233   : > { %v6024_v10 = vpop.eup %4483  ;;  %4491 = vtanh.f32 %v1902_v34  ;;  %v1906_v52 = vmul.f32 0.7978846, %v1778_v60  ;;  %v2561_v30 = vpack.c.bf16 %v2385_v2, %v2381_v15  ;;  %v6027_v12 = vadd.f32 %v1067_v56, %v5674_v0  ;;  %3205 = vmatpush1.bf16.msra.mxu0 %v4406_v48 }
 0x234   : > { %v6030_v23 = vpop.eup %4485  ;;  %4493 = vtanh.f32 %v1905_v25  ;;  %v1525_v36 = vmul.f32 %v1397_v9, %v6004_v16  ;;  %v1398_v19 = vmul.f32 %v6019_v20, %v6019_v20  ;;  %v1401_v29 = vmul.f32 %v6022_v37, %v6022_v37  ;;  %3206 = vmatprep.subr.bf16.mxu0 %v4411_v5 }
 0x235   : > { %v6038_v55 = vpop.eup %4487  ;;  %4495 = vtanh.f32 %v1906_v52  ;;  %3060 = vmatmul.mubr.bf16.gmra.mrb[12].mxu0 %v2561_v30  ;;  %v1402_v56 = vmul.f32 %v6027_v12, %v6027_v12  ;;  %v2134_v39 = vadd.f32 1.0, %v5912_v46  ;;  %v2138_v48 = vadd.f32 1.0, %v5928_v13  ;;  %v4417_v46 = vld [vmem:[%s5311_s29 + $0x1a4] ss:$8 sps:$4 sm:$0xff]  }
 0x236   : > { %v1653_v59 = vmul.f32 0.044715, %v1525_v36  ;;  %v1526_v38 = vmul.f32 %v1398_v19, %v6019_v20  ;;  %v1529_v53 = vmul.f32 %v1401_v29, %v6022_v37  ;;  %v2133_v22 = vadd.f32 1.0, %v5904_v42  ;;  %v6047_v49 = vpop.f32.mrb[40].mxu1 }
 0x237   : > { %v1530_v15 = vmul.f32 %v1402_v56, %v6027_v12  ;;  %v2262_v5 = vmul.f32 0.5, %v2134_v39  ;;  %v2266_v34 = vmul.f32 0.5, %v2138_v48  ;;  %v2137_v60 = vadd.f32 1.0, %v5921_v32  ;;  %v6052_v2 = vpop.f32.mrb[41].mxu1  ;;  %3207 = vmatpush1.bf16.msra.mxu0 %v4409_v21 }
 0x238   : > { %v1781_v13 = vadd.f32 %v1653_v59, %v6004_v16  ;;  %v1654_v25 = vmul.f32 0.044715, %v1526_v38  ;;  %v1657_v9 = vmul.f32 0.044715, %v1529_v53  ;;  %v2261_v52 = vmul.f32 0.5, %v2133_v22  ;;  %v6056_v30 = vpop.f32.mrb[42].mxu1  ;;  %3208 = vmatprep.subr.bf16.mxu0 %v4414_v4 }
 0x239   : > { %v1658_v42 = vmul.f32 0.044715, %v1530_v15  ;;  %v2390_v36 = vmul.f32 %v2262_v5, %v5811_v63  ;;  %v2394_v19 = vmul.f32 %v2266_v34, %v5824_v33  ;;  %v2265_v29 = vmul.f32 0.5, %v2137_v60  ;;  %v6060_v32 = vpop.f32.mrb[43].mxu1 }
 0x23a   : > { %v1909_v56 = vmul.f32 0.7978846, %v1781_v13  ;;  %v1782_v21 = vadd.f32 %v1654_v25, %v6019_v20  ;;  %v1785_v39 = vadd.f32 %v1657_v9, %v6022_v37  ;;  %v2389_v48 = vmul.f32 %v2261_v52, %v5805_v44  ;;  %v4415_v44 = vld [vmem:[%s5311_s29 + $0x1a0] ss:$8 sps:$4 sm:$0xff]  }
 0x23b   : > { %v6065_v59 = vpop.eup %4489  ;;  %v1786_v4 = vadd.f32 %v1658_v42, %v6027_v12  ;;  %v2566_v38 = vpack.c.bf16 %v2394_v19, %v2390_v36  ;;  %v2393_v63 = vmul.f32 %v2265_v29, %v5818_v14  ;;  %v6071_v33 = vadd.f32 %v5995_v58, %v5670_v62  ;;  %3209 = vmatpush1.bf16.msra.mxu0 %v4412_v27  ;;  %v4420_v27 = vld [vmem:[%s5311_s29 + $0x1b4] ss:$8 sps:$4 sm:$0xff]  }
 0x23c   : > { %4497 = vtanh.f32 %v1909_v56  ;;  %v1910_v53 = vmul.f32 0.7978846, %v1782_v21  ;;  %v1913_v22 = vmul.f32 0.7978846, %v1785_v39  ;;  %v6075_v15 = vadd.f32 %v5999_v17, %v5674_v0  ;;  %3210 = vmatprep.subr.bf16.mxu0 %v4417_v46  ;;  %v4418_v21 = vld [vmem:[%s5311_s29 + $0x1b0] ss:$8 sps:$4 sm:$0xff]  }
 0x23d   : > { %v6078_v5 = vpop.eup %4491  ;;  %v1914_v34 = vmul.f32 0.7978846, %v1786_v4  ;;  %3069 = vmatprep.mubr.bf16.mxu0 %v2566_v38  ;;  %v2565_v60 = vpack.c.bf16 %v2393_v63, %v2389_v48  ;;  %v1405_v14 = vmul.f32 %v6071_v33, %v6071_v33  ;;  %v6084_v58 = vadd.f32 %v6006_v31, %v5670_v62  ;;  %v4423_v39 = vld [vmem:[%s5311_s29 + $0x1c4] ss:$8 sps:$4 sm:$0xff]  }
 0x23e   : > { %v6087_v13 = vpop.eup %4493  ;;  %4499 = vtanh.f32 %v1910_v53  ;;  %v1406_v17 = vmul.f32 %v6075_v15, %v6075_v15  ;;  %v6093_v46 = vadd.f32 %v6013_v11, %v5674_v0  ;;  %v2142_v25 = vadd.f32 1.0, %v5956_v8  ;;  %v6096_v9 = vpop.f32.mrb[44].mxu1 }
 0x23f   : > { %v6098_v52 = vpop.eup %4495  ;;  %4501 = vtanh.f32 %v1913_v22  ;;  %3070 = vmatmul.mubr.bf16.gmra.mrb[16].mxu0 %v2565_v60  ;;  %v1533_v31 = vmul.f32 %v1405_v14, %v6071_v33  ;;  %v1409_v42 = vmul.f32 %v6084_v58, %v6084_v58  ;;  %v2146_v36 = vadd.f32 1.0, %v5981_v6  ;;  %v6104_v19 = vpop.f32.mrb[45].mxu1 }
 0x240   : > { %4503 = vtanh.f32 %v1914_v34  ;;  %v1534_v11 = vmul.f32 %v1406_v17, %v6075_v15  ;;  %v1410_v8 = vmul.f32 %v6093_v46, %v6093_v46  ;;  %v2270_v29 = vmul.f32 0.5, %v2142_v25  ;;  %v6109_v56 = vpop.f32.mrb[46].mxu1  ;;  %3211 = vmatpush1.bf16.msra.mxu0 %v4415_v44 }
 0x241   : > { %v1661_v48 = vmul.f32 0.044715, %v1533_v31  ;;  %v1537_v4 = vmul.f32 %v1409_v42, %v6084_v58  ;;  %v2274_v38 = vmul.f32 0.5, %v2146_v36  ;;  %v2141_v6 = vadd.f32 1.0, %v5950_v45  ;;  %v6115_v63 = vpop.f32.mrb[47].mxu1  ;;  %3212 = vmatprep.subr.bf16.mxu0 %v4420_v27 }
 0x242   : > { %v1662_v53 = vmul.f32 0.044715, %v1534_v11  ;;  %v1538_v22 = vmul.f32 %v1410_v8, %v6093_v46  ;;  %v2398_v34 = vmul.f32 %v2270_v29, %v5855_v3  ;;  %v2145_v60 = vadd.f32 1.0, %v5966_v35  ;;  %v4421_v36 = vld [vmem:[%s5311_s29 + $0x1c0] ss:$8 sps:$4 sm:$0xff]  }
 0x243   : > { %v1789_v44 = vadd.f32 %v1661_v48, %v6071_v33  ;;  %v1665_v14 = vmul.f32 0.044715, %v1537_v4  ;;  %v2402_v17 = vmul.f32 %v2274_v38, %v5874_v28  ;;  %v2269_v25 = vmul.f32 0.5, %v2141_v6  ;;  %v4426_v29 = vld [vmem:[%s5311_s29 + $0x1d4] ss:$8 sps:$4 sm:$0xff]  }
 0x244   : > { %v1790_v45 = vadd.f32 %v1662_v53, %v6075_v15  ;;  %v1666_v31 = vmul.f32 0.044715, %v1538_v22  ;;  %v2273_v42 = vmul.f32 0.5, %v2145_v60  ;;  %v6125_v27 = vadd.f32 %v6047_v49, %v5670_v62  ;;  %3213 = vmatpush1.bf16.msra.mxu0 %v4418_v21 }
 0x245   : > { %v1917_v3 = vmul.f32 0.7978846, %v1789_v44  ;;  %v1793_v35 = vadd.f32 %v1665_v14, %v6084_v58  ;;  %v2570_v11 = vpack.c.bf16 %v2402_v17, %v2398_v34  ;;  %v2397_v8 = vmul.f32 %v2269_v25, %v5850_v61  ;;  %3214 = vmatprep.subr.bf16.mxu0 %v4423_v39  ;;  %v4424_v14 = vld [vmem:[%s5311_s29 + $0x1d0] ss:$8 sps:$4 sm:$0xff]  }
 0x246   : > { %v6131_v28 = vpop.eup %4497  ;;  %v1918_v48 = vmul.f32 0.7978846, %v1790_v45  ;;  %v1794_v4 = vadd.f32 %v1666_v31, %v6093_v46  ;;  %v2401_v38 = vmul.f32 %v2273_v42, %v5862_v24  ;;  %v1413_v49 = vmul.f32 %v6125_v27, %v6125_v27  ;;  %v6137_v21 = vpop.f32.mrb[48].mxu1  ;;  %v4429_v31 = vld [vmem:[%s5311_s29 + $0x1e4] ss:$8 sps:$4 sm:$0xff]  }
 0x247   : > { %4505 = vtanh.f32 %v1917_v3  ;;  %v1921_v6 = vmul.f32 0.7978846, %v1793_v35  ;;  %3079 = vmatprep.mubr.bf16.mxu0 %v2570_v11  ;;  %v6141_v61 = vadd.f32 %v6052_v2, %v5674_v0  ;;  %v6145_v39 = vadd.f32 %v6056_v30, %v5670_v62  ;;  %v6147_v53 = vpop.f32.mrb[49].mxu1 }
 0x248   : > { %v6149_v24 = vpop.eup %4499  ;;  %4507 = vtanh.f32 %v1918_v48  ;;  %v1922_v22 = vmul.f32 0.7978846, %v1794_v4  ;;  %v2569_v34 = vpack.c.bf16 %v2401_v38, %v2397_v8  ;;  %v1541_v60 = vmul.f32 %v1413_v49, %v6125_v27  ;;  %v6152_v44 = vpop.f32.mrb[50].mxu1  ;;  %3215 = vmatpush1.bf16.msra.mxu0 %v4421_v36  ;;  %v4427_v48 = vld [vmem:[%s5311_s29 + $0x1e0] ss:$8 sps:$4 sm:$0xff]  }
 0x249   : > { %v6155_v2 = vpop.eup %4501  ;;  %4509 = vtanh.f32 %v1921_v6  ;;  %v1414_v30 = vmul.f32 %v6141_v61, %v6141_v61  ;;  %v1417_v17 = vmul.f32 %v6145_v39, %v6145_v39  ;;  %v6163_v25 = vadd.f32 %v6060_v32, %v5674_v0  ;;  %v6165_v45 = vpop.f32.mrb[51].mxu1  ;;  %3216 = vmatprep.subr.bf16.mxu0 %v4426_v29 }
 0x24a   : > { %v6168_v42 = vpop.eup %4503  ;;  %4511 = vtanh.f32 %v1922_v22  ;;  %3080 = vmatmul.mubr.bf16.gmra.mrb[20].mxu0 %v2569_v34  ;;  %v1669_v36 = vmul.f32 0.044715, %v1541_v60  ;;  %v2150_v3 = vadd.f32 1.0, %v6024_v10  ;;  %v2154_v35 = vadd.f32 1.0, %v6038_v55  ;;  %v4432_v10 = vld [vmem:[%s5311_s29 + $0x1f4] ss:$8 sps:$4 sm:$0xff]  }
 0x24b   : > { %v1542_v11 = vmul.f32 %v1414_v30, %v6141_v61  ;;  %v1545_v8 = vmul.f32 %v1417_v17, %v6145_v39  ;;  %v1418_v32 = vmul.f32 %v6163_v25, %v6163_v25  ;;  %v2149_v29 = vadd.f32 1.0, %v6009_v47 }
 0x24c   : > { %v1797_v4 = vadd.f32 %v1669_v36, %v6125_v27  ;;  %v2278_v38 = vmul.f32 0.5, %v2150_v3  ;;  %v2282_v49 = vmul.f32 0.5, %v2154_v35  ;;  %v2153_v6 = vadd.f32 1.0, %v6030_v23  ;;  %3217 = vmatpush1.bf16.msra.mxu0 %v4424_v14 }
 0x24d   : > { %v1670_v22 = vmul.f32 0.044715, %v1542_v11  ;;  %v1673_v55 = vmul.f32 0.044715, %v1545_v8  ;;  %v1546_v34 = vmul.f32 %v1418_v32, %v6163_v25  ;;  %v2277_v60 = vmul.f32 0.5, %v2149_v29  ;;  %3218 = vmatprep.subr.bf16.mxu0 %v4429_v31 }
 0x24e   : > { %v1925_v30 = vmul.f32 0.7978846, %v1797_v4  ;;  %v2406_v17 = vmul.f32 %v2278_v38, %v5910_v50  ;;  %v2410_v47 = vmul.f32 %v2282_v49, %v5918_v1  ;;  %v2281_v54 = vmul.f32 0.5, %v2153_v6  ;;  %v6184_v36 = vpop.f32.mrb[52].mxu1  ;;  %v4430_v32 = vld [vmem:[%s5311_s29 + $0x1f0] ss:$8 sps:$4 sm:$0xff]  }
 0x24f   : > { %v1798_v3 = vadd.f32 %v1670_v22, %v6141_v61  ;;  %v1801_v23 = vadd.f32 %v1673_v55, %v6145_v39  ;;  %v1674_v14 = vmul.f32 0.044715, %v1546_v34  ;;  %v2405_v35 = vmul.f32 %v2277_v60, %v5900_v18  ;;  %v6189_v11 = vpop.f32.mrb[53].mxu1 }
 0x250   : > { %4513 = vtanh.f32 %v1925_v30  ;;  %v2574_v31 = vpack.c.bf16 %v2410_v47, %v2406_v17  ;;  %v2409_v8 = vmul.f32 %v2281_v54, %v5915_v26  ;;  %v6194_v50 = vadd.f32 %v6096_v9, %v5670_v62  ;;  %v6196_v1 = vpop.f32.mrb[54].mxu1  ;;  %3219 = vmatpush1.bf16.msra.mxu0 %v4427_v48 }
 0x251   : > { %v6199_v29 = vpop.eup %4505  ;;  %v1926_v4 = vmul.f32 0.7978846, %v1798_v3  ;;  %v1929_v38 = vmul.f32 0.7978846, %v1801_v23  ;;  %v1802_v18 = vadd.f32 %v1674_v14, %v6163_v25  ;;  %v6204_v49 = vadd.f32 %v6104_v19, %v5674_v0  ;;  %v6206_v6 = vpop.f32.mrb[55].mxu1  ;;  %3220 = vmatprep.subr.bf16.mxu0 %v4432_v10 }
 0x252   : > { %v6208_v54 = vpop.eup %4507  ;;  %3089 = vmatprep.mubr.bf16.mxu0 %v2574_v31  ;;  %v2573_v26 = vpack.c.bf16 %v2409_v8, %v2405_v35  ;;  %v1421_v9 = vmul.f32 %v6194_v50, %v6194_v50  ;;  %v6214_v48 = vadd.f32 %v6109_v56, %v5670_v62  ;;  %v6218_v22 = vadd.f32 %v6115_v63, %v5674_v0 }
 0x253   : > { %v6220_v19 = vpop.eup %4509  ;;  %4515 = vtanh.f32 %v1926_v4  ;;  %v1930_v55 = vmul.f32 0.7978846, %v1802_v18  ;;  %v1422_v10 = vmul.f32 %v6204_v49, %v6204_v49  ;;  %v2158_v34 = vadd.f32 1.0, %v6078_v5 }
 0x254   : > { %v6225_v60 = vpop.eup %4511  ;;  %4517 = vtanh.f32 %v1929_v38  ;;  %3090 = vmatmul.mubr.bf16.gmra.mrb[24].mxu0 %v2573_v26  ;;  %v1549_v56 = vmul.f32 %v1421_v9, %v6194_v50  ;;  %v1425_v30 = vmul.f32 %v6214_v48, %v6214_v48  ;;  %v1426_v63 = vmul.f32 %v6218_v22, %v6218_v22 }
 0x255   : > { %4519 = vtanh.f32 %v1930_v55  ;;  %v1550_v17 = vmul.f32 %v1422_v10, %v6204_v49  ;;  %v2162_v47 = vadd.f32 1.0, %v6098_v52  ;;  %v2286_v3 = vmul.f32 0.5, %v2158_v34  ;;  %3221 = vmatpush1.bf16.msra.mxu0 %v4430_v32 }
 0x256   : > { %v1677_v5 = vmul.f32 0.044715, %v1549_v56  ;;  %v1553_v23 = vmul.f32 %v1425_v30, %v6214_v48  ;;  %v1554_v14 = vmul.f32 %v1426_v63, %v6218_v22  ;;  %v2157_v35 = vadd.f32 1.0, %v6065_v59  ;;  %v6237_v31 = vpop.f32.mrb[56].mxu1 }
 0x257   : > { %v1678_v8 = vmul.f32 0.044715, %v1550_v17  ;;  %v2290_v4 = vmul.f32 0.5, %v2162_v47  ;;  %v2414_v38 = vmul.f32 %v2286_v3, %v5961_v51  ;;  %v2161_v18 = vadd.f32 1.0, %v6087_v13  ;;  %v6241_v26 = vpop.f32.mrb[57].mxu1 }
 0x258   : > { %v1805_v52 = vadd.f32 %v1677_v5, %v6194_v50  ;;  %v1681_v32 = vmul.f32 0.044715, %v1553_v23  ;;  %v1682_v9 = vmul.f32 0.044715, %v1554_v14  ;;  %v2285_v55 = vmul.f32 0.5, %v2157_v35  ;;  %v6244_v10 = vpop.f32.mrb[58].mxu1 }
 0x259   : > { %v1806_v34 = vadd.f32 %v1678_v8, %v6204_v49  ;;  %v2418_v59 = vmul.f32 %v2290_v4, %v5975_v7  ;;  %v2289_v56 = vmul.f32 0.5, %v2161_v18  ;;  %v6250_v30 = vadd.f32 %v6137_v21, %v5670_v62  ;;  %v6252_v51 = vpop.f32.mrb[59].mxu1 }
 0x25a   : > { %v6254_v13 = vpop.eup %4513  ;;  %v1933_v63 = vmul.f32 0.7978846, %v1805_v52  ;;  %v1809_v17 = vadd.f32 %v1681_v32, %v6214_v48  ;;  %v1810_v47 = vadd.f32 %v1682_v9, %v6218_v22  ;;  %v2413_v3 = vmul.f32 %v2285_v55, %v5948_v57 }
 0x25b   : > { %v1934_v5 = vmul.f32 0.7978846, %v1806_v34  ;;  %v2578_v23 = vpack.c.bf16 %v2418_v59, %v2414_v38  ;;  %v2417_v7 = vmul.f32 %v2289_v56, %v5969_v40  ;;  %v1429_v14 = vmul.f32 %v6250_v30, %v6250_v30 }
 0x25c   : > { %4521 = vtanh.f32 %v1933_v63  ;;  %v1937_v21 = vmul.f32 0.7978846, %v1809_v17  ;;  %v1938_v35 = vmul.f32 0.7978846, %v1810_v47  ;;  %v6264_v8 = vadd.f32 %v6147_v53, %v5674_v0 }
 0x25d   : > { %v6266_v4 = vpop.eup %4515  ;;  %4523 = vtanh.f32 %v1934_v5  ;;  %3099 = vmatprep.mubr.bf16.mxu0 %v2578_v23  ;;  %v2577_v18 = vpack.c.bf16 %v2417_v7, %v2413_v3  ;;  %v1557_v57 = vmul.f32 %v1429_v14, %v6250_v30  ;;  %v6271_v40 = vadd.f32 %v6152_v44, %v5670_v62 }
 0x25e   : > { %v6273_v38 = vpop.eup %4517  ;;  %4525 = vtanh.f32 %v1937_v21  ;;  %v1430_v52 = vmul.f32 %v6264_v8, %v6264_v8  ;;  %v6279_v53 = vadd.f32 %v6165_v45, %v5674_v0  ;;  %v2166_v32 = vadd.f32 1.0, %v6149_v24  ;;  %v6282_v9 = vpop.f32.mrb[60].mxu1 }
 0x25f   : > { %7656 = vst [vmem:[#allocation26_spill] sm:$0xff] %v6271_v40  ;;  %v6284_v55 = vpop.eup %4519  ;;  %4527 = vtanh.f32 %v1938_v35  ;;  %3100 = vmatmul.mubr.bf16.gmra.mrb[28].mxu0 %v2577_v18  ;;  %v1685_v44 = vmul.f32 0.044715, %v1557_v57  ;;  %v1433_v34 = vmul.f32 %v6271_v40, %v6271_v40  ;;  %v2170_v59 = vadd.f32 1.0, %v6168_v42  ;;  %v6289_v56 = vpop.f32.mrb[61].mxu1 }
 0x260   : > { %v1558_v63 = vmul.f32 %v1430_v52, %v6264_v8  ;;  %v1434_v45 = vmul.f32 %v6279_v53, %v6279_v53  ;;  %v2294_v24 = vmul.f32 0.5, %v2166_v32  ;;  %v2165_v17 = vadd.f32 1.0, %v6131_v28  ;;  %v6295_v47 = vpop.f32.mrb[62].mxu1 }
 0x261   : > { %v1813_v3 = vadd.f32 %v1685_v44, %v6250_v30  ;;  %v1561_v5 = vmul.f32 %v1433_v34, %v6271_v40  ;;  %v2298_v23 = vmul.f32 0.5, %v2170_v59  ;;  %v2169_v7 = vadd.f32 1.0, %v6155_v2  ;;  %v6300_v42 = vpop.f32.mrb[63].mxu1 }
 0x262   : > { %v1686_v14 = vmul.f32 0.044715, %v1558_v63  ;;  %v1562_v21 = vmul.f32 %v1434_v45, %v6279_v53  ;;  %v2422_v35 = vmul.f32 %v2294_v24, %v6019_v20  ;;  %v2293_v18 = vmul.f32 0.5, %v2165_v17 }
 0x263   : > { %v1941_v57 = vmul.f32 0.7978846, %v1813_v3  ;;  %v1689_v52 = vmul.f32 0.044715, %v1561_v5  ;;  %v2426_v28 = vmul.f32 %v2298_v23, %v6027_v12  ;;  %v2297_v32 = vmul.f32 0.5, %v2169_v7 }
 0x264   : > { %v1814_v44 = vadd.f32 %v1686_v14, %v6264_v8  ;;  %v1690_v43 = vmul.f32 0.044715, %v1562_v21  ;;  %v2421_v34 = vmul.f32 %v2293_v18, %v6004_v16  ;;  %v6309_v2 = vadd.f32 %v6184_v36, %v5670_v62 }
 0x265   : > { %4529 = vtanh.f32 %v1941_v57  ;;  %v1817_v59 = vadd.f32 %v1689_v52, %v6271_v40  ;;  %v2582_v63 = vpack.c.bf16 %v2426_v28, %v2422_v35  ;;  %v2425_v20 = vmul.f32 %v2297_v32, %v6022_v37 }
 0x266   : > { %v6313_v45 = vpop.eup %4521  ;;  %v1942_v24 = vmul.f32 0.7978846, %v1814_v44  ;;  %v1818_v12 = vadd.f32 %v1690_v43, %v6279_v53  ;;  %v1437_v17 = vmul.f32 %v6309_v2, %v6309_v2  ;;  %v6320_v16 = vadd.f32 %v6189_v11, %v5674_v0  ;;  %v6322_v36 = vpop.f32.mrb[64].mxu1 }
 0x267   : > { %v6324_v3 = vpop.eup %4523  ;;  %v1945_v5 = vmul.f32 0.7978846, %v1817_v59  ;;  %3109 = vmatprep.mubr.bf16.mxu0 %v2582_v63  ;;  %v2581_v23 = vpack.c.bf16 %v2425_v20, %v2421_v34  ;;  %v6328_v37 = vadd.f32 %v6196_v1, %v5670_v62  ;;  %v6332_v43 = vadd.f32 %v6206_v6, %v5674_v0  ;;  %v6334_v7 = vpop.f32.mrb[65].mxu1 }
 0x268   : > { %v6336_v14 = vpop.eup %4525  ;;  %4531 = vtanh.f32 %v1942_v24  ;;  %v1946_v11 = vmul.f32 0.7978846, %v1818_v12  ;;  %v1565_v21 = vmul.f32 %v1437_v17, %v6309_v2  ;;  %v1438_v35 = vmul.f32 %v6320_v16, %v6320_v16  ;;  %v6341_v18 = vpop.f32.mrb[66].mxu1 }
 0x269   : > { %v6343_v57 = vpop.eup %4527  ;;  %4533 = vtanh.f32 %v1945_v5  ;;  %3110 = vmatmul.mubr.bf16.gmra.mrb[32].mxu0 %v2581_v23  ;;  %v1441_v1 = vmul.f32 %v6328_v37, %v6328_v37  ;;  %v1442_v6 = vmul.f32 %v6332_v43, %v6332_v43  ;;  %v2174_v52 = vadd.f32 1.0, %v6208_v54  ;;  %v6350_v28 = vpop.f32.mrb[67].mxu1 }
 0x26a   : > { %4535 = vtanh.f32 %v1946_v11  ;;  %v1693_v32 = vmul.f32 0.044715, %v1565_v21  ;;  %v1566_v44 = vmul.f32 %v1438_v35, %v6320_v16  ;;  %v2178_v34 = vadd.f32 1.0, %v6225_v60 }
 0x26b   : > { %v1569_v59 = vmul.f32 %v1441_v1, %v6328_v37  ;;  %v1570_v63 = vmul.f32 %v1442_v6, %v6332_v43  ;;  %v2302_v20 = vmul.f32 0.5, %v2174_v52  ;;  %v2173_v24 = vadd.f32 1.0, %v6199_v29 }
 0x26c   : > { %v1821_v12 = vadd.f32 %v1693_v32, %v6309_v2  ;;  %v1694_v17 = vmul.f32 0.044715, %v1566_v44  ;;  %v2306_v5 = vmul.f32 0.5, %v2178_v34  ;;  %v2177_v54 = vadd.f32 1.0, %v6220_v19 }
 0x26d   : > { %v1697_v23 = vmul.f32 0.044715, %v1569_v59  ;;  %v1698_v11 = vmul.f32 0.044715, %v1570_v63  ;;  %v2430_v21 = vmul.f32 %v2302_v20, %v6075_v15  ;;  %v2301_v35 = vmul.f32 0.5, %v2173_v24 }
 0x26e   : > { %v1949_v40 = vmul.f32 0.7978846, %v1821_v12  ;;  %v1822_v60 = vadd.f32 %v1694_v17, %v6320_v16  ;;  %v2434_v1 = vmul.f32 %v2306_v5, %v6093_v46  ;;  %v2305_v6 = vmul.f32 0.5, %v2177_v54  ;;  %v6362_v52 = vpop.f32.mrb[68].mxu1 }
 0x26f   : > { %v6364_v29 = vpop.eup %4529  ;;  %v1825_v32 = vadd.f32 %v1697_v23, %v6328_v37  ;;  %v1826_v44 = vadd.f32 %v1698_v11, %v6332_v43  ;;  %v2429_v19 = vmul.f32 %v2301_v35, %v6071_v33  ;;  %v6371_v15 = vadd.f32 %v6237_v31, %v5670_v62  ;;  %v6373_v34 = vpop.f32.mrb[69].mxu1 }
 0x270   : > { %4537 = vtanh.f32 %v1949_v40  ;;  %v1950_v59 = vmul.f32 0.7978846, %v1822_v60  ;;  %v2586_v46 = vpack.c.bf16 %v2434_v1, %v2430_v21  ;;  %v2433_v63 = vmul.f32 %v2305_v6, %v6084_v58  ;;  %v6376_v20 = vpop.f32.mrb[70].mxu1 }
 0x271   : > { %v1953_v24 = vmul.f32 0.7978846, %v1825_v32  ;;  %v1954_v12 = vmul.f32 0.7978846, %v1826_v44  ;;  %v1445_v17 = vmul.f32 %v6371_v15, %v6371_v15  ;;  %v6382_v33 = vadd.f32 %v6241_v26, %v5674_v0  ;;  %v6384_v31 = vpop.f32.mrb[71].mxu1 }
 0x272   : > { %v6386_v5 = vpop.eup %4531  ;;  %4539 = vtanh.f32 %v1950_v59  ;;  %3119 = vmatprep.mubr.bf16.mxu0 %v2586_v46  ;;  %v2585_v40 = vpack.c.bf16 %v2433_v63, %v2429_v19  ;;  %v6390_v58 = vadd.f32 %v6244_v10, %v5670_v62  ;;  %v6394_v54 = vadd.f32 %v6252_v51, %v5674_v0 }
 0x273   : > { %v6396_v23 = vpop.eup %4533  ;;  %4541 = vtanh.f32 %v1953_v24  ;;  %v1573_v26 = vmul.f32 %v1445_v17, %v6371_v15  ;;  %v1446_v11 = vmul.f32 %v6382_v33, %v6382_v33  ;;  %v2182_v21 = vadd.f32 1.0, %v6266_v4 }
 0x274   : > { %v6402_v35 = vpop.eup %4535  ;;  %4543 = vtanh.f32 %v1954_v12  ;;  %3120 = vmatmul.mubr.bf16.gmra.mrb[36].mxu0 %v2585_v40  ;;  %v1449_v10 = vmul.f32 %v6390_v58, %v6390_v58  ;;  %v1450_v51 = vmul.f32 %v6394_v54, %v6394_v54  ;;  %v2186_v60 = vadd.f32 1.0, %v6284_v55 }
 0x275   : > { %v1701_v1 = vmul.f32 0.044715, %v1573_v26  ;;  %v1574_v6 = vmul.f32 %v1446_v11, %v6382_v33  ;;  %v2310_v32 = vmul.f32 0.5, %v2182_v21  ;;  %v2181_v44 = vadd.f32 1.0, %v6254_v13 }
 0x276   : > { %v1577_v4 = vmul.f32 %v1449_v10, %v6390_v58  ;;  %v1578_v19 = vmul.f32 %v1450_v51, %v6394_v54  ;;  %v2314_v59 = vmul.f32 0.5, %v2186_v60  ;;  %v2185_v46 = vadd.f32 1.0, %v6273_v38  ;;  %v6414_v63 = vpop.f32.mrb[72].mxu1 }
 0x277   : > { %v1829_v24 = vadd.f32 %v1701_v1, %v6371_v15  ;;  %v1702_v12 = vmul.f32 0.044715, %v1574_v6  ;;  %v2438_v55 = vmul.f32 %v2310_v32, %v6141_v61  ;;  %v2309_v17 = vmul.f32 0.5, %v2181_v44  ;;  %v6418_v40 = vpop.f32.mrb[73].mxu1 }
 0x278   : > { %v1705_v26 = vmul.f32 0.044715, %v1577_v4  ;;  %v1706_v11 = vmul.f32 0.044715, %v1578_v19  ;;  %v2442_v13 = vmul.f32 %v2314_v59, %v6163_v25  ;;  %v2313_v21 = vmul.f32 0.5, %v2185_v46  ;;  %v6421_v10 = vpop.f32.mrb[74].mxu1 }
 0x279   : > { %v1957_v51 = vmul.f32 0.7978846, %v1829_v24  ;;  %v1830_v38 = vadd.f32 %v1702_v12, %v6382_v33  ;;  %v2437_v60 = vmul.f32 %v2309_v17, %v6125_v27  ;;  %v6427_v1 = vadd.f32 %v6282_v9, %v5670_v62  ;;  %v6429_v61 = vpop.f32.mrb[75].mxu1 }
 0x27a   : > { %v6431_v6 = vpop.eup %4537  ;;  %v1833_v32 = vadd.f32 %v1705_v26, %v6390_v58  ;;  %v1834_v25 = vadd.f32 %v1706_v11, %v6394_v54  ;;  %v2590_v44 = vpack.c.bf16 %v2442_v13, %v2438_v55  ;;  %v2441_v4 = vmul.f32 %v2313_v21, %v6145_v39 }
 0x27b   : > { %7657 = vst [vmem:[#allocation27_spill] sm:$0xff] %v6427_v1  ;;  %4545 = vtanh.f32 %v1957_v51  ;;  %v1958_v19 = vmul.f32 0.7978846, %v1830_v38  ;;  %v1453_v27 = vmul.f32 %v6427_v1, %v6427_v1  ;;  %v6440_v9 = vadd.f32 %v6289_v56, %v5674_v0 }
 0x27c   : > { %v6442_v59 = vpop.eup %4539  ;;  %v1961_v46 = vmul.f32 0.7978846, %v1833_v32  ;;  %v1962_v24 = vmul.f32 0.7978846, %v1834_v25  ;;  %3129 = vmatprep.mubr.bf16.mxu0 %v2590_v44  ;;  %v2589_v12 = vpack.c.bf16 %v2441_v4, %v2437_v60  ;;  %v6446_v55 = vadd.f32 %v6295_v47, %v5670_v62 }
 0x27d   : > { %v6448_v39 = vpop.eup %4541  ;;  %4547 = vtanh.f32 %v1958_v19  ;;  %v1581_v17 = vmul.f32 %v1453_v27, %v6427_v1  ;;  %v1454_v26 = vmul.f32 %v6440_v9, %v6440_v9  ;;  %v6455_v56 = vadd.f32 %v6300_v42, %v5674_v0 }
 0x27e   : > { %v6457_v11 = vpop.eup %4543  ;;  %4549 = vtanh.f32 %v1961_v46  ;;  %3130 = vmatmul.mubr.bf16.gmra.mrb[40].mxu0 %v2589_v12  ;;  %v1457_v62 = vmul.f32 %v6446_v55, %v6446_v55  ;;  %v2190_v47 = vadd.f32 1.0, %v6324_v3  ;;  %v2194_v13 = vadd.f32 1.0, %v6343_v57  ;;  %v6463_v21 = vpop.f32.mrb[76].mxu1 }
 0x27f   : > { %4551 = vtanh.f32 %v1962_v24  ;;  %v1709_v51 = vmul.f32 0.044715, %v1581_v17  ;;  %v1582_v38 = vmul.f32 %v1454_v26, %v6440_v9  ;;  %v1458_v0 = vmul.f32 %v6455_v56, %v6455_v56  ;;  %v6468_v42 = vpop.f32.mrb[77].mxu1 }
 0x280   : > { %v1585_v60 = vmul.f32 %v1457_v62, %v6446_v55  ;;  %v2318_v32 = vmul.f32 0.5, %v2190_v47  ;;  %v2322_v25 = vmul.f32 0.5, %v2194_v13  ;;  %v2189_v44 = vadd.f32 1.0, %v6313_v45  ;;  %v6472_v3 = vpop.f32.mrb[78].mxu1 }
 0x281   : > { %v1837_v57 = vadd.f32 %v1709_v51, %v6427_v1  ;;  %v1710_v4 = vmul.f32 0.044715, %v1582_v38  ;;  %v1586_v19 = vmul.f32 %v1458_v0, %v6455_v56  ;;  %v2193_v27 = vadd.f32 1.0, %v6336_v14  ;;  %v6477_v46 = vpop.f32.mrb[79].mxu1 }
 0x282   : > { %v1713_v24 = vmul.f32 0.044715, %v1585_v60  ;;  %v2446_v12 = vmul.f32 %v2318_v32, %v6204_v49  ;;  %v2450_v17 = vmul.f32 %v2322_v25, %v6218_v22  ;;  %v2317_v26 = vmul.f32 0.5, %v2189_v44  ;;  %v4689_v25 = vld [vmem:[%s5309_s9] sm:$0xf] }
 0x283   : > { %v1965_v62 = vmul.f32 0.7978846, %v1837_v57  ;;  %v1838_v45 = vadd.f32 %v1710_v4, %v6440_v9  ;;  %v1714_v47 = vmul.f32 0.044715, %v1586_v19  ;;  %v2321_v13 = vmul.f32 0.5, %v2193_v27 }
 0x284   : > { %v1841_v51 = vadd.f32 %v1713_v24, %v6446_v55  ;;  %v2594_v38 = vpack.c.bf16 %v2450_v17, %v2446_v12  ;;  %v2445_v0 = vmul.f32 %v2317_v26, %v6194_v50  ;;  %v617_v14 = vsub.s32 2, %v5661_v41 }
 0x285   : > { %v6485_v1 = vpop.eup %4545  ;;  %4553 = vtanh.f32 %v1965_v62  ;;  %v1966_v49 = vmul.f32 0.7978846, %v1838_v45  ;;  %v1842_v22 = vadd.f32 %v1714_v47, %v6455_v56  ;;  %v2449_v60 = vmul.f32 %v2321_v13, %v6214_v48 }
 0x286   : > { %v1969_v32 = vmul.f32 0.7978846, %v1841_v51  ;;  %3139 = vmatprep.mubr.bf16.mxu0 %v2594_v38  ;;  %v6490_v44 = vrot.slane %v4689_v25, %v617_v14  ;;  %v621_v57 = vsub.s32 3, %v5661_v41  ;;  %v2198_v4 = vadd.f32 1.0, %v6386_v5  ;;  %v6494_v50 = vpop.f32.mrb[80].mxu1 }
 0x287   : > { %v6496_v19 = vpop.eup %4547  ;;  %4555 = vtanh.f32 %v1966_v49  ;;  %v1970_v27 = vmul.f32 0.7978846, %v1842_v22  ;;  %v2593_v24 = vpack.c.bf16 %v2449_v60, %v2445_v0  ;;  %v2202_v12 = vadd.f32 1.0, %v6402_v35  ;;  %v6499_v17 = vpop.f32.mrb[81].mxu1 }
 0x288   : > { %v6501_v48 = vpop.eup %4549  ;;  %4557 = vtanh.f32 %v1969_v32  ;;  %v6505_v26 = vadd.f32 %v6322_v36, %v6490_v44  ;;  %v6507_v62 = vrot.slane %v4689_v25, %v621_v57  ;;  %v6511_v5 = vadd.f32 %v6341_v18, %v6490_v44  ;;  %v6513_v45 = vpop.f32.mrb[82].mxu1 }
 0x289   : > { %v6515_v47 = vpop.eup %4551  ;;  %4559 = vtanh.f32 %v1970_v27  ;;  %3140 = vmatmul.mubr.bf16.gmra.mrb[44].mxu0 %v2593_v24  ;;  %v2326_v35 = vmul.f32 0.5, %v2198_v4  ;;  %v2330_v13 = vmul.f32 0.5, %v2202_v12  ;;  %v2197_v51 = vadd.f32 1.0, %v6364_v29  ;;  %v6518_v38 = vpop.f32.mrb[83].mxu1 }
 0x28a   : > { %v1335_v36 = vmul.f32 %v6505_v26, %v6505_v26  ;;  %v6524_v0 = vadd.f32 %v6334_v7, %v6507_v62  ;;  %v1339_v18 = vmul.f32 %v6511_v5, %v6511_v5  ;;  %v6530_v14 = vadd.f32 %v6350_v28, %v6507_v62 }
 0x28b   : > { %v2454_v49 = vmul.f32 %v2326_v35, %v6264_v8  ;;  %v2458_v29 = vmul.f32 %v2330_v13, %v6279_v53  ;;  %v2201_v22 = vadd.f32 1.0, %v6396_v23  ;;  %v2325_v60 = vmul.f32 0.5, %v2197_v51  ;;  %v7659_v51 = vld [vmem:[#allocation26_spill] sm:$0xff] }
 0x28c   : > { %7658 = vst [vmem:[#allocation28_spill] sm:$0xff] %v6530_v14  ;;  %v1463_v32 = vmul.f32 %v1335_v36, %v6505_v26  ;;  %v1336_v7 = vmul.f32 %v6524_v0, %v6524_v0  ;;  %v1467_v25 = vmul.f32 %v1339_v18, %v6511_v5  ;;  %v1340_v57 = vmul.f32 %v6530_v14, %v6530_v14 }
 0x28d   : > { %v2598_v4 = vpack.c.bf16 %v2458_v29, %v2454_v49  ;;  %v2329_v28 = vmul.f32 0.5, %v2201_v22  ;;  %v2453_v27 = vmul.f32 %v2325_v60, %v6250_v30  ;;  %v6544_v8 = vadd.f32 %v6362_v52, %v6490_v44 }
 0x28e   : > { %v1591_v53 = vmul.f32 0.044715, %v1463_v32  ;;  %v1464_v23 = vmul.f32 %v1336_v7, %v6524_v0  ;;  %v1595_v24 = vmul.f32 0.044715, %v1467_v25  ;;  %v1468_v12 = vmul.f32 %v1340_v57, %v6530_v14  ;;  %v6548_v35 = vpop.f32.mrb[84].mxu1 }
 0x28f   : > { %v6550_v13 = vpop.eup %4553  ;;  %3149 = vmatprep.mubr.bf16.mxu0 %v2598_v4  ;;  %v2457_v36 = vmul.f32 %v2329_v28, %v7659_v51  ;;  %v1343_v30 = vmul.f32 %v6544_v8, %v6544_v8  ;;  %v6557_v52 = vadd.f32 %v6373_v34, %v6507_v62  ;;  %v6561_v18 = vadd.f32 %v6376_v20, %v6490_v44  ;;  %v6563_v49 = vpop.f32.mrb[85].mxu1 }
 0x290   : > { %v1719_v29 = vadd.f32 %v1591_v53, %v6505_v26  ;;  %v1592_v22 = vmul.f32 0.044715, %v1464_v23  ;;  %v1723_v60 = vadd.f32 %v1595_v24, %v6511_v5  ;;  %v1596_v32 = vmul.f32 0.044715, %v1468_v12  ;;  %v6567_v7 = vpop.f32.mrb[86].mxu1 }
 0x291   : > { %7660 = vst [vmem:[#allocation26_spill] sm:$0xff] %v6567_v7  ;;  %v6569_v25 = vpop.eup %4555  ;;  %v2597_v57 = vpack.c.bf16 %v2457_v36, %v2453_v27  ;;  %v1471_v34 = vmul.f32 %v1343_v30, %v6544_v8  ;;  %v1344_v4 = vmul.f32 %v6557_v52, %v6557_v52  ;;  %v1347_v20 = vmul.f32 %v6561_v18, %v6561_v18  ;;  %v6576_v28 = vpop.f32.mrb[87].mxu1 }
 0x292   : > { %7661 = vst [vmem:[#allocation29_spill] sm:$0xff] %v6576_v28  ;;  %v6578_v53 = vpop.eup %4557  ;;  %v1847_v23 = vmul.f32 0.7978846, %v1719_v29  ;;  %v1720_v24 = vadd.f32 %v1592_v22, %v6524_v0  ;;  %v1851_v12 = vmul.f32 0.7978846, %v1723_v60  ;;  %v1724_v51 = vadd.f32 %v1596_v32, %v6530_v14 }
 0x293   : > { %v6582_v41 = vpop.eup %4559  ;;  %3150 = vmatmul.mubr.bf16.gmra.mrb[48].mxu0 %v2597_v57  ;;  %v1599_v27 = vmul.f32 0.044715, %v1471_v34  ;;  %v1472_v36 = vmul.f32 %v1344_v4, %v6557_v52  ;;  %v1475_v30 = vmul.f32 %v1347_v20, %v6561_v18  ;;  %v6588_v7 = vadd.f32 %v6384_v31, %v6507_v62 }
 0x294   : > { %4561 = vtanh.f32 %v1847_v23  ;;  %v1848_v28 = vmul.f32 0.7978846, %v1720_v24  ;;  %v1852_v29 = vmul.f32 0.7978846, %v1724_v51  ;;  %v2206_v22 = vadd.f32 1.0, %v6442_v59 }
 0x295   : > { %4563 = vtanh.f32 %v1851_v12  ;;  %v1727_v60 = vadd.f32 %v1599_v27, %v6544_v8  ;;  %v1600_v32 = vmul.f32 0.044715, %v1472_v36  ;;  %v1603_v14 = vmul.f32 0.044715, %v1475_v30 }
 0x296   : > { %4565 = vtanh.f32 %v1848_v28  ;;  %v1348_v57 = vmul.f32 %v6588_v7, %v6588_v7  ;;  %v2210_v34 = vadd.f32 1.0, %v6457_v11  ;;  %v2334_v4 = vmul.f32 0.5, %v2206_v22  ;;  %v6595_v20 = vpop.f32.mrb[88].mxu1 }
 0x297   : > { %4567 = vtanh.f32 %v1852_v29  ;;  %v1855_v31 = vmul.f32 0.7978846, %v1727_v60  ;;  %v1728_v23 = vadd.f32 %v1600_v32, %v6557_v52  ;;  %v1731_v59 = vadd.f32 %v1603_v14, %v6561_v18  ;;  %v6599_v24 = vpop.f32.mrb[89].mxu1 }
 0x298   : > { %v1476_v12 = vmul.f32 %v1348_v57, %v6588_v7  ;;  %v2338_v51 = vmul.f32 0.5, %v2210_v34  ;;  %v2462_v28 = vmul.f32 %v2334_v4, %v6320_v16  ;;  %v2205_v27 = vadd.f32 1.0, %v6431_v6  ;;  %v6604_v36 = vpop.f32.mrb[90].mxu1 }
 0x299   : > { %4569 = vtanh.f32 %v1855_v31  ;;  %v1856_v11 = vmul.f32 0.7978846, %v1728_v23  ;;  %v1859_v30 = vmul.f32 0.7978846, %v1731_v59  ;;  %v2209_v29 = vadd.f32 1.0, %v6448_v39  ;;  %v6607_v22 = vpop.f32.mrb[91].mxu1 }
 0x29a   : > { %v1604_v60 = vmul.f32 0.044715, %v1476_v12  ;;  %v2466_v14 = vmul.f32 %v2338_v51, %v6332_v43  ;;  %v2333_v32 = vmul.f32 0.5, %v2205_v27  ;;  %v6612_v57 = vadd.f32 %v6414_v63, %v6490_v44 }
 0x29b   : > { %4571 = vtanh.f32 %v1856_v11  ;;  %v2337_v16 = vmul.f32 0.5, %v2209_v29  ;;  %v6616_v6 = vadd.f32 %v6418_v40, %v6507_v62  ;;  %v6620_v34 = vadd.f32 %v6421_v10, %v6490_v44 }
 0x29c   : > { %4573 = vtanh.f32 %v1859_v30  ;;  %v1732_v39 = vadd.f32 %v1604_v60, %v6588_v7  ;;  %v2602_v4 = vpack.c.bf16 %v2466_v14, %v2462_v28  ;;  %v2461_v43 = vmul.f32 %v2333_v32, %v6309_v2 }
 0x29d   : > { %v2465_v31 = vmul.f32 %v2337_v16, %v6328_v37  ;;  %v1351_v63 = vmul.f32 %v6612_v57, %v6612_v57  ;;  %v1352_v23 = vmul.f32 %v6616_v6, %v6616_v6  ;;  %v1355_v40 = vmul.f32 %v6620_v34, %v6620_v34 }
 0x29e   : > { %v4562_v59 = vpop.eup %4561  ;;  %v1860_v10 = vmul.f32 0.7978846, %v1732_v39  ;;  %3159 = vmatprep.mubr.bf16.mxu0 %v2602_v4  ;;  %v6633_v12 = vadd.f32 %v6429_v61, %v6507_v62  ;;  %v2214_v2 = vadd.f32 1.0, %v6496_v19  ;;  %v2218_v37 = vadd.f32 1.0, %v6515_v47  ;;  %v6637_v51 = vpop.f32.mrb[92].mxu1 }
 0x29f   : > { %v4564_v28 = vpop.eup %4563  ;;  %v2103_v27 = vadd.f32 1.0, %v4562_v59  ;;  %v2601_v11 = vpack.c.bf16 %v2465_v31, %v2461_v43  ;;  %v1479_v30 = vmul.f32 %v1351_v63, %v6612_v57  ;;  %v1480_v29 = vmul.f32 %v1352_v23, %v6616_v6  ;;  %v6641_v60 = vpop.f32.mrb[93].mxu1 }
 0x2a0   : > { %7662 = vst [vmem:[#allocation30_spill] sm:$0xff] %v6641_v60  ;;  %v6643_v14 = vpop.eup %4565  ;;  %v2107_v32 = vadd.f32 1.0, %v4564_v28  ;;  %4575 = vtanh.f32 %v1860_v10  ;;  %v1483_v61 = vmul.f32 %v1355_v40, %v6620_v34  ;;  %v1356_v19 = vmul.f32 %v6633_v12, %v6633_v12  ;;  %v6648_v47 = vpop.f32.mrb[94].mxu1 }
 0x2a1   : > { %7663 = vst [vmem:[#allocation31_spill] sm:$0xff] %v6648_v47  ;;  %v6650_v16 = vpop.eup %4567  ;;  %v2231_v39 = vmul.f32 0.5, %v2103_v27  ;;  %3160 = vmatmul.mubr.bf16.gmra.mrb[52].mxu0 %v2601_v11  ;;  %v1607_v4 = vmul.f32 0.044715, %v1479_v30  ;;  %v1608_v43 = vmul.f32 0.044715, %v1480_v29 }
 0x2a2   : > { %v2342_v31 = vmul.f32 0.5, %v2214_v2  ;;  %v2235_v63 = vmul.f32 0.5, %v2107_v32  ;;  %v1611_v23 = vmul.f32 0.044715, %v1483_v61  ;;  %v1484_v59 = vmul.f32 %v1356_v19, %v6633_v12  ;;  %v6653_v10 = vpop.f32.mrb[95].mxu1 }
 0x2a3   : > { %v2346_v28 = vmul.f32 0.5, %v2218_v37  ;;  %v6655_v40 = vpop.eup %4569  ;;  %v6658_v60 = vmul.f32 %v2231_v39, %v6505_v26  ;;  %v1735_v47 = vadd.f32 %v1607_v4, %v6612_v57  ;;  %v1736_v27 = vadd.f32 %v1608_v43, %v6616_v6 }
 0x2a4   : > { %v2470_v11 = vmul.f32 %v2342_v31, %v6382_v33  ;;  %v6664_v2 = vmul.f32 %v2235_v63, %v6511_v5  ;;  %v1739_v30 = vadd.f32 %v1611_v23, %v6620_v34  ;;  %v1612_v29 = vmul.f32 0.044715, %v1484_v59 }
 0x2a5   : > { %v2474_v37 = vmul.f32 %v2346_v28, %v6394_v54  ;;  %v6668_v32 = vpop.eup %4571  ;;  %v1863_v61 = vmul.f32 0.7978846, %v1735_v47  ;;  %v1864_v19 = vmul.f32 0.7978846, %v1736_v27  ;;  %v2213_v26 = vadd.f32 1.0, %v6485_v1 }
 0x2a6   : > { %v2217_v39 = vadd.f32 1.0, %v6501_v48  ;;  %v6672_v4 = vpop.eup %4573  ;;  %v1867_v5 = vmul.f32 0.7978846, %v1739_v30  ;;  %v1740_v43 = vadd.f32 %v1612_v29, %v6633_v12  ;;  %v6677_v63 = vpop.f32.mrb[96].mxu1  ;;  %v6681_v47 = vadd.f32 %v6463_v21, %v6490_v44 }
 0x2a7   : > { %v2606_v31 = vpack.c.bf16 %v2474_v37, %v2470_v11  ;;  %4577 = vtanh.f32 %v1863_v61  ;;  %v2341_v54 = vmul.f32 0.5, %v2213_v26  ;;  %v6683_v1 = vpop.f32.mrb[97].mxu1  ;;  %v6687_v59 = vadd.f32 %v6468_v42, %v6507_v62 }
 0x2a8   : > { %v2345_v23 = vmul.f32 0.5, %v2217_v39  ;;  %4579 = vtanh.f32 %v1864_v19  ;;  %v1868_v48 = vmul.f32 0.7978846, %v1740_v43  ;;  %v6691_v28 = vadd.f32 %v6472_v3, %v6490_v44  ;;  %v6693_v27 = vpop.f32.mrb[98].mxu1 }
 0x2a9   : > { %3169 = vmatprep.mubr.bf16.mxu0 %v2606_v31  ;;  %4581 = vtanh.f32 %v1867_v5  ;;  %v2469_v11 = vmul.f32 %v2341_v54, %v6371_v15  ;;  %v1359_v30 = vmul.f32 %v6681_v47, %v6681_v47  ;;  %v6699_v29 = vpop.f32.mrb[99].mxu1  ;;  %v1360_v42 = vmul.f32 %v6687_v59, %v6687_v59 }
 0x2aa   : > { %v2473_v21 = vmul.f32 %v2345_v23, %v6390_v58  ;;  %v6701_v37 = vpop.eup %4575  ;;  %4583 = vtanh.f32 %v1868_v48  ;;  %v1363_v3 = vmul.f32 %v6691_v28, %v6691_v28  ;;  %v6709_v61 = vadd.f32 %v6477_v46, %v6507_v62 }
 0x2ab   : > { %v1487_v58 = vmul.f32 %v1359_v30, %v6681_v47  ;;  %v2222_v19 = vadd.f32 1.0, %v6569_v25  ;;  %v2226_v26 = vadd.f32 1.0, %v6582_v41  ;;  %v1488_v39 = vmul.f32 %v1360_v42, %v6687_v59 }
 0x2ac   : > { %v2605_v15 = vpack.c.bf16 %v2473_v21, %v2469_v11  ;;  %v1491_v5 = vmul.f32 %v1363_v3, %v6691_v28  ;;  %v1364_v43 = vmul.f32 %v6709_v61, %v6709_v61  ;;  %v2221_v31 = vadd.f32 1.0, %v6550_v13 }
 0x2ad   : > { %v1615_v54 = vmul.f32 0.044715, %v1487_v58  ;;  %v2350_v46 = vmul.f32 0.5, %v2222_v19  ;;  %v2354_v23 = vmul.f32 0.5, %v2226_v26  ;;  %v2225_v48 = vadd.f32 1.0, %v6578_v53  ;;  %v7664_v26 = vld [vmem:[#allocation27_spill] sm:$0xff] }
 0x2ae   : > { %3170 = vmatmul.mubr.bf16.gmra.mrb[56].mxu0 %v2605_v15  ;;  %v1616_v11 = vmul.f32 0.044715, %v1488_v39  ;;  %v1619_v21 = vmul.f32 0.044715, %v1491_v5  ;;  %v1492_v25 = vmul.f32 %v1364_v43, %v6709_v61  ;;  %v2349_v41 = vmul.f32 0.5, %v2221_v31  ;;  %v6721_v30 = vpop.f32.mrb[100].mxu1 }
 0x2af   : > { %v1743_v42 = vadd.f32 %v1615_v54, %v6681_v47  ;;  %v2478_v3 = vmul.f32 %v2350_v46, %v6440_v9  ;;  %v2482_v33 = vmul.f32 %v2354_v23, %v6455_v56  ;;  %v2353_v13 = vmul.f32 0.5, %v2225_v48  ;;  %v6726_v15 = vpop.f32.mrb[101].mxu1 }
 0x2b0   : > { %v1744_v58 = vadd.f32 %v1616_v11, %v6687_v59  ;;  %v1747_v53 = vadd.f32 %v1619_v21, %v6691_v28  ;;  %v1620_v19 = vmul.f32 0.044715, %v1492_v25  ;;  %v2477_v39 = vmul.f32 %v2349_v41, %v7664_v26  ;;  %v6731_v5 = vpop.f32.mrb[102].mxu1 }
 0x2b1   : > { %v6733_v43 = vpop.eup %4577  ;;  %v1871_v31 = vmul.f32 0.7978846, %v1743_v42  ;;  %v2610_v54 = vpack.c.bf16 %v2482_v33, %v2478_v3  ;;  %v2481_v9 = vmul.f32 %v2353_v13, %v6446_v55  ;;  %v6738_v56 = vadd.f32 %v6494_v50, %v6490_v44  ;;  %v6740_v46 = vpop.f32.mrb[103].mxu1 }
 0x2b2   : > { %v6742_v23 = vpop.eup %4579  ;;  %v1872_v48 = vmul.f32 0.7978846, %v1744_v58  ;;  %v1875_v11 = vmul.f32 0.7978846, %v1747_v53  ;;  %v1748_v21 = vadd.f32 %v1620_v19, %v6709_v61  ;;  %v6747_v25 = vadd.f32 %v6499_v17, %v6507_v62 }
 0x2b3   : > { %v6749_v41 = vpop.eup %4581  ;;  %4585 = vtanh.f32 %v1871_v31  ;;  %3179 = vmatprep.mubr.bf16.mxu0 %v2610_v54  ;;  %v2609_v55 = vpack.c.bf16 %v2481_v9, %v2477_v39  ;;  %v1367_v50 = vmul.f32 %v6738_v56, %v6738_v56  ;;  %v6755_v33 = vadd.f32 %v6513_v45, %v6490_v44 }
 0x2b4   : > { %v6757_v42 = vpop.eup %4583  ;;  %4587 = vtanh.f32 %v1872_v48  ;;  %v1876_v3 = vmul.f32 0.7978846, %v1748_v21  ;;  %v1368_v17 = vmul.f32 %v6747_v25, %v6747_v25  ;;  %v6763_v13 = vadd.f32 %v6518_v38, %v6507_v62 }
 0x2b5   : > { %4589 = vtanh.f32 %v1875_v11  ;;  %v1495_v58 = vmul.f32 %v1367_v50, %v6738_v56  ;;  %v1371_v53 = vmul.f32 %v6755_v33, %v6755_v33  ;;  %v2104_v45 = vadd.f32 1.0, %v6643_v14 }
 0x2b6   : > { %3180 = vmatmul.mubr.bf16.gmra.mrb[60].mxu0 %v2609_v55  ;;  %4591 = vtanh.f32 %v1876_v3  ;;  %v1496_v19 = vmul.f32 %v1368_v17, %v6747_v25  ;;  %v1372_v26 = vmul.f32 %v6763_v13, %v6763_v13  ;;  %v2108_v39 = vadd.f32 1.0, %v6650_v16  ;;  %v6773_v31 = vpop.f32.mrb[104].mxu1 }
 0x2b7   : > { %7665 = vst [vmem:[#allocation27_spill] sm:$0xff] %v6773_v31  ;;  %v1623_v38 = vmul.f32 0.044715, %v1495_v58  ;;  %v1499_v54 = vmul.f32 %v1371_v53, %v6755_v33  ;;  %v2232_v9 = vmul.f32 0.5, %v2104_v45  ;;  %v6778_v48 = vadd.f32 %v6548_v35, %v6490_v44  ;;  %v6780_v11 = vpop.f32.mrb[105].mxu1 }
 0x2b8   : > { %7667 = vst [vmem:[#allocation33_spill] sm:$0xff] %v6780_v11  ;;  %v1624_v14 = vmul.f32 0.044715, %v1496_v19  ;;  %v1500_v21 = vmul.f32 %v1372_v26, %v6763_v13  ;;  %v2236_v55 = vmul.f32 0.5, %v2108_v39  ;;  %v6785_v50 = vadd.f32 %v6563_v49, %v6507_v62  ;;  %v6787_v16 = vpop.f32.mrb[106].mxu1  ;;  %v7670_v26 = vld [vmem:[#allocation28_spill] sm:$0xff] }
 0x2b9   : > { %7666 = vst [vmem:[#allocation32_spill] sm:$0xff] %v6778_v48  ;;  %7668 = vst [vmem:[#allocation34_spill] sm:$0xff] %v6787_v16  ;;  %v1751_v3 = vadd.f32 %v1623_v38, %v6738_v56  ;;  %v1627_v17 = vmul.f32 0.044715, %v1499_v54  ;;  %v2360_v58 = vmul.f32 %v2232_v9, %v6524_v0  ;;  %v1375_v35 = vmul.f32 %v6778_v48, %v6778_v48  ;;  %v6793_v53 = vpop.f32.mrb[107].mxu1  ;;  %v7671_v0 = vld [vmem:[#allocation26_spill] sm:$0xff] }
 0x2ba   : > { %7669 = vst [vmem:[#allocation35_spill] sm:$0xff] %v6793_v53  ;;  %v1752_v45 = vadd.f32 %v1624_v14, %v6747_v25  ;;  %v1628_v19 = vmul.f32 0.044715, %v1500_v21  ;;  %v2364_v39 = vmul.f32 %v2236_v55, %v7670_v26  ;;  %v1376_v49 = vmul.f32 %v6785_v50, %v6785_v50 }
 0x2bb   : > { %v1879_v11 = vmul.f32 0.7978846, %v1751_v3  ;;  %v1755_v16 = vadd.f32 %v1627_v17, %v6755_v33  ;;  %v1503_v38 = vmul.f32 %v1375_v35, %v6778_v48  ;;  %v6803_v54 = vadd.f32 %v7671_v0, %v6490_v44 }
 0x2bc   : > { %v1880_v9 = vmul.f32 0.7978846, %v1752_v45  ;;  %v1756_v53 = vadd.f32 %v1628_v19, %v6763_v13  ;;  %v2552_v31 = vpack.c.bf16 %v2364_v39, %v2360_v58  ;;  %v1504_v14 = vmul.f32 %v1376_v49, %v6785_v50  ;;  %v7672_v45 = vld [vmem:[#allocation29_spill] sm:$0xff] }
 0x2bd   : > { %v6807_v21 = vpop.eup %4585  ;;  %4593 = vtanh.f32 %v1879_v11  ;;  %v1883_v55 = vmul.f32 0.7978846, %v1755_v16  ;;  %v1631_v26 = vmul.f32 0.044715, %v1503_v38  ;;  %v1379_v3 = vmul.f32 %v6803_v54, %v6803_v54 }
 0x2be   : > { %v6811_v17 = vpop.eup %4587  ;;  %4595 = vtanh.f32 %v1880_v9  ;;  %v1884_v35 = vmul.f32 0.7978846, %v1756_v53  ;;  %3222 = vmatprep.mubr.bf16.mxu0 %v2552_v31  ;;  %v1632_v0 = vmul.f32 0.044715, %v1504_v14  ;;  %v6815_v19 = vadd.f32 %v7672_v45, %v6507_v62  ;;  %v6817_v58 = vpop.f32.mrb[108].mxu1 }
 0x2bf   : > { %7673 = vst [vmem:[#allocation28_spill] sm:$0xff] %v6817_v58  ;;  %v6819_v39 = vpop.eup %4589  ;;  %4597 = vtanh.f32 %v1883_v55  ;;  %v7674_v11 = vpack.c.bf16 %v6664_v2, %v6658_v60  ;;  %v1759_v16 = vadd.f32 %v1631_v26, %v6778_v48  ;;  %v1507_v49 = vmul.f32 %v1379_v3, %v6803_v54  ;;  %v6827_v53 = vpop.f32.mrb[109].mxu1 }
 0x2c0   : > { %v2112_v31 = vadd.f32 1.0, %v6668_v32  ;;  %7675 = vst [vmem:[#allocation26_spill] sm:$0xff] %v6827_v53  ;;  %v6829_v38 = vpop.eup %4591  ;;  %4599 = vtanh.f32 %v1884_v35  ;;  %v1760_v9 = vadd.f32 %v1632_v0, %v6785_v50  ;;  %v1380_v14 = vmul.f32 %v6815_v19, %v6815_v19  ;;  %v6835_v60 = vpop.f32.mrb[110].mxu1 }
 0x2c1   : > { %3223 = vmatmul.mubr.bf16.vlgmr.msra.gmra.mrb[0].mxu0 %v7674_v11  ;;  %v2116_v55 = vadd.f32 1.0, %v6701_v37  ;;  %v1887_v2 = vmul.f32 0.7978846, %v1759_v16  ;;  %v1635_v26 = vmul.f32 0.044715, %v1507_v49  ;;  %v2111_v3 = vadd.f32 1.0, %v6655_v40 }
 0x2c2   : > { %v2240_v45 = vmul.f32 0.5, %v2112_v31  ;;  %v1888_v32 = vmul.f32 0.7978846, %v1760_v9  ;;  %v1508_v11 = vmul.f32 %v1380_v14, %v6815_v19  ;;  %v2115_v35 = vadd.f32 1.0, %v6672_v4  ;;  %v6840_v58 = vpop.f32.mrb[111].mxu1 }
 0x2c3   : > { %v2244_v53 = vmul.f32 0.5, %v2116_v55  ;;  %4601 = vtanh.f32 %v1887_v2  ;;  %v1763_v0 = vadd.f32 %v1635_v26, %v6803_v54  ;;  %v2239_v48 = vmul.f32 0.5, %v2111_v3 }
 0x2c4   : > { %v2368_v37 = vmul.f32 %v2240_v45, %v6557_v52  ;;  %4603 = vtanh.f32 %v1888_v32  ;;  %v1636_v16 = vmul.f32 0.044715, %v1508_v11  ;;  %v2243_v31 = vmul.f32 0.5, %v2115_v35 }
 0x2c5   : > { %v2372_v49 = vmul.f32 %v2244_v53, %v6588_v7  ;;  %v1891_v40 = vmul.f32 0.7978846, %v1763_v0  ;;  %v2367_v9 = vmul.f32 %v2239_v48, %v6544_v8  ;;  %v6848_v14 = vadd.f32 %v6595_v20, %v6490_v44 }
 0x2c6   : > { %v6852_v4 = vadd.f32 %v6599_v24, %v6507_v62  ;;  %v1764_v55 = vadd.f32 %v1636_v16, %v6815_v19  ;;  %v2371_v2 = vmul.f32 %v2243_v31, %v6561_v18  ;;  %v6858_v7 = vadd.f32 %v6604_v36, %v6490_v44  ;;  %v6860_v53 = vpop.f32.mrb[112].mxu1 }
 0x2c7   : > { %v2556_v52 = vpack.c.bf16 %v2372_v49, %v2368_v37  ;;  %v6862_v8 = vpop.eup %4593  ;;  %4605 = vtanh.f32 %v1891_v40  ;;  %v1383_v20 = vmul.f32 %v6848_v14, %v6848_v14  ;;  %v6870_v48 = vadd.f32 %v6607_v22, %v6507_v62  ;;  %v6872_v18 = vpop.f32.mrb[113].mxu1 }
 0x2c8   : > { %v1384_v24 = vmul.f32 %v6852_v4, %v6852_v4  ;;  %7676 = vst [vmem:[#allocation29_spill] sm:$0xff] %v6872_v18  ;;  %v6874_v26 = vpop.eup %4595  ;;  %v1892_v36 = vmul.f32 0.7978846, %v1764_v55  ;;  %v2555_v45 = vpack.c.bf16 %v2371_v2, %v2367_v9  ;;  %v1387_v3 = vmul.f32 %v6858_v7, %v6858_v7  ;;  %v6879_v11 = vpop.f32.mrb[114].mxu1 }
 0x2c9   : > { %3232 = vmatprep.mubr.bf16.mxu0 %v2556_v52  ;;  %v2120_v32 = vadd.f32 1.0, %v6742_v23  ;;  %7677 = vst [vmem:[#allocation36_spill] sm:$0xff] %v6879_v11  ;;  %v6881_v35 = vpop.eup %4597  ;;  %v1511_v0 = vmul.f32 %v1383_v20, %v6848_v14  ;;  %v1388_v37 = vmul.f32 %v6870_v48, %v6870_v48  ;;  %v2124_v16 = vadd.f32 1.0, %v6757_v42  ;;  %v6888_v49 = vpop.f32.mrb[115].mxu1 }
 0x2ca   : > { %v1512_v22 = vmul.f32 %v1384_v24, %v6852_v4  ;;  %7678 = vst [vmem:[#allocation37_spill] sm:$0xff] %v6888_v49  ;;  %v6890_v31 = vpop.eup %4599  ;;  %4607 = vtanh.f32 %v1892_v36  ;;  %3233 = vmatmul.mubr.bf16.gmra.mrb[4].mxu0 %v2555_v45  ;;  %v1515_v23 = vmul.f32 %v1387_v3, %v6858_v7  ;;  %v2119_v9 = vadd.f32 1.0, %v6733_v43 }
 0x2cb   : > { %v2248_v40 = vmul.f32 0.5, %v2120_v32  ;;  %v1639_v55 = vmul.f32 0.044715, %v1511_v0  ;;  %v1516_v2 = vmul.f32 %v1388_v37, %v6870_v48  ;;  %v2252_v20 = vmul.f32 0.5, %v2124_v16 }
 0x2cc   : > { %v1640_v52 = vmul.f32 0.044715, %v1512_v22  ;;  %v1643_v24 = vmul.f32 0.044715, %v1515_v23  ;;  %v2123_v42 = vadd.f32 1.0, %v6749_v41  ;;  %v2247_v49 = vmul.f32 0.5, %v2119_v9 }
 0x2cd   : > { %v2376_v11 = vmul.f32 %v2248_v40, %v6616_v6  ;;  %v6897_v18 = vpop.eup %4601  ;;  %v1767_v36 = vadd.f32 %v1639_v55, %v6848_v14  ;;  %v1644_v3 = vmul.f32 0.044715, %v1516_v2  ;;  %v2380_v43 = vmul.f32 %v2252_v20, %v6633_v12 }
 0x2ce   : > { %v1768_v45 = vadd.f32 %v1640_v52, %v6852_v4  ;;  %v6902_v32 = vpop.eup %4603  ;;  %v1771_v0 = vadd.f32 %v1643_v24, %v6858_v7  ;;  %v2251_v22 = vmul.f32 0.5, %v2123_v42  ;;  %v2375_v37 = vmul.f32 %v2247_v49, %v6612_v57  ;;  %v6910_v41 = vpop.f32.mrb[116].mxu1  ;;  %v7679_v57 = vld [vmem:[#allocation30_spill] sm:$0xff] }
 0x2cf   : > { %v6908_v6 = vadd.f32 %v6637_v51, %v6490_v44  ;;  %v1895_v16 = vmul.f32 0.7978846, %v1767_v36  ;;  %v1772_v40 = vadd.f32 %v1644_v3, %v6870_v48  ;;  %v2560_v9 = vpack.c.bf16 %v2380_v43, %v2376_v11  ;;  %v6913_v55 = vpop.f32.mrb[117].mxu1  ;;  %v7681_v11 = vld [vmem:[#allocation31_spill] sm:$0xff] }
 0x2d0   : > { %v1896_v23 = vmul.f32 0.7978846, %v1768_v45  ;;  %v1899_v12 = vmul.f32 0.7978846, %v1771_v0  ;;  %v2379_v52 = vmul.f32 %v2251_v22, %v6620_v34  ;;  %v6920_v49 = vadd.f32 %v7679_v57, %v6507_v62  ;;  %v6922_v51 = vpop.f32.mrb[118].mxu1 }
 0x2d1   : > { %v1391_v2 = vmul.f32 %v6908_v6, %v6908_v6  ;;  %7680 = vst [vmem:[#allocation30_spill] sm:$0xff] %v6922_v51  ;;  %v6924_v20 = vpop.eup %4605  ;;  %4609 = vtanh.f32 %v1895_v16  ;;  %v1900_v24 = vmul.f32 0.7978846, %v1772_v40  ;;  %3242 = vmatprep.mubr.bf16.mxu0 %v2560_v9  ;;  %v6928_v42 = vadd.f32 %v7681_v11, %v6490_v44  ;;  %v6934_v36 = vpop.f32.mrb[119].mxu1 }
 0x2d2   : > { %v6932_v34 = vadd.f32 %v6653_v10, %v6507_v62  ;;  %7682 = vst [vmem:[#allocation31_spill] sm:$0xff] %v6934_v36  ;;  %4611 = vtanh.f32 %v1896_v23  ;;  %v2559_v45 = vpack.c.bf16 %v2379_v52, %v2375_v37  ;;  %v1392_v43 = vmul.f32 %v6920_v49, %v6920_v49 }
 0x2d3   : > { %v1519_v3 = vmul.f32 %v1391_v2, %v6908_v6  ;;  %4613 = vtanh.f32 %v1899_v12  ;;  %v1395_v0 = vmul.f32 %v6928_v42, %v6928_v42  ;;  %v2128_v16 = vadd.f32 1.0, %v6811_v17 }
 0x2d4   : > { %v1396_v22 = vmul.f32 %v6932_v34, %v6932_v34  ;;  %v6944_v10 = vpop.eup %4607  ;;  %4615 = vtanh.f32 %v1900_v24  ;;  %3243 = vmatmul.mubr.bf16.gmra.mrb[8].mxu0 %v2559_v45  ;;  %v1520_v37 = vmul.f32 %v1392_v43, %v6920_v49  ;;  %v2132_v40 = vadd.f32 1.0, %v6829_v38 }
 0x2d5   : > { %v1647_v23 = vmul.f32 0.044715, %v1519_v3  ;;  %v1523_v9 = vmul.f32 %v1395_v0, %v6928_v42  ;;  %v2256_v52 = vmul.f32 0.5, %v2128_v16  ;;  %v2127_v2 = vadd.f32 1.0, %v6807_v21 }
 0x2d6   : > { %v1524_v12 = vmul.f32 %v1396_v22, %v6932_v34  ;;  %v1648_v11 = vmul.f32 0.044715, %v1520_v37  ;;  %v2260_v17 = vmul.f32 0.5, %v2132_v40  ;;  %v2131_v36 = vadd.f32 1.0, %v6819_v39  ;;  %v6953_v24 = vpop.f32.mrb[120].mxu1 }
 0x2d7   : > { %v1775_v57 = vadd.f32 %v1647_v23, %v6908_v6  ;;  %v1651_v45 = vmul.f32 0.044715, %v1523_v9  ;;  %v2384_v43 = vmul.f32 %v2256_v52, %v6687_v59  ;;  %v2255_v38 = vmul.f32 0.5, %v2127_v2  ;;  %v6956_v51 = vpop.f32.mrb[121].mxu1 }
 0x2d8   : > { %v1652_v3 = vmul.f32 0.044715, %v1524_v12  ;;  %v1776_v22 = vadd.f32 %v1648_v11, %v6920_v49  ;;  %v2388_v21 = vmul.f32 %v2260_v17, %v6709_v61  ;;  %v2259_v16 = vmul.f32 0.5, %v2131_v36  ;;  %v6960_v23 = vpop.f32.mrb[122].mxu1 }
 0x2d9   : > { %v1903_v0 = vmul.f32 0.7978846, %v1775_v57  ;;  %v1779_v37 = vadd.f32 %v1651_v45, %v6928_v42  ;;  %v2383_v40 = vmul.f32 %v2255_v38, %v6681_v47  ;;  %v6967_v59 = vadd.f32 %v6677_v63, %v6490_v44  ;;  %v6969_v9 = vpop.f32.mrb[123].mxu1 }
 0x2da   : > { %v1780_v39 = vadd.f32 %v1652_v3, %v6932_v34  ;;  %v1904_v12 = vmul.f32 0.7978846, %v1776_v22  ;;  %v2564_v52 = vpack.c.bf16 %v2388_v21, %v2384_v43  ;;  %v2387_v61 = vmul.f32 %v2259_v16, %v6691_v28 }
 0x2db   : > { %4617 = vtanh.f32 %v1903_v0  ;;  %v6972_v36 = vpop.eup %4609  ;;  %v1907_v2 = vmul.f32 0.7978846, %v1779_v37  ;;  %v1399_v11 = vmul.f32 %v6967_v59, %v6967_v59  ;;  %v6978_v47 = vadd.f32 %v6683_v1, %v6507_v62 }
 0x2dc   : > { %v1908_v57 = vmul.f32 0.7978846, %v1780_v39  ;;  %v6980_v63 = vpop.eup %4611  ;;  %4619 = vtanh.f32 %v1904_v12  ;;  %3252 = vmatprep.mubr.bf16.mxu0 %v2564_v52  ;;  %v2563_v17 = vpack.c.bf16 %v2387_v61, %v2383_v40  ;;  %v6984_v45 = vadd.f32 %v6693_v27, %v6490_v44 }
 0x2dd   : > { %v6988_v28 = vadd.f32 %v6699_v29, %v6507_v62  ;;  %v6990_v3 = vpop.eup %4613  ;;  %4621 = vtanh.f32 %v1907_v2  ;;  %v1527_v43 = vmul.f32 %v1399_v11, %v6967_v59  ;;  %v1400_v1 = vmul.f32 %v6978_v47, %v6978_v47 }
 0x2de   : > { %v2136_v38 = vadd.f32 1.0, %v6874_v26  ;;  %v6996_v0 = vpop.eup %4615  ;;  %4623 = vtanh.f32 %v1908_v57  ;;  %3253 = vmatmul.mubr.bf16.gmra.mrb[12].mxu0 %v2563_v17  ;;  %v1403_v27 = vmul.f32 %v6984_v45, %v6984_v45  ;;  %v2140_v22 = vadd.f32 1.0, %v6890_v31  ;;  %v7003_v21 = vpop.f32.mrb[124].mxu1 }
 0x2df   : > { %v1404_v29 = vmul.f32 %v6988_v28, %v6988_v28  ;;  %7683 = vst [vmem:[#allocation38_spill] sm:$0xff] %v7003_v21  ;;  %v1655_v16 = vmul.f32 0.044715, %v1527_v43  ;;  %v1528_v37 = vmul.f32 %v1400_v1, %v6978_v47  ;;  %v2135_v26 = vadd.f32 1.0, %v6862_v8  ;;  %v7007_v40 = vpop.f32.mrb[125].mxu1 }
 0x2e0   : > { %v2264_v39 = vmul.f32 0.5, %v2136_v38  ;;  %7684 = vst [vmem:[#allocation39_spill] sm:$0xff] %v7007_v40  ;;  %v1531_v12 = vmul.f32 %v1403_v27, %v6984_v45  ;;  %v2268_v61 = vmul.f32 0.5, %v2140_v22  ;;  %v2139_v2 = vadd.f32 1.0, %v6881_v35  ;;  %v7012_v57 = vpop.f32.mrb[126].mxu1 }
 0x2e1   : > { %v1532_v52 = vmul.f32 %v1404_v29, %v6988_v28  ;;  %v1783_v31 = vadd.f32 %v1655_v16, %v6967_v59  ;;  %v1656_v11 = vmul.f32 0.044715, %v1528_v37  ;;  %v2263_v43 = vmul.f32 0.5, %v2135_v26  ;;  %v7016_v1 = vpop.f32.mrb[127].mxu1 }
 0x2e2   : > { %v2392_v17 = vmul.f32 %v2264_v39, %v6747_v25  ;;  %v1659_v8 = vmul.f32 0.044715, %v1531_v12  ;;  %v2396_v40 = vmul.f32 %v2268_v61, %v6763_v13  ;;  %v2267_v27 = vmul.f32 0.5, %v2139_v2 }
 0x2e3   : > { %v1660_v38 = vmul.f32 0.044715, %v1532_v52  ;;  %v1911_v21 = vmul.f32 0.7978846, %v1783_v31  ;;  %v1784_v29 = vadd.f32 %v1656_v11, %v6978_v47  ;;  %v2391_v35 = vmul.f32 %v2263_v43, %v6738_v56 }
 0x2e4   : > { %v7023_v22 = vadd.f32 %v6721_v30, %v6490_v44  ;;  %v1787_v25 = vadd.f32 %v1659_v8, %v6984_v45  ;;  %v2568_v39 = vpack.c.bf16 %v2396_v40, %v2392_v17  ;;  %v2395_v26 = vmul.f32 %v2267_v27, %v6755_v33 }
 0x2e5   : > { %v7025_v16 = vpop.eup %4617  ;;  %v1788_v37 = vadd.f32 %v1660_v38, %v6988_v28  ;;  %4625 = vtanh.f32 %v1911_v21  ;;  %v1912_v13 = vmul.f32 0.7978846, %v1784_v29  ;;  %v7034_v56 = vadd.f32 %v6726_v15, %v6507_v62 }
 0x2e6   : > { %v1407_v12 = vmul.f32 %v7023_v22, %v7023_v22  ;;  %v7036_v30 = vpop.eup %4619  ;;  %v1915_v52 = vmul.f32 0.7978846, %v1787_v25  ;;  %3262 = vmatprep.mubr.bf16.mxu0 %v2568_v39  ;;  %v2567_v2 = vpack.c.bf16 %v2395_v26, %v2391_v35  ;;  %v7040_v40 = vadd.f32 %v6731_v5, %v6490_v44 }
 0x2e7   : > { %v1916_v61 = vmul.f32 0.7978846, %v1788_v37  ;;  %v7042_v33 = vpop.eup %4621  ;;  %4627 = vtanh.f32 %v1912_v13  ;;  %v1408_v31 = vmul.f32 %v7034_v56, %v7034_v56  ;;  %v7049_v15 = vadd.f32 %v6740_v46, %v6507_v62 }
 0x2e8   : > { %v1535_v21 = vmul.f32 %v1407_v12, %v7023_v22  ;;  %v7051_v11 = vpop.eup %4623  ;;  %4629 = vtanh.f32 %v1915_v52  ;;  %3263 = vmatmul.mubr.bf16.gmra.mrb[16].mxu0 %v2567_v2  ;;  %v1411_v5 = vmul.f32 %v7040_v40, %v7040_v40  ;;  %v2144_v17 = vadd.f32 1.0, %v6902_v32 }
 0x2e9   : > { %v2148_v43 = vadd.f32 1.0, %v6944_v10  ;;  %4631 = vtanh.f32 %v1916_v61  ;;  %v1536_v38 = vmul.f32 %v1408_v31, %v7034_v56  ;;  %v1412_v27 = vmul.f32 %v7049_v15, %v7049_v15 }
 0x2ea   : > { %v1663_v8 = vmul.f32 0.044715, %v1535_v21  ;;  %v1539_v46 = vmul.f32 %v1411_v5, %v7040_v40  ;;  %v2272_v29 = vmul.f32 0.5, %v2144_v17  ;;  %v2143_v25 = vadd.f32 1.0, %v6897_v18  ;;  %v7685_v17 = vld [vmem:[#allocation32_spill] sm:$0xff] }
 0x2eb   : > { %v2276_v35 = vmul.f32 0.5, %v2148_v43  ;;  %v1664_v39 = vmul.f32 0.044715, %v1536_v38  ;;  %v1540_v32 = vmul.f32 %v1412_v27, %v7049_v15  ;;  %v2147_v10 = vadd.f32 1.0, %v6924_v20 }
 0x2ec   : > { %v1791_v37 = vadd.f32 %v1663_v8, %v7023_v22  ;;  %v1667_v26 = vmul.f32 0.044715, %v1539_v46  ;;  %v2400_v13 = vmul.f32 %v2272_v29, %v6785_v50  ;;  %v2271_v52 = vmul.f32 0.5, %v2143_v25  ;;  %v7686_v8 = vld [vmem:[#allocation27_spill] sm:$0xff] }
 0x2ed   : > { %v2404_v12 = vmul.f32 %v2276_v35, %v6815_v19  ;;  %v1792_v2 = vadd.f32 %v1664_v39, %v7034_v56  ;;  %v1668_v21 = vmul.f32 0.044715, %v1540_v32  ;;  %v2275_v31 = vmul.f32 0.5, %v2147_v10  ;;  %v7687_v35 = vld [vmem:[#allocation33_spill] sm:$0xff] }
 0x2ee   : > { %v1919_v61 = vmul.f32 0.7978846, %v1791_v37  ;;  %v1795_v18 = vadd.f32 %v1667_v26, %v7040_v40  ;;  %v2399_v43 = vmul.f32 %v2271_v52, %v7685_v17  ;;  %v7072_v38 = vadd.f32 %v7686_v8, %v6490_v44  ;;  %v7688_v37 = vld [vmem:[#allocation34_spill] sm:$0xff] }
 0x2ef   : > { %v2572_v5 = vpack.c.bf16 %v2404_v12, %v2400_v13  ;;  %v7074_v20 = vpop.eup %4625  ;;  %v1920_v50 = vmul.f32 0.7978846, %v1792_v2  ;;  %v1796_v19 = vadd.f32 %v1668_v21, %v7049_v15  ;;  %v2403_v27 = vmul.f32 %v2275_v31, %v6803_v54  ;;  %v7689_v54 = vld [vmem:[#allocation35_spill] sm:$0xff] }
 0x2f0   : > { %4633 = vtanh.f32 %v1919_v61  ;;  %v1923_v46 = vmul.f32 0.7978846, %v1795_v18  ;;  %v1415_v29 = vmul.f32 %v7072_v38, %v7072_v38  ;;  %v7082_v25 = vadd.f32 %v7687_v35, %v6507_v62 }
 0x2f1   : > { %3272 = vmatprep.mubr.bf16.mxu0 %v2572_v5  ;;  %v7086_v39 = vadd.f32 %v7688_v37, %v6490_v44  ;;  %v7088_v32 = vpop.eup %4627  ;;  %4635 = vtanh.f32 %v1920_v50  ;;  %v1924_v10 = vmul.f32 0.7978846, %v1796_v19  ;;  %v2571_v26 = vpack.c.bf16 %v2403_v27, %v2399_v43 }
 0x2f2   : > { %v7092_v13 = vadd.f32 %v7689_v54, %v6507_v62  ;;  %v7094_v12 = vpop.eup %4629  ;;  %4637 = vtanh.f32 %v1923_v46  ;;  %v1543_v52 = vmul.f32 %v1415_v29, %v7072_v38  ;;  %v1416_v61 = vmul.f32 %v7082_v25, %v7082_v25 }
 0x2f3   : > { %v1419_v2 = vmul.f32 %v7086_v39, %v7086_v39  ;;  %v7101_v21 = vpop.eup %4631  ;;  %4639 = vtanh.f32 %v1924_v10  ;;  %3273 = vmatmul.mubr.bf16.gmra.mrb[20].mxu0 %v2571_v26  ;;  %v2152_v18 = vadd.f32 1.0, %v6980_v63  ;;  %v2156_v5 = vadd.f32 1.0, %v6996_v0 }
 0x2f4   : > { %v1420_v31 = vmul.f32 %v7092_v13, %v7092_v13  ;;  %v1671_v17 = vmul.f32 0.044715, %v1543_v52  ;;  %v1544_v43 = vmul.f32 %v1416_v61, %v7082_v25  ;;  %v2151_v50 = vadd.f32 1.0, %v6972_v36 }
 0x2f5   : > { %v1547_v8 = vmul.f32 %v1419_v2, %v7086_v39  ;;  %v2280_v27 = vmul.f32 0.5, %v2152_v18  ;;  %v2284_v46 = vmul.f32 0.5, %v2156_v5  ;;  %v2155_v29 = vadd.f32 1.0, %v6990_v3 }
 0x2f6   : > { %v1548_v19 = vmul.f32 %v1420_v31, %v7092_v13  ;;  %v1799_v35 = vadd.f32 %v1671_v17, %v7072_v38  ;;  %v1672_v37 = vmul.f32 0.044715, %v1544_v43  ;;  %v2279_v63 = vmul.f32 0.5, %v2151_v50  ;;  %v7690_v43 = vld [vmem:[#allocation28_spill] sm:$0xff]  ;;  %v7691_v50 = vld [vmem:[#allocation26_spill] sm:$0xff] }
 0x2f7   : > { %v1675_v10 = vmul.f32 0.044715, %v1547_v8  ;;  %v2408_v0 = vmul.f32 %v2280_v27, %v6852_v4  ;;  %v2412_v54 = vmul.f32 %v2284_v46, %v6870_v48  ;;  %v2283_v52 = vmul.f32 0.5, %v2155_v29 }
 0x2f8   : > { %v1676_v26 = vmul.f32 0.044715, %v1548_v19  ;;  %v1927_v61 = vmul.f32 0.7978846, %v1799_v35  ;;  %v1800_v36 = vadd.f32 %v1672_v37, %v7082_v25  ;;  %v2407_v31 = vmul.f32 %v2279_v63, %v6848_v14 }
 0x2f9   : > { %v1803_v2 = vadd.f32 %v1675_v10, %v7086_v39  ;;  %v2576_v5 = vpack.c.bf16 %v2412_v54, %v2408_v0  ;;  %v2411_v17 = vmul.f32 %v2283_v52, %v6858_v7  ;;  %v7124_v4 = vadd.f32 %v7690_v43, %v6490_v44 }
 0x2fa   : > { %v7118_v18 = vpop.eup %4633  ;;  %v1804_v3 = vadd.f32 %v1676_v26, %v7092_v13  ;;  %4641 = vtanh.f32 %v1927_v61  ;;  %v1928_v48 = vmul.f32 0.7978846, %v1800_v36  ;;  %v7128_v19 = vadd.f32 %v7691_v50, %v6507_v62 }
 0x2fb   : > { %v1931_v8 = vmul.f32 0.7978846, %v1803_v2  ;;  %v7130_v27 = vpop.eup %4635  ;;  %3282 = vmatprep.mubr.bf16.mxu0 %v2576_v5  ;;  %v2575_v46 = vpack.c.bf16 %v2411_v17, %v2407_v31  ;;  %v1423_v29 = vmul.f32 %v7124_v4, %v7124_v4  ;;  %v7136_v7 = vadd.f32 %v6835_v60, %v6490_v44 }
 0x2fc   : > { %v1932_v14 = vmul.f32 0.7978846, %v1804_v3  ;;  %v7138_v35 = vpop.eup %4637  ;;  %4643 = vtanh.f32 %v1928_v48  ;;  %v1424_v37 = vmul.f32 %v7128_v19, %v7128_v19  ;;  %v7144_v10 = vadd.f32 %v6840_v58, %v6507_v62 }
 0x2fd   : > { %v2160_v63 = vadd.f32 1.0, %v7036_v30  ;;  %v7147_v26 = vpop.eup %4639  ;;  %4645 = vtanh.f32 %v1931_v8  ;;  %3283 = vmatmul.mubr.bf16.gmra.mrb[24].mxu0 %v2575_v46  ;;  %v1551_v0 = vmul.f32 %v1423_v29, %v7124_v4  ;;  %v1427_v60 = vmul.f32 %v7136_v7, %v7136_v7 }
 0x2fe   : > { %v2164_v54 = vadd.f32 1.0, %v7051_v11  ;;  %4647 = vtanh.f32 %v1932_v14  ;;  %v1552_v52 = vmul.f32 %v1424_v37, %v7128_v19  ;;  %v1428_v58 = vmul.f32 %v7144_v10, %v7144_v10 }
 0x2ff   : > { %v2288_v61 = vmul.f32 0.5, %v2160_v63  ;;  %v1679_v36 = vmul.f32 0.044715, %v1551_v0  ;;  %v1555_v30 = vmul.f32 %v1427_v60, %v7136_v7  ;;  %v2159_v31 = vadd.f32 1.0, %v7025_v16 }
 0x300   : > { %v2292_v2 = vmul.f32 0.5, %v2164_v54  ;;  %v1680_v3 = vmul.f32 0.044715, %v1552_v52  ;;  %v1556_v5 = vmul.f32 %v1428_v58, %v7144_v10  ;;  %v2163_v11 = vadd.f32 1.0, %v7042_v33 }
 0x301   : > { %v2416_v17 = vmul.f32 %v2288_v61, %v6920_v49  ;;  %v1807_v43 = vadd.f32 %v1679_v36, %v7124_v4  ;;  %v1683_v48 = vmul.f32 0.044715, %v1555_v30  ;;  %v2287_v50 = vmul.f32 0.5, %v2159_v31  ;;  %v7693_v36 = vld [vmem:[#allocation36_spill] sm:$0xff] }
 0x302   : > { %v2420_v8 = vmul.f32 %v2292_v2, %v6932_v34  ;;  %v1808_v14 = vadd.f32 %v1680_v3, %v7128_v19  ;;  %v1684_v46 = vmul.f32 0.044715, %v1556_v5  ;;  %v2291_v29 = vmul.f32 0.5, %v2163_v11  ;;  %v7694_v11 = vld [vmem:[#allocation37_spill] sm:$0xff] }
 0x303   : > { %v7166_v16 = vadd.f32 %v6860_v53, %v6490_v44  ;;  %v1935_v37 = vmul.f32 0.7978846, %v1807_v43  ;;  %v1811_v63 = vadd.f32 %v1683_v48, %v7136_v7  ;;  %v2415_v33 = vmul.f32 %v2287_v50, %v6908_v6  ;;  %v7692_v53 = vld [vmem:[#allocation29_spill] sm:$0xff] }
 0x304   : > { %v2580_v49 = vpack.c.bf16 %v2420_v8, %v2416_v17  ;;  %v7170_v0 = vpop.eup %4641  ;;  %v1936_v60 = vmul.f32 0.7978846, %v1808_v14  ;;  %v1812_v34 = vadd.f32 %v1684_v46, %v7144_v10  ;;  %v2419_v54 = vmul.f32 %v2291_v29, %v6928_v42 }
 0x305   : > { %v1431_v52 = vmul.f32 %v7166_v16, %v7166_v16  ;;  %4649 = vtanh.f32 %v1935_v37  ;;  %v1939_v58 = vmul.f32 0.7978846, %v1811_v63  ;;  %v7178_v61 = vadd.f32 %v7692_v53, %v6507_v62 }
 0x306   : > { %3292 = vmatprep.mubr.bf16.mxu0 %v2580_v49  ;;  %v7182_v6 = vadd.f32 %v7693_v36, %v6490_v44  ;;  %v7184_v30 = vpop.eup %4643  ;;  %4651 = vtanh.f32 %v1936_v60  ;;  %v1940_v2 = vmul.f32 0.7978846, %v1812_v34  ;;  %v2579_v31 = vpack.c.bf16 %v2419_v54, %v2415_v33 }
 0x307   : > { %v1559_v42 = vmul.f32 %v1431_v52, %v7166_v16  ;;  %v7187_v3 = vpop.eup %4645  ;;  %4653 = vtanh.f32 %v1939_v58  ;;  %v1432_v5 = vmul.f32 %v7178_v61, %v7178_v61  ;;  %v7195_v43 = vadd.f32 %v7694_v11, %v6507_v62 }
 0x308   : > { %v1435_v17 = vmul.f32 %v7182_v6, %v7182_v6  ;;  %v7197_v48 = vpop.eup %4647  ;;  %4655 = vtanh.f32 %v1940_v2  ;;  %3293 = vmatmul.mubr.bf16.gmra.mrb[28].mxu0 %v2579_v31  ;;  %v2168_v50 = vadd.f32 1.0, %v7088_v32  ;;  %v2172_v14 = vadd.f32 1.0, %v7101_v21 }
 0x309   : > { %v1687_v8 = vmul.f32 0.044715, %v1559_v42  ;;  %v1560_v46 = vmul.f32 %v1432_v5, %v7178_v61  ;;  %v1436_v37 = vmul.f32 %v7195_v43, %v7195_v43  ;;  %v2167_v63 = vadd.f32 1.0, %v7074_v20 }
 0x30a   : > { %v1563_v29 = vmul.f32 %v1435_v17, %v7182_v6  ;;  %v2296_v33 = vmul.f32 0.5, %v2168_v50  ;;  %v2300_v60 = vmul.f32 0.5, %v2172_v14  ;;  %v2171_v34 = vadd.f32 1.0, %v7094_v12 }
 0x30b   : > { %v1815_v49 = vadd.f32 %v1687_v8, %v7166_v16  ;;  %v1688_v54 = vmul.f32 0.044715, %v1560_v46  ;;  %v1564_v32 = vmul.f32 %v1436_v37, %v7195_v43  ;;  %v2295_v21 = vmul.f32 0.5, %v2167_v63  ;;  %v7696_v37 = vld [vmem:[#allocation31_spill] sm:$0xff] }
 0x30c   : > { %v1691_v52 = vmul.f32 0.044715, %v1563_v29  ;;  %v2424_v53 = vmul.f32 %v2296_v33, %v6978_v47  ;;  %v2428_v36 = vmul.f32 %v2300_v60, %v6988_v28  ;;  %v2299_v2 = vmul.f32 0.5, %v2171_v34 }
 0x30d   : > { %v1943_v58 = vmul.f32 0.7978846, %v1815_v49  ;;  %v1816_v31 = vadd.f32 %v1688_v54, %v7178_v61  ;;  %v1692_v42 = vmul.f32 0.044715, %v1564_v32  ;;  %v2423_v5 = vmul.f32 %v2295_v21, %v6967_v59 }
 0x30e   : > { %v1819_v20 = vadd.f32 %v1691_v52, %v7182_v6  ;;  %v2584_v12 = vpack.c.bf16 %v2428_v36, %v2424_v53  ;;  %v2427_v17 = vmul.f32 %v2299_v2, %v6984_v45  ;;  %v7217_v11 = vadd.f32 %v6910_v41, %v6490_v44  ;;  %v7695_v41 = vld [vmem:[#allocation30_spill] sm:$0xff] }
 0x30f   : > { %4657 = vtanh.f32 %v1943_v58  ;;  %v7219_v8 = vpop.eup %4649  ;;  %v1944_v47 = vmul.f32 0.7978846, %v1816_v31  ;;  %v1820_v50 = vadd.f32 %v1692_v42, %v7195_v43  ;;  %v7224_v14 = vadd.f32 %v6913_v55, %v6507_v62 }
 0x310   : > { %v1947_v28 = vmul.f32 0.7978846, %v1819_v20  ;;  %v7226_v46 = vpop.eup %4651  ;;  %3302 = vmatprep.mubr.bf16.mxu0 %v2584_v12  ;;  %v2583_v59 = vpack.c.bf16 %v2427_v17, %v2423_v5  ;;  %v1439_v45 = vmul.f32 %v7217_v11, %v7217_v11  ;;  %v7232_v29 = vadd.f32 %v7695_v41, %v6490_v44 }
 0x311   : > { %v7236_v63 = vadd.f32 %v7696_v37, %v6507_v62  ;;  %v7238_v49 = vpop.eup %4653  ;;  %4659 = vtanh.f32 %v1944_v47  ;;  %v1948_v55 = vmul.f32 0.7978846, %v1820_v50  ;;  %v1440_v33 = vmul.f32 %v7224_v14, %v7224_v14 }
 0x312   : > { %v2176_v60 = vadd.f32 1.0, %v7130_v27  ;;  %v7243_v34 = vpop.eup %4655  ;;  %4661 = vtanh.f32 %v1947_v28  ;;  %3303 = vmatmul.mubr.bf16.gmra.mrb[32].mxu0 %v2583_v59  ;;  %v1567_v54 = vmul.f32 %v1439_v45, %v7217_v11  ;;  %v1443_v52 = vmul.f32 %v7232_v29, %v7232_v29 }
 0x313   : > { %v1444_v32 = vmul.f32 %v7236_v63, %v7236_v63  ;;  %4663 = vtanh.f32 %v1948_v55  ;;  %v1568_v21 = vmul.f32 %v1440_v33, %v7224_v14  ;;  %v2180_v58 = vadd.f32 1.0, %v7147_v26 }
 0x314   : > { %v2304_v53 = vmul.f32 0.5, %v2176_v60  ;;  %v1695_v36 = vmul.f32 0.044715, %v1567_v54  ;;  %v1571_v27 = vmul.f32 %v1443_v52, %v7232_v29  ;;  %v2175_v31 = vadd.f32 1.0, %v7118_v18 }
 0x315   : > { %v1572_v2 = vmul.f32 %v1444_v32, %v7236_v63  ;;  %v1696_v20 = vmul.f32 0.044715, %v1568_v21  ;;  %v2308_v42 = vmul.f32 0.5, %v2180_v58  ;;  %v2179_v12 = vadd.f32 1.0, %v7138_v35 }
 0x316   : > { %v2432_v5 = vmul.f32 %v2304_v53, %v7034_v56  ;;  %v1823_v17 = vadd.f32 %v1695_v36, %v7217_v11  ;;  %v1699_v47 = vmul.f32 0.044715, %v1571_v27  ;;  %v2303_v50 = vmul.f32 0.5, %v2175_v31 }
 0x317   : > { %v1700_v28 = vmul.f32 0.044715, %v1572_v2  ;;  %v1824_v26 = vadd.f32 %v1696_v20, %v7224_v14  ;;  %v2436_v59 = vmul.f32 %v2308_v42, %v7049_v15  ;;  %v2307_v45 = vmul.f32 0.5, %v2179_v12 }
 0x318   : > { %v7262_v41 = vadd.f32 %v6953_v24, %v6490_v44  ;;  %v1951_v37 = vmul.f32 0.7978846, %v1823_v17  ;;  %v1827_v56 = vadd.f32 %v1699_v47, %v7232_v29  ;;  %v2431_v55 = vmul.f32 %v2303_v50, %v7023_v22 }
 0x319   : > { %v7264_v18 = vpop.eup %4657  ;;  %v1828_v35 = vadd.f32 %v1700_v28, %v7236_v63  ;;  %v1952_v33 = vmul.f32 0.7978846, %v1824_v26  ;;  %v2588_v60 = vpack.c.bf16 %v2436_v59, %v2432_v5  ;;  %v2435_v54 = vmul.f32 %v2307_v45, %v7040_v40 }
 0x31a   : > { %v1447_v15 = vmul.f32 %v7262_v41, %v7262_v41  ;;  %4665 = vtanh.f32 %v1951_v37  ;;  %v1955_v52 = vmul.f32 0.7978846, %v1827_v56  ;;  %v7274_v32 = vadd.f32 %v6956_v51, %v6507_v62 }
 0x31b   : > { %v1956_v24 = vmul.f32 0.7978846, %v1828_v35  ;;  %v7276_v21 = vpop.eup %4659  ;;  %4667 = vtanh.f32 %v1952_v33  ;;  %3312 = vmatprep.mubr.bf16.mxu0 %v2588_v60  ;;  %v2587_v58 = vpack.c.bf16 %v2435_v54, %v2431_v55  ;;  %v7281_v40 = vadd.f32 %v6960_v23, %v6490_v44  ;;  %v7697_v60 = vld [vmem:[#allocation38_spill] sm:$0xff] }
 0x31c   : > { %v1575_v22 = vmul.f32 %v1447_v15, %v7262_v41  ;;  %v7283_v53 = vpop.eup %4661  ;;  %4669 = vtanh.f32 %v1955_v52  ;;  %v1448_v36 = vmul.f32 %v7274_v32, %v7274_v32  ;;  %v7289_v51 = vadd.f32 %v6969_v9, %v6507_v62 }
 0x31d   : > { %v2184_v27 = vadd.f32 1.0, %v7184_v30  ;;  %v7292_v2 = vpop.eup %4663  ;;  %4671 = vtanh.f32 %v1956_v24  ;;  %3313 = vmatmul.mubr.bf16.gmra.mrb[36].mxu0 %v2587_v58  ;;  %v1451_v23 = vmul.f32 %v7281_v40, %v7281_v40  ;;  %v2188_v20 = vadd.f32 1.0, %v7197_v48 }
 0x31e   : > { %v1703_v31 = vmul.f32 0.044715, %v1575_v22  ;;  %v1576_v42 = vmul.f32 %v1448_v36, %v7274_v32  ;;  %v1452_v5 = vmul.f32 %v7289_v51, %v7289_v51  ;;  %v2183_v9 = vadd.f32 1.0, %v7170_v0 }
 0x31f   : > { %v2312_v12 = vmul.f32 0.5, %v2184_v27  ;;  %v1579_v17 = vmul.f32 %v1451_v23, %v7281_v40  ;;  %v2316_v47 = vmul.f32 0.5, %v2188_v20  ;;  %v2187_v28 = vadd.f32 1.0, %v7187_v3 }
 0x320   : > { %v1831_v30 = vadd.f32 %v1703_v31, %v7262_v41  ;;  %v1704_v50 = vmul.f32 0.044715, %v1576_v42  ;;  %v1580_v26 = vmul.f32 %v1452_v5, %v7289_v51  ;;  %v2311_v59 = vmul.f32 0.5, %v2183_v9 }
 0x321   : > { %v2440_v48 = vmul.f32 %v2312_v12, %v7082_v25  ;;  %v1707_v37 = vmul.f32 0.044715, %v1579_v17  ;;  %v2444_v56 = vmul.f32 %v2316_v47, %v7092_v13  ;;  %v2315_v35 = vmul.f32 0.5, %v2187_v28 }
 0x322   : > { %v1959_v45 = vmul.f32 0.7978846, %v1831_v30  ;;  %v1832_v0 = vadd.f32 %v1704_v50, %v7274_v32  ;;  %v1708_v55 = vmul.f32 0.044715, %v1580_v26  ;;  %v2439_v33 = vmul.f32 %v2311_v59, %v7072_v38  ;;  %v7698_v38 = vld [vmem:[#allocation39_spill] sm:$0xff] }
 0x323   : > { %v7311_v54 = vadd.f32 %v7697_v60, %v6490_v44  ;;  %v1835_v3 = vadd.f32 %v1707_v37, %v7281_v40  ;;  %v2592_v15 = vpack.c.bf16 %v2444_v56, %v2440_v48  ;;  %v2443_v25 = vmul.f32 %v2315_v35, %v7086_v39 }
 0x324   : > { %4673 = vtanh.f32 %v1959_v45  ;;  %v7315_v52 = vpop.eup %4665  ;;  %v1960_v24 = vmul.f32 0.7978846, %v1832_v0  ;;  %v1836_v13 = vadd.f32 %v1708_v55, %v7289_v51  ;;  %v7322_v22 = vadd.f32 %v7698_v38, %v6507_v62 }
 0x325   : > { %v1455_v58 = vmul.f32 %v7311_v54, %v7311_v54  ;;  %v4668_v36 = vpop.eup %4667  ;;  %v1963_v27 = vmul.f32 0.7978846, %v1835_v3  ;;  %3322 = vmatprep.mubr.bf16.mxu0 %v2592_v15  ;;  %v2591_v31 = vpack.c.bf16 %v2443_v25, %v2439_v33  ;;  %v7326_v23 = vadd.f32 %v7012_v57, %v6490_v44 }
 0x326   : > { %v7330_v39 = vadd.f32 %v7016_v1, %v6507_v62  ;;  %v7332_v20 = vpop.eup %4669  ;;  %4675 = vtanh.f32 %v1960_v24  ;;  %v1964_v42 = vmul.f32 0.7978846, %v1836_v13  ;;  %v1456_v12 = vmul.f32 %v7322_v22, %v7322_v22 }
 0x327   : > { %v1583_v5 = vmul.f32 %v1455_v58, %v7311_v54  ;;  %v4672_v9 = vpop.eup %4671  ;;  %4677 = vtanh.f32 %v1963_v27  ;;  %3323 = vmatmul.mubr.bf16.gmra.mrb[40].mxu0 %v2591_v31  ;;  %v1459_v44 = vmul.f32 %v7326_v23, %v7326_v23  ;;  %v2192_v62 = vadd.f32 1.0, %v7226_v46 }
 0x328   : > { %v1460_v57 = vmul.f32 %v7330_v39, %v7330_v39  ;;  %4679 = vtanh.f32 %v1964_v42  ;;  %v1584_v30 = vmul.f32 %v1456_v12, %v7322_v22  ;;  %v2196_v17 = vadd.f32 1.0, %v7243_v34 }
 0x329   : > { %v1711_v1 = vmul.f32 0.044715, %v1583_v5  ;;  %v1587_v47 = vmul.f32 %v1459_v44, %v7326_v23  ;;  %v2320_v50 = vmul.f32 0.5, %v2192_v62  ;;  %v2191_v26 = vadd.f32 1.0, %v7219_v8 }
 0x32a   : > { %v1588_v28 = vmul.f32 %v1460_v57, %v7330_v39  ;;  %v1712_v59 = vmul.f32 0.044715, %v1584_v30  ;;  %v2324_v45 = vmul.f32 0.5, %v2196_v17  ;;  %v2195_v37 = vadd.f32 1.0, %v7238_v49 }
 0x32b   : > { %v1839_v48 = vadd.f32 %v1711_v1, %v7311_v54  ;;  %v1715_v46 = vmul.f32 0.044715, %v1587_v47  ;;  %v2448_v35 = vmul.f32 %v2320_v50, %v7128_v19  ;;  %v2319_v0 = vmul.f32 0.5, %v2191_v26 }
 0x32c   : > { %v1716_v56 = vmul.f32 0.044715, %v1588_v28  ;;  %v1840_v34 = vadd.f32 %v1712_v59, %v7322_v22  ;;  %v2452_v33 = vmul.f32 %v2324_v45, %v7144_v10  ;;  %v2323_v60 = vmul.f32 0.5, %v2195_v37 }
 0x32d   : > { %v1967_v55 = vmul.f32 0.7978846, %v1839_v48  ;;  %v1843_v8 = vadd.f32 %v1715_v46, %v7326_v23  ;;  %v2447_v25 = vmul.f32 %v2319_v0, %v7124_v4  ;;  %v2200_v49 = vadd.f32 1.0, %v7276_v21 }
 0x32e   : > { %v4674_v3 = vpop.eup %4673  ;;  %v1844_v15 = vadd.f32 %v1716_v56, %v7330_v39  ;;  %v1968_v24 = vmul.f32 0.7978846, %v1840_v34  ;;  %v2596_v13 = vpack.c.bf16 %v2452_v33, %v2448_v35  ;;  %v2451_v19 = vmul.f32 %v2323_v60, %v7136_v7 }
 0x32f   : > { %4681 = vtanh.f32 %v1967_v55  ;;  %v1971_v58 = vmul.f32 0.7978846, %v1843_v8  ;;  %v2204_v27 = vadd.f32 1.0, %v7292_v2  ;;  %v2328_v10 = vmul.f32 0.5, %v2200_v49 }
 0x330   : > { %v1972_v38 = vmul.f32 0.7978846, %v1844_v15  ;;  %v4676_v31 = vpop.eup %4675  ;;  %4683 = vtanh.f32 %v1968_v24  ;;  %3332 = vmatprep.mubr.bf16.mxu0 %v2596_v13  ;;  %v2595_v42 = vpack.c.bf16 %v2451_v19, %v2447_v25  ;;  %v2199_v5 = vadd.f32 1.0, %v7264_v18 }
 0x331   : > { %v2203_v4 = vadd.f32 1.0, %v7283_v53  ;;  %v4678_v12 = vpop.eup %4677  ;;  %4685 = vtanh.f32 %v1971_v58  ;;  %v2332_v21 = vmul.f32 0.5, %v2204_v27  ;;  %v2456_v44 = vmul.f32 %v2328_v10, %v7178_v61 }
 0x332   : > { %v2208_v57 = vadd.f32 1.0, %v4668_v36  ;;  %v4680_v7 = vpop.eup %4679  ;;  %4687 = vtanh.f32 %v1972_v38  ;;  %3333 = vmatmul.mubr.bf16.gmra.mrb[44].mxu0 %v2595_v42  ;;  %v2327_v62 = vmul.f32 0.5, %v2199_v5  ;;  %v2212_v1 = vadd.f32 1.0, %v4672_v9  ;;  %v2485_v42 = vld [vmem:[#allocation2] sm:$0xff]  ;;  %v2486_v5 = vld [vmem:[#allocation2 + $0x8] sm:$0xff] }
 0x333   : > { %v2331_v2 = vmul.f32 0.5, %v2203_v4  ;;  %v2460_v30 = vmul.f32 %v2332_v21, %v7195_v43  ;;  %v2207_v47 = vadd.f32 1.0, %v7315_v52  ;;  %v2211_v18 = vadd.f32 1.0, %v7332_v20 }
 0x334   : > { %v2336_v17 = vmul.f32 0.5, %v2208_v57  ;;  %v2455_v53 = vmul.f32 %v2327_v62, %v7166_v16  ;;  %v2340_v50 = vmul.f32 0.5, %v2212_v1  ;;  %v2216_v61 = vadd.f32 1.0, %v4676_v31  ;;  %v2489_v62 = vld [vmem:[#allocation2 + $0x20] sm:$0xff] }
 0x335   : > { %v2459_v28 = vmul.f32 %v2331_v2, %v7182_v6  ;;  %v2600_v36 = vpack.c.bf16 %v2460_v30, %v2456_v44  ;;  %v2335_v48 = vmul.f32 0.5, %v2207_v47  ;;  %v2339_v59 = vmul.f32 0.5, %v2211_v18  ;;  %v2490_v2 = vld [vmem:[#allocation2 + $0x28] sm:$0xff]  ;;  %v2491_v30 = vld [vmem:[#allocation2 + $0x30] sm:$0xff]  ;;  %v2492_v18 = vld [vmem:[#allocation2 + $0x38] sm:$0xff] }
 0x336   : > { %v2464_v26 = vmul.f32 %v2336_v17, %v7224_v14  ;;  %v2468_v9 = vmul.f32 %v2340_v50, %v7236_v63  ;;  %v2220_v43 = vadd.f32 1.0, %v4680_v7  ;;  %v2344_v37 = vmul.f32 0.5, %v2216_v61 }
 0x337   : > { %v2599_v45 = vpack.c.bf16 %v2459_v28, %v2455_v53  ;;  %3342 = vmatprep.mubr.bf16.mxu0 %v2600_v36  ;;  %v2463_v52 = vmul.f32 %v2335_v48, %v7217_v11  ;;  %v2467_v20 = vmul.f32 %v2339_v59, %v7232_v29  ;;  %v2215_v16 = vadd.f32 1.0, %v4674_v3  ;;  %v2494_v48 = vld [vmem:[#allocation2 + $0x48] sm:$0xff] }
 0x338   : > { %v2219_v46 = vadd.f32 1.0, %v4678_v12  ;;  %v2604_v56 = vpack.c.bf16 %v2468_v9, %v2464_v26  ;;  %v2348_v35 = vmul.f32 0.5, %v2220_v43  ;;  %v2472_v63 = vmul.f32 %v2344_v37, %v7274_v32  ;;  %v2487_v12 = vld [vmem:[#allocation2 + $0x10] sm:$0xff]  ;;  %v2493_v26 = vld [vmem:[#allocation2 + $0x40] sm:$0xff]  ;;  %v2496_v37 = vld [vmem:[#allocation2 + $0x58] sm:$0xff] }
 0x339   : > { %v4682_v6 = vpop.eup %4681  ;;  %v2603_v0 = vpack.c.bf16 %v2467_v20, %v2463_v52  ;;  %v2343_v55 = vmul.f32 0.5, %v2215_v16 }
 0x33a   : > { %v2347_v14 = vmul.f32 0.5, %v2219_v46  ;;  %v2223_v34 = vadd.f32 1.0, %v4682_v6  ;;  %v4684_v33 = vpop.eup %4683  ;;  %3343 = vmatmul.mubr.bf16.gmra.mrb[48].mxu0 %v2599_v45  ;;  %v2476_v60 = vmul.f32 %v2348_v35, %v7289_v51  ;;  %v2495_v45 = vld [vmem:[#allocation2 + $0x50] sm:$0xff]  ;;  %v2498_v35 = vld [vmem:[#allocation2 + $0x68] sm:$0xff] }
 0x33b   : > { %v4686_v8 = vpop.eup %4685  ;;  %3352 = vmatprep.mubr.bf16.mxu0 %v2604_v56  ;;  %v2471_v11 = vmul.f32 %v2343_v55, %v7262_v41  ;;  %v2224_v3 = vadd.f32 1.0, %v4684_v33  ;;  %v2497_v56 = vld [vmem:[#allocation2 + $0x60] sm:$0xff]  ;;  %v2499_v55 = vld [vmem:[#allocation2 + $0x70] sm:$0xff]  ;;  %v2500_v33 = vld [vmem:[#allocation2 + $0x78] sm:$0xff] }
 0x33c   : > { %v2475_v29 = vmul.f32 %v2347_v14, %v7281_v40  ;;  %v4688_v15 = vpop.eup %4687  ;;  %v2608_v25 = vpack.c.bf16 %v2476_v60, %v2472_v63  ;;  %v2227_v49 = vadd.f32 1.0, %v4686_v8  ;;  %v2351_v24 = vmul.f32 0.5, %v2223_v34 }
 0x33d   : > { %v2228_v19 = vadd.f32 1.0, %v4688_v15  ;;  %v2352_v58 = vmul.f32 0.5, %v2224_v3  ;;  %v2501_v3 = vld [vmem:[#allocation2 + $0x80] sm:$0xff]  ;;  %v2502_v15 = vld [vmem:[#allocation2 + $0x88] sm:$0xff] }
 0x33e   : > { %v2607_v13 = vpack.c.bf16 %v2475_v29, %v2471_v11  ;;  %v2355_v38 = vmul.f32 0.5, %v2227_v49  ;;  %v2479_v32 = vmul.f32 %v2351_v24, %v7311_v54  ;;  %v2488_v54 = vld [vmem:[#allocation2 + $0x18] sm:$0xff]  ;;  %v2503_v49 = vld [vmem:[#allocation2 + $0x90] sm:$0xff] }
 0x33f   : > { %v2356_v27 = vmul.f32 0.5, %v2228_v19  ;;  %v2480_v10 = vmul.f32 %v2352_v58, %v7322_v22  ;;  %v2504_v19 = vld [vmem:[#allocation2 + $0x98] sm:$0xff] }
 0x340   : > { %v2483_v51 = vmul.f32 %v2355_v38, %v7326_v23 }
 0x341   : > { %v2484_v41 = vmul.f32 %v2356_v27, %v7330_v39 }
 0x342   : > { %3353 = vmatmul.mubr.bf16.gmra.mrb[52].mxu0 %v2603_v0  ;;  %v2611_v40 = vpack.c.bf16 %v2483_v51, %v2479_v32 }
 0x343   : > { %3362 = vmatprep.mubr.bf16.mxu0 %v2608_v25  ;;  %v2612_v31 = vpack.c.bf16 %v2484_v41, %v2480_v10  ;;  %v2505_v10 = vld [vmem:[#allocation2 + $0xa0] sm:$0xff]  ;;  %v2506_v41 = vld [vmem:[#allocation2 + $0xa8] sm:$0xff] }
 0x34a   : > { %3363 = vmatmul.mubr.bf16.gmra.mrb[56].mxu0 %v2607_v13 }
 0x34b   : > { %3372 = vmatprep.mubr.bf16.mxu0 %v2612_v31  ;;  %v2507_v31 = vld [vmem:[#allocation2 + $0xb0] sm:$0xff] }
 0x352   : > { %3373 = vmatmul.mubr.bf16.gmra.mrb[60].mxu0 %v2611_v40 }
 0x394   : > { %v3224_v4 = vpop.f32.mrb[0].mxu0 }
 0x395   : > { %v3383_v21 = vadd.f32 %v3224_v4, %v2485_v42  ;;  %v3226_v44 = vpop.f32.mrb[1].mxu0  ;;  %v2508_v4 = vld [vmem:[#allocation2 + $0xb8] sm:$0xff] }
 0x396   : > { %v3384_v57 = vadd.f32 %v3226_v44, %v2486_v5  ;;  %v3228_v23 = vpop.f32.mrb[2].mxu0 }
 0x397   : > { %3447 = vst [vmem:[#allocation2] sm:$0xff] %v3383_v21  ;;  %v3385_v22 = vadd.f32 %v3228_v23, %v2487_v12  ;;  %v3230_v7 = vpop.f32.mrb[3].mxu0  ;;  %v2509_v23 = vld [vmem:[#allocation2 + $0xc0] sm:$0xff] }
 0x398   : > { %3448 = vst [vmem:[#allocation2 + $0x8] sm:$0xff] %v3384_v57  ;;  %v3386_v39 = vadd.f32 %v3230_v7, %v2488_v54 }
 0x399   : > { %3449 = vst [vmem:[#allocation2 + $0x10] sm:$0xff] %v3385_v22  ;;  %v2510_v22 = vld [vmem:[#allocation2 + $0xc8] sm:$0xff] }
 0x39a   : > { %3450 = vst [vmem:[#allocation2 + $0x18] sm:$0xff] %v3386_v39  ;;  %v2511_v39 = vld [vmem:[#allocation2 + $0xd0] sm:$0xff] }
 0x39d   : > { %v3234_v1 = vpop.f32.mrb[4].mxu0 }
 0x39e   : > { %v3387_v17 = vadd.f32 %v3234_v1, %v2489_v62  ;;  %v3236_v47 = vpop.f32.mrb[5].mxu0  ;;  %v2512_v1 = vld [vmem:[#allocation2 + $0xd8] sm:$0xff] }
 0x39f   : > { %v3388_v53 = vadd.f32 %v3236_v47, %v2490_v2  ;;  %v3238_v28 = vpop.f32.mrb[6].mxu0 }
 0x3a0   : > { %3451 = vst [vmem:[#allocation2 + $0x20] sm:$0xff] %v3387_v17  ;;  %v3389_v50 = vadd.f32 %v3238_v28, %v2491_v30  ;;  %v3240_v61 = vpop.f32.mrb[7].mxu0  ;;  %v2513_v28 = vld [vmem:[#allocation2 + $0xe0] sm:$0xff] }
 0x3a1   : > { %3452 = vst [vmem:[#allocation2 + $0x28] sm:$0xff] %v3388_v53  ;;  %v3390_v36 = vadd.f32 %v3240_v61, %v2492_v18 }
 0x3a2   : > { %3453 = vst [vmem:[#allocation2 + $0x30] sm:$0xff] %v3389_v50  ;;  %v2514_v50 = vld [vmem:[#allocation2 + $0xe8] sm:$0xff] }
 0x3a3   : > { %3454 = vst [vmem:[#allocation2 + $0x38] sm:$0xff] %v3390_v36  ;;  %v2515_v36 = vld [vmem:[#allocation2 + $0xf0] sm:$0xff] }
 0x3a7   : > { %v3244_v59 = vpop.f32.mrb[8].mxu0 }
 0x3a8   : > { %v3391_v9 = vadd.f32 %v3244_v59, %v2493_v26  ;;  %v3246_v43 = vpop.f32.mrb[9].mxu0  ;;  %v2516_v59 = vld [vmem:[#allocation2 + $0xf8] sm:$0xff] }
 0x3a9   : > { %v3392_v52 = vadd.f32 %v3246_v43, %v2494_v48  ;;  %v3248_v20 = vpop.f32.mrb[10].mxu0 }
 0x3aa   : > { %3455 = vst [vmem:[#allocation2 + $0x40] sm:$0xff] %v3391_v9  ;;  %v3393_v16 = vadd.f32 %v3248_v20, %v2495_v45  ;;  %v3250_v46 = vpop.f32.mrb[11].mxu0  ;;  %v2517_v20 = vld [vmem:[#allocation2 + $0x100] sm:$0xff] }
 0x3ab   : > { %3456 = vst [vmem:[#allocation2 + $0x48] sm:$0xff] %v3392_v52  ;;  %v3394_v6 = vadd.f32 %v3250_v46, %v2496_v37 }
 0x3ac   : > { %3457 = vst [vmem:[#allocation2 + $0x50] sm:$0xff] %v3393_v16  ;;  %v2518_v16 = vld [vmem:[#allocation2 + $0x108] sm:$0xff] }
 0x3ad   : > { %3458 = vst [vmem:[#allocation2 + $0x58] sm:$0xff] %v3394_v6  ;;  %v2519_v6 = vld [vmem:[#allocation2 + $0x110] sm:$0xff] }
 0x3b1   : > { %v3254_v0 = vpop.f32.mrb[12].mxu0 }
 0x3b2   : > { %v3395_v14 = vadd.f32 %v3254_v0, %v2497_v56  ;;  %v3256_v34 = vpop.f32.mrb[13].mxu0  ;;  %v2520_v0 = vld [vmem:[#allocation2 + $0x118] sm:$0xff] }
 0x3b3   : > { %v3396_v63 = vadd.f32 %v3256_v34, %v2498_v35  ;;  %v3258_v60 = vpop.f32.mrb[14].mxu0 }
 0x3b4   : > { %3459 = vst [vmem:[#allocation2 + $0x60] sm:$0xff] %v3395_v14  ;;  %v3397_v8 = vadd.f32 %v3258_v60, %v2499_v55  ;;  %v3260_v11 = vpop.f32.mrb[15].mxu0  ;;  %v2521_v60 = vld [vmem:[#allocation2 + $0x120] sm:$0xff] }
 0x3b5   : > { %3460 = vst [vmem:[#allocation2 + $0x68] sm:$0xff] %v3396_v63  ;;  %v3398_v29 = vadd.f32 %v3260_v11, %v2500_v33 }
 0x3b6   : > { %3461 = vst [vmem:[#allocation2 + $0x70] sm:$0xff] %v3397_v8  ;;  %v2522_v8 = vld [vmem:[#allocation2 + $0x128] sm:$0xff] }
 0x3b7   : > { %3462 = vst [vmem:[#allocation2 + $0x78] sm:$0xff] %v3398_v29  ;;  %v2523_v29 = vld [vmem:[#allocation2 + $0x130] sm:$0xff] }
 0x3bb   : > { %v3264_v25 = vpop.f32.mrb[16].mxu0 }
 0x3bc   : > { %v3399_v24 = vadd.f32 %v3264_v25, %v2501_v3  ;;  %v3266_v13 = vpop.f32.mrb[17].mxu0  ;;  %v2524_v25 = vld [vmem:[#allocation2 + $0x138] sm:$0xff] }
 0x3bd   : > { %v3400_v58 = vadd.f32 %v3266_v13, %v2502_v15  ;;  %v3268_v38 = vpop.f32.mrb[18].mxu0 }
 0x3be   : > { %3463 = vst [vmem:[#allocation2 + $0x80] sm:$0xff] %v3399_v24  ;;  %v3401_v27 = vadd.f32 %v3268_v38, %v2503_v49  ;;  %v3270_v32 = vpop.f32.mrb[19].mxu0  ;;  %v2525_v38 = vld [vmem:[#allocation2 + $0x140] sm:$0xff] }
 0x3bf   : > { %3464 = vst [vmem:[#allocation2 + $0x88] sm:$0xff] %v3400_v58  ;;  %v3402_v51 = vadd.f32 %v3270_v32, %v2504_v19 }
 0x3c0   : > { %3465 = vst [vmem:[#allocation2 + $0x90] sm:$0xff] %v3401_v27  ;;  %v2526_v27 = vld [vmem:[#allocation2 + $0x148] sm:$0xff] }
 0x3c1   : > { %3466 = vst [vmem:[#allocation2 + $0x98] sm:$0xff] %v3402_v51  ;;  %v2527_v51 = vld [vmem:[#allocation2 + $0x150] sm:$0xff] }
 0x3c6   : > { %v3274_v40 = vpop.f32.mrb[20].mxu0 }
 0x3c7   : > { %v3403_v42 = vadd.f32 %v3274_v40, %v2505_v10  ;;  %v3276_v5 = vpop.f32.mrb[21].mxu0  ;;  %v2528_v40 = vld [vmem:[#allocation2 + $0x158] sm:$0xff] }
 0x3c8   : > { %v3404_v12 = vadd.f32 %v3276_v5, %v2506_v41  ;;  %v3278_v21 = vpop.f32.mrb[22].mxu0 }
 0x3c9   : > { %3467 = vst [vmem:[#allocation2 + $0xa0] sm:$0xff] %v3403_v42  ;;  %v3405_v44 = vadd.f32 %v3278_v21, %v2507_v31  ;;  %v3280_v54 = vpop.f32.mrb[23].mxu0  ;;  %v2529_v21 = vld [vmem:[#allocation2 + $0x160] sm:$0xff] }
 0x3ca   : > { %3468 = vst [vmem:[#allocation2 + $0xa8] sm:$0xff] %v3404_v12  ;;  %v3406_v57 = vadd.f32 %v3280_v54, %v2508_v4 }
 0x3cb   : > { %3469 = vst [vmem:[#allocation2 + $0xb0] sm:$0xff] %v3405_v44  ;;  %v2530_v44 = vld [vmem:[#allocation2 + $0x168] sm:$0xff] }
 0x3cc   : > { %3470 = vst [vmem:[#allocation2 + $0xb8] sm:$0xff] %v3406_v57  ;;  %v2531_v57 = vld [vmem:[#allocation2 + $0x170] sm:$0xff] }
 0x3d0   : > { %v3284_v7 = vpop.f32.mrb[24].mxu0 }
 0x3d1   : > { %v3407_v62 = vadd.f32 %v3284_v7, %v2509_v23  ;;  %v3286_v2 = vpop.f32.mrb[25].mxu0  ;;  %v2532_v7 = vld [vmem:[#allocation2 + $0x178] sm:$0xff] }
 0x3d2   : > { %v3408_v30 = vadd.f32 %v3286_v2, %v2510_v22  ;;  %v3288_v17 = vpop.f32.mrb[26].mxu0 }
 0x3d3   : > { %3471 = vst [vmem:[#allocation2 + $0xc0] sm:$0xff] %v3407_v62  ;;  %v3409_v47 = vadd.f32 %v3288_v17, %v2511_v39  ;;  %v3290_v18 = vpop.f32.mrb[27].mxu0  ;;  %v2533_v17 = vld [vmem:[#allocation2 + $0x180] sm:$0xff] }
 0x3d4   : > { %3472 = vst [vmem:[#allocation2 + $0xc8] sm:$0xff] %v3408_v30  ;;  %v3410_v53 = vadd.f32 %v3290_v18, %v2512_v1 }
 0x3d5   : > { %3473 = vst [vmem:[#allocation2 + $0xd0] sm:$0xff] %v3409_v47  ;;  %v2534_v47 = vld [vmem:[#allocation2 + $0x188] sm:$0xff] }
 0x3d6   : > { %3474 = vst [vmem:[#allocation2 + $0xd8] sm:$0xff] %v3410_v53  ;;  %v2535_v53 = vld [vmem:[#allocation2 + $0x190] sm:$0xff] }
 0x3db   : > { %v3294_v61 = vpop.f32.mrb[28].mxu0 }
 0x3dc   : > { %v3411_v26 = vadd.f32 %v3294_v61, %v2513_v28  ;;  %v3296_v48 = vpop.f32.mrb[29].mxu0  ;;  %v2536_v61 = vld [vmem:[#allocation2 + $0x198] sm:$0xff] }
 0x3dd   : > { %v3412_v45 = vadd.f32 %v3296_v48, %v2514_v50  ;;  %v3298_v9 = vpop.f32.mrb[30].mxu0 }
 0x3de   : > { %3475 = vst [vmem:[#allocation2 + $0xe0] sm:$0xff] %v3411_v26  ;;  %v3413_v43 = vadd.f32 %v3298_v9, %v2515_v36  ;;  %v3300_v37 = vpop.f32.mrb[31].mxu0  ;;  %v2537_v9 = vld [vmem:[#allocation2 + $0x1a0] sm:$0xff] }
 0x3df   : > { %3476 = vst [vmem:[#allocation2 + $0xe8] sm:$0xff] %v3412_v45  ;;  %v3414_v52 = vadd.f32 %v3300_v37, %v2516_v59 }
 0x3e0   : > { %3477 = vst [vmem:[#allocation2 + $0xf0] sm:$0xff] %v3413_v43  ;;  %v2538_v43 = vld [vmem:[#allocation2 + $0x1a8] sm:$0xff] }
 0x3e1   : > { %3478 = vst [vmem:[#allocation2 + $0xf8] sm:$0xff] %v3414_v52  ;;  %v2539_v52 = vld [vmem:[#allocation2 + $0x1b0] sm:$0xff] }
 0x3e5   : > { %v3304_v46 = vpop.f32.mrb[32].mxu0 }
 0x3e6   : > { %v3415_v56 = vadd.f32 %v3304_v46, %v2517_v20  ;;  %v3306_v35 = vpop.f32.mrb[33].mxu0  ;;  %v2540_v46 = vld [vmem:[#allocation2 + $0x1b8] sm:$0xff] }
 0x3e7   : > { %v3416_v55 = vadd.f32 %v3306_v35, %v2518_v16  ;;  %v3308_v14 = vpop.f32.mrb[34].mxu0 }
 0x3e8   : > { %3479 = vst [vmem:[#allocation2 + $0x100] sm:$0xff] %v3415_v56  ;;  %v3417_v34 = vadd.f32 %v3308_v14, %v2519_v6  ;;  %v3310_v33 = vpop.f32.mrb[35].mxu0  ;;  %v2541_v14 = vld [vmem:[#allocation2 + $0x1c0] sm:$0xff] }
 0x3e9   : > { %3480 = vst [vmem:[#allocation2 + $0x108] sm:$0xff] %v3416_v55  ;;  %v3418_v63 = vadd.f32 %v3310_v33, %v2520_v0 }
 0x3ea   : > { %3481 = vst [vmem:[#allocation2 + $0x110] sm:$0xff] %v3417_v34  ;;  %v2542_v34 = vld [vmem:[#allocation2 + $0x1c8] sm:$0xff] }
 0x3eb   : > { %3482 = vst [vmem:[#allocation2 + $0x118] sm:$0xff] %v3418_v63  ;;  %v2543_v63 = vld [vmem:[#allocation2 + $0x1d0] sm:$0xff] }
 0x3f0   : > { %v3314_v11 = vpop.f32.mrb[36].mxu0 }
 0x3f1   : > { %v3419_v3 = vadd.f32 %v3314_v11, %v2521_v60  ;;  %v3316_v15 = vpop.f32.mrb[37].mxu0  ;;  %v2544_v11 = vld [vmem:[#allocation2 + $0x1d8] sm:$0xff] }
 0x3f2   : > { %v3420_v49 = vadd.f32 %v3316_v15, %v2522_v8  ;;  %v3318_v24 = vpop.f32.mrb[38].mxu0 }
 0x3f3   : > { %3483 = vst [vmem:[#allocation2 + $0x120] sm:$0xff] %v3419_v3  ;;  %v3421_v13 = vadd.f32 %v3318_v24, %v2523_v29  ;;  %v3320_v19 = vpop.f32.mrb[39].mxu0  ;;  %v2545_v24 = vld [vmem:[#allocation2 + $0x1e0] sm:$0xff] }
 0x3f4   : > { %3484 = vst [vmem:[#allocation2 + $0x128] sm:$0xff] %v3420_v49  ;;  %v3422_v58 = vadd.f32 %v3320_v19, %v2524_v25 }
 0x3f5   : > { %3485 = vst [vmem:[#allocation2 + $0x130] sm:$0xff] %v3421_v13  ;;  %v2546_v13 = vld [vmem:[#allocation2 + $0x1e8] sm:$0xff] }
 0x3f6   : > { %3486 = vst [vmem:[#allocation2 + $0x138] sm:$0xff] %v3422_v58  ;;  %v2547_v58 = vld [vmem:[#allocation2 + $0x1f0] sm:$0xff] }
 0x3fa   : > { %v3324_v32 = vpop.f32.mrb[40].mxu0 }
 0x3fb   : > { %v3423_v10 = vadd.f32 %v3324_v32, %v2525_v38  ;;  %v3326_v41 = vpop.f32.mrb[41].mxu0  ;;  %v2548_v32 = vld [vmem:[#allocation2 + $0x1f8] sm:$0xff] }
 0x3fc   : > { %v3424_v31 = vadd.f32 %v3326_v41, %v2526_v27  ;;  %v3328_v42 = vpop.f32.mrb[42].mxu0 }
 0x3fd   : > { %3487 = vst [vmem:[#allocation2 + $0x140] sm:$0xff] %v3423_v10  ;;  %v3425_v5 = vadd.f32 %v3328_v42, %v2527_v51  ;;  %v3330_v4 = vpop.f32.mrb[43].mxu0  ;;  %v3515_v42 = vld [vmem:[#allocation2] sm:$0xff] (!%p4037_p4) }
 0x3fe   : > { %3488 = vst [vmem:[#allocation2 + $0x148] sm:$0xff] %v3424_v31  ;;  %v3426_v12 = vadd.f32 %v3330_v4, %v2528_v40  ;;  %v3516_v4 = vld [vmem:[#allocation2 + $0x8] sm:$0xff] (!%p4037_p4) }
 0x3ff   : > { %3489 = vst [vmem:[#allocation2 + $0x150] sm:$0xff] %v3425_v5  ;;  %v3579_v5 = vld [vmem:[%s7699_s23] sm:$0x3] (!%p4037_p4) }
 0x400   : > { %3490 = vst [vmem:[#allocation2 + $0x158] sm:$0xff] %v3426_v12  ;;  %v7700_v12 = vld [vmem:[#allocation25_spill] sm:$0xff] (!%p4037_p4) }
 0x405   : > { %v3334_v54 = vpop.f32.mrb[44].mxu0 }
 0x406   : > { %v3427_v23 = vadd.f32 %v3334_v54, %v2529_v21  ;;  %v3336_v22 = vpop.f32.mrb[45].mxu0  ;;  %v7701_v21 = vsub.s32 (!%p4037_p4), 0, %v7700_v12  ;;  %v7702_v54 = vsub.s32 (!%p4037_p4), 1, %v7700_v12 }
 0x407   : > { %v3428_v39 = vadd.f32 %v3336_v22, %v2530_v44  ;;  %v3338_v62 = vpop.f32.mrb[46].mxu0  ;;  %v3518_v22 = vld [vmem:[#allocation2 + $0x18] sm:$0xff] (!%p4037_p4) }
 0x408   : > { %3491 = vst [vmem:[#allocation2 + $0x160] sm:$0xff] %v3427_v23  ;;  %v3429_v2 = vadd.f32 %v3338_v62, %v2531_v57  ;;  %v3340_v1 = vpop.f32.mrb[47].mxu0  ;;  %v7384_v44 = vrot.slane (!%p4037_p4), %v3579_v5, %v7701_v21  ;;  %v7388_v57 = vrot.slane (!%p4037_p4), %v3579_v5, %v7702_v54  ;;  %v3517_v23 = vld [vmem:[#allocation2 + $0x10] sm:$0xff] (!%p4037_p4) }
 0x409   : > { %3492 = vst [vmem:[#allocation2 + $0x168] sm:$0xff] %v3428_v39  ;;  %v3430_v30 = vadd.f32 %v3340_v1, %v2532_v7  ;;  %v3519_v7 = vld [vmem:[#allocation2 + $0x20] sm:$0xff] (!%p4037_p4)  ;;  %v3520_v39 = vld [vmem:[#allocation2 + $0x28] sm:$0xff] (!%p4037_p4)  ;;  %v3521_v62 = vld [vmem:[#allocation2 + $0x30] sm:$0xff] (!%p4037_p4) }
 0x40a   : > { %3493 = vst [vmem:[#allocation2 + $0x170] sm:$0xff] %v3429_v2  ;;  %v3522_v2 = vld [vmem:[#allocation2 + $0x38] sm:$0xff] (!%p4037_p4)  ;;  %v3591_v1 = vadd.f32 (!%p4037_p4), %v7384_v44, %v3515_v42  ;;  %v3544_v42 = vld [vmem:[#allocation2 + $0xe8] sm:$0xff] (!%p4037_p4)  ;;  %v3545_v5 = vld [vmem:[#allocation2 + $0xf0] sm:$0xff] (!%p4037_p4) }
 0x40b   : > { %3494 = vst [vmem:[#allocation2 + $0x178] sm:$0xff] %v3430_v30  ;;  %v3592_v30 = vadd.f32 (!%p4037_p4), %v7388_v57, %v3516_v4  ;;  %v3546_v4 = vld [vmem:[#allocation2 + $0xf8] sm:$0xff] (!%p4037_p4)  ;;  %v3620_v12 = vadd.f32 (!%p4037_p4), %v7388_v57, %v3544_v42  ;;  %v3621_v21 = vadd.f32 (!%p4037_p4), %v7384_v44, %v3545_v5 }
 0x40c   : > { %3655 = vst [vmem:[%s5317_s8] sm:$0xff] (!%p4037_p4), %v3591_v1  ;;  %v3622_v54 = vadd.f32 (!%p4037_p4), %v7388_v57, %v3546_v4  ;;  %v3550_v1 = vld [vmem:[#allocation2 + $0x118] sm:$0xff] (!%p4037_p4) }
 0x40d   : > { %v3344_v18 = vpop.f32.mrb[48].mxu0  ;;  %3656 = vst [vmem:[%s5317_s8 + $0x8] sm:$0xff] (!%p4037_p4), %v3592_v30  ;;  %v3551_v30 = vld [vmem:[#allocation2 + $0x120] sm:$0xff] (!%p4037_p4)  ;;  %3684 = vst [vmem:[%s5317_s8 + $0xe8] sm:$0xff] (!%p4037_p4), %v3620_v12 }
 0x40e   : > { %v3431_v28 = vadd.f32 %v3344_v18, %v2533_v17  ;;  %v3346_v50 = vpop.f32.mrb[49].mxu0  ;;  %v3593_v17 = vadd.f32 (!%p4037_p4), %v7384_v44, %v3517_v23  ;;  %v3523_v18 = vld [vmem:[#allocation2 + $0x40] sm:$0xff] (!%p4037_p4)  ;;  %3685 = vst [vmem:[%s5317_s8 + $0xf0] sm:$0xff] (!%p4037_p4), %v3621_v21  ;;  %3686 = vst [vmem:[%s5317_s8 + $0xf8] sm:$0xff] (!%p4037_p4), %v3622_v54 }
 0x40f   : > { %v3432_v36 = vadd.f32 %v3346_v50, %v2534_v47  ;;  %v3348_v26 = vpop.f32.mrb[50].mxu0  ;;  %v3594_v47 = vadd.f32 (!%p4037_p4), %v7388_v57, %v3518_v22  ;;  %v3595_v50 = vadd.f32 (!%p4037_p4), %v7384_v44, %v3519_v7  ;;  %v3547_v23 = vld [vmem:[#allocation2 + $0x100] sm:$0xff] (!%p4037_p4)  ;;  %v3548_v22 = vld [vmem:[#allocation2 + $0x108] sm:$0xff] (!%p4037_p4)  ;;  %v3549_v7 = vld [vmem:[#allocation2 + $0x110] sm:$0xff] (!%p4037_p4) }
 0x410   : > { %3495 = vst [vmem:[#allocation2 + $0x180] sm:$0xff] %v3431_v28  ;;  %v3433_v48 = vadd.f32 %v3348_v26, %v2535_v53  ;;  %v3350_v59 = vpop.f32.mrb[51].mxu0  ;;  %v3524_v53 = vld [vmem:[#allocation2 + $0x48] sm:$0xff] (!%p4037_p4)  ;;  %v3525_v28 = vld [vmem:[#allocation2 + $0x50] sm:$0xff] (!%p4037_p4)  ;;  %v3598_v26 = vadd.f32 (!%p4037_p4), %v7388_v57, %v3522_v2  ;;  %3657 = vst [vmem:[%s5317_s8 + $0x10] sm:$0xff] (!%p4037_p4), %v3593_v17  ;;  %v3625_v2 = vadd.f32 (!%p4037_p4), %v7384_v44, %v3549_v7 }
 0x411   : > { %3496 = vst [vmem:[#allocation2 + $0x188] sm:$0xff] %v3432_v36  ;;  %v3434_v45 = vadd.f32 %v3350_v59, %v2536_v61  ;;  %v3596_v61 = vadd.f32 (!%p4037_p4), %v7388_v57, %v3520_v39  ;;  %v3597_v36 = vadd.f32 (!%p4037_p4), %v7384_v44, %v3521_v62  ;;  %v3527_v59 = vld [vmem:[#allocation2 + $0x60] sm:$0xff] (!%p4037_p4)  ;;  %3658 = vst [vmem:[%s5317_s8 + $0x18] sm:$0xff] (!%p4037_p4), %v3594_v47  ;;  %v3552_v17 = vld [vmem:[#allocation2 + $0x128] sm:$0xff] (!%p4037_p4) }
 0x412   : > { %3497 = vst [vmem:[#allocation2 + $0x190] sm:$0xff] %v3433_v48  ;;  %v3526_v48 = vld [vmem:[#allocation2 + $0x58] sm:$0xff] (!%p4037_p4)  ;;  %3659 = vst [vmem:[%s5317_s8 + $0x20] sm:$0xff] (!%p4037_p4), %v3595_v50  ;;  %v3623_v39 = vadd.f32 (!%p4037_p4), %v7384_v44, %v3547_v23  ;;  %v3624_v62 = vadd.f32 (!%p4037_p4), %v7388_v57, %v3548_v22  ;;  %v3626_v47 = vadd.f32 (!%p4037_p4), %v7388_v57, %v3550_v1 }
 0x413   : > { %3498 = vst [vmem:[#allocation2 + $0x198] sm:$0xff] %v3434_v45  ;;  %v3528_v45 = vld [vmem:[#allocation2 + $0x68] sm:$0xff] (!%p4037_p4)  ;;  %3660 = vst [vmem:[%s5317_s8 + $0x28] sm:$0xff] (!%p4037_p4), %v3596_v61  ;;  %v3554_v50 = vld [vmem:[#allocation2 + $0x138] sm:$0xff] (!%p4037_p4) }
 0x414   : > { %3661 = vst [vmem:[%s5317_s8 + $0x30] sm:$0xff] (!%p4037_p4), %v3597_v36  ;;  %3662 = vst [vmem:[%s5317_s8 + $0x38] sm:$0xff] (!%p4037_p4), %v3598_v26  ;;  %v3555_v61 = vld [vmem:[#allocation2 + $0x140] sm:$0xff] (!%p4037_p4)  ;;  %v3630_v26 = vadd.f32 (!%p4037_p4), %v7388_v57, %v3554_v50 }
 0x415   : > { %v3354_v37 = vpop.f32.mrb[52].mxu0  ;;  %3687 = vst [vmem:[%s5317_s8 + $0x100] sm:$0xff] (!%p4037_p4), %v3623_v39  ;;  %3688 = vst [vmem:[%s5317_s8 + $0x108] sm:$0xff] (!%p4037_p4), %v3624_v62 }
 0x416   : > { %v3435_v20 = vadd.f32 %v3354_v37, %v2537_v9  ;;  %v3356_v16 = vpop.f32.mrb[53].mxu0  ;;  %v3599_v9 = vadd.f32 (!%p4037_p4), %v7384_v44, %v3523_v18  ;;  %v3601_v37 = vadd.f32 (!%p4037_p4), %v7384_v44, %v3525_v28  ;;  %v3627_v18 = vadd.f32 (!%p4037_p4), %v7384_v44, %v3551_v30  ;;  %v3553_v28 = vld [vmem:[#allocation2 + $0x130] sm:$0xff] (!%p4037_p4)  ;;  %3689 = vst [vmem:[%s5317_s8 + $0x110] sm:$0xff] (!%p4037_p4), %v3625_v2 }
 0x417   : > { %v3436_v6 = vadd.f32 %v3356_v16, %v2538_v43  ;;  %v3358_v56 = vpop.f32.mrb[54].mxu0  ;;  %v3600_v43 = vadd.f32 (!%p4037_p4), %v7388_v57, %v3524_v53  ;;  %v3530_v16 = vld [vmem:[#allocation2 + $0x78] sm:$0xff] (!%p4037_p4)  ;;  %v3628_v53 = vadd.f32 (!%p4037_p4), %v7388_v57, %v3552_v17  ;;  %v3629_v36 = vadd.f32 (!%p4037_p4), %v7384_v44, %v3553_v28  ;;  %3690 = vst [vmem:[%s5317_s8 + $0x118] sm:$0xff] (!%p4037_p4), %v3626_v47 }
 0x418   : > { %3499 = vst [vmem:[#allocation2 + $0x1a0] sm:$0xff] %v3435_v20  ;;  %v3437_v35 = vadd.f32 %v3358_v56, %v2539_v52  ;;  %v3360_v0 = vpop.f32.mrb[55].mxu0  ;;  %v3602_v52 = vadd.f32 (!%p4037_p4), %v7388_v57, %v3526_v48  ;;  %v3529_v20 = vld [vmem:[#allocation2 + $0x70] sm:$0xff] (!%p4037_p4)  ;;  %v3604_v56 = vadd.f32 (!%p4037_p4), %v7388_v57, %v3528_v45  ;;  %3663 = vst [vmem:[%s5317_s8 + $0x40] sm:$0xff] (!%p4037_p4), %v3599_v9  ;;  %v3558_v9 = vld [vmem:[#allocation2 + $0x158] sm:$0xff] (!%p4037_p4) }
 0x419   : > { %3500 = vst [vmem:[#allocation2 + $0x1a8] sm:$0xff] %v3436_v6  ;;  %v3438_v55 = vadd.f32 %v3360_v0, %v2540_v46  ;;  %v3531_v46 = vld [vmem:[#allocation2 + $0x80] sm:$0xff] (!%p4037_p4)  ;;  %v3603_v6 = vadd.f32 (!%p4037_p4), %v7384_v44, %v3527_v59  ;;  %v3606_v0 = vadd.f32 (!%p4037_p4), %v7388_v57, %v3530_v16  ;;  %3664 = vst [vmem:[%s5317_s8 + $0x48] sm:$0xff] (!%p4037_p4), %v3600_v43  ;;  %v3556_v59 = vld [vmem:[#allocation2 + $0x148] sm:$0xff] (!%p4037_p4) }
 0x41a   : > { %3501 = vst [vmem:[#allocation2 + $0x1b0] sm:$0xff] %v3437_v35  ;;  %v3605_v35 = vadd.f32 (!%p4037_p4), %v7384_v44, %v3529_v20  ;;  %3665 = vst [vmem:[%s5317_s8 + $0x50] sm:$0xff] (!%p4037_p4), %v3601_v37  ;;  %v3631_v48 = vadd.f32 (!%p4037_p4), %v7384_v44, %v3555_v61  ;;  %v3557_v45 = vld [vmem:[#allocation2 + $0x150] sm:$0xff] (!%p4037_p4)  ;;  %v3632_v43 = vadd.f32 (!%p4037_p4), %v7388_v57, %v3556_v59  ;;  %v3559_v20 = vld [vmem:[#allocation2 + $0x160] sm:$0xff] (!%p4037_p4) }
 0x41b   : > { %3502 = vst [vmem:[#allocation2 + $0x1b8] sm:$0xff] %v3438_v55  ;;  %v3532_v55 = vld [vmem:[#allocation2 + $0x88] sm:$0xff] (!%p4037_p4)  ;;  %3666 = vst [vmem:[%s5317_s8 + $0x58] sm:$0xff] (!%p4037_p4), %v3602_v52  ;;  %v3633_v37 = vadd.f32 (!%p4037_p4), %v7384_v44, %v3557_v45  ;;  %v3634_v52 = vadd.f32 (!%p4037_p4), %v7388_v57, %v3558_v9 }
 0x41c   : > { %3667 = vst [vmem:[%s5317_s8 + $0x60] sm:$0xff] (!%p4037_p4), %v3603_v6  ;;  %3668 = vst [vmem:[%s5317_s8 + $0x68] sm:$0xff] (!%p4037_p4), %v3604_v56  ;;  %v3560_v16 = vld [vmem:[#allocation2 + $0x168] sm:$0xff] (!%p4037_p4)  ;;  %v3635_v6 = vadd.f32 (!%p4037_p4), %v7384_v44, %v3559_v20 }
 0x41d   : > { %v3364_v33 = vpop.f32.mrb[56].mxu0  ;;  %3669 = vst [vmem:[%s5317_s8 + $0x70] sm:$0xff] (!%p4037_p4), %v3605_v35  ;;  %3670 = vst [vmem:[%s5317_s8 + $0x78] sm:$0xff] (!%p4037_p4), %v3606_v0  ;;  %v3636_v56 = vadd.f32 (!%p4037_p4), %v7388_v57, %v3560_v16  ;;  %v3562_v0 = vld [vmem:[#allocation2 + $0x178] sm:$0xff] (!%p4037_p4) }
 0x41e   : > { %v3439_v60 = vadd.f32 %v3364_v33, %v2541_v14  ;;  %v3366_v8 = vpop.f32.mrb[57].mxu0  ;;  %v3533_v14 = vld [vmem:[#allocation2 + $0x90] sm:$0xff] (!%p4037_p4)  ;;  %v3607_v33 = vadd.f32 (!%p4037_p4), %v7384_v44, %v3531_v46  ;;  %3691 = vst [vmem:[%s5317_s8 + $0x120] sm:$0xff] (!%p4037_p4), %v3627_v18  ;;  %3692 = vst [vmem:[%s5317_s8 + $0x128] sm:$0xff] (!%p4037_p4), %v3628_v53 }
 0x41f   : > { %v3440_v29 = vadd.f32 %v3366_v8, %v2542_v34  ;;  %v3368_v3 = vpop.f32.mrb[58].mxu0  ;;  %v3534_v34 = vld [vmem:[#allocation2 + $0x98] sm:$0xff] (!%p4037_p4)  ;;  %v3561_v46 = vld [vmem:[#allocation2 + $0x170] sm:$0xff] (!%p4037_p4)  ;;  %3693 = vst [vmem:[%s5317_s8 + $0x130] sm:$0xff] (!%p4037_p4), %v3629_v36  ;;  %3694 = vst [vmem:[%s5317_s8 + $0x138] sm:$0xff] (!%p4037_p4), %v3630_v26 }
 0x420   : > { %3503 = vst [vmem:[#allocation2 + $0x1c0] sm:$0xff] %v3439_v60  ;;  %v3441_v15 = vadd.f32 %v3368_v3, %v2543_v63  ;;  %v3370_v25 = vpop.f32.mrb[59].mxu0  ;;  %v3608_v63 = vadd.f32 (!%p4037_p4), %v7388_v57, %v3532_v55  ;;  %v3609_v60 = vadd.f32 (!%p4037_p4), %v7384_v44, %v3533_v14  ;;  %v3610_v8 = vadd.f32 (!%p4037_p4), %v7388_v57, %v3534_v34  ;;  %v3537_v3 = vld [vmem:[#allocation2 + $0xb0] sm:$0xff] (!%p4037_p4)  ;;  %v3563_v55 = vld [vmem:[#allocation2 + $0x180] sm:$0xff] (!%p4037_p4)  ;;  %v3564_v14 = vld [vmem:[#allocation2 + $0x188] sm:$0xff] (!%p4037_p4) }
 0x421   : > { %3504 = vst [vmem:[#allocation2 + $0x1c8] sm:$0xff] %v3440_v29  ;;  %v3442_v49 = vadd.f32 %v3370_v25, %v2544_v11  ;;  %v3535_v11 = vld [vmem:[#allocation2 + $0xa0] sm:$0xff] (!%p4037_p4)  ;;  %v3536_v29 = vld [vmem:[#allocation2 + $0xa8] sm:$0xff] (!%p4037_p4)  ;;  %3671 = vst [vmem:[%s5317_s8 + $0x80] sm:$0xff] (!%p4037_p4), %v3607_v33  ;;  %v3637_v35 = vadd.f32 (!%p4037_p4), %v7384_v44, %v3561_v46  ;;  %v3638_v34 = vadd.f32 (!%p4037_p4), %v7388_v57, %v3562_v0 }
 0x422   : > { %3505 = vst [vmem:[#allocation2 + $0x1d0] sm:$0xff] %v3441_v15  ;;  %v3611_v15 = vadd.f32 (!%p4037_p4), %v7384_v44, %v3535_v11  ;;  %v3612_v25 = vadd.f32 (!%p4037_p4), %v7388_v57, %v3536_v29  ;;  %3672 = vst [vmem:[%s5317_s8 + $0x88] sm:$0xff] (!%p4037_p4), %v3608_v63  ;;  %v3639_v33 = vadd.f32 (!%p4037_p4), %v7384_v44, %v3563_v55  ;;  %v3567_v11 = vld [vmem:[#allocation2 + $0x1a0] sm:$0xff] (!%p4037_p4) }
 0x423   : > { %3506 = vst [vmem:[#allocation2 + $0x1d8] sm:$0xff] %v3442_v49  ;;  %v3613_v49 = vadd.f32 (!%p4037_p4), %v7384_v44, %v3537_v3  ;;  %3673 = vst [vmem:[%s5317_s8 + $0x90] sm:$0xff] (!%p4037_p4), %v3609_v60  ;;  %v3640_v63 = vadd.f32 (!%p4037_p4), %v7388_v57, %v3564_v14  ;;  %v3565_v60 = vld [vmem:[#allocation2 + $0x190] sm:$0xff] (!%p4037_p4) }
 0x424   : > { %3674 = vst [vmem:[%s5317_s8 + $0x98] sm:$0xff] (!%p4037_p4), %v3610_v8  ;;  %3675 = vst [vmem:[%s5317_s8 + $0xa0] sm:$0xff] (!%p4037_p4), %v3611_v15  ;;  %v3566_v8 = vld [vmem:[#allocation2 + $0x198] sm:$0xff] (!%p4037_p4)  ;;  %v3641_v29 = vadd.f32 (!%p4037_p4), %v7384_v44, %v3565_v60  ;;  %v3643_v15 = vadd.f32 (!%p4037_p4), %v7384_v44, %v3567_v11 }
 0x425   : > { %v3374_v19 = vpop.f32.mrb[60].mxu0  ;;  %3514 = sbr.rel (%p4037_p4) target bundleno = 1079 (0x437), region = 64  ;;  %3676 = vst [vmem:[%s5317_s8 + $0xa8] sm:$0xff] (!%p4037_p4), %v3612_v25  ;;  %3677 = vst [vmem:[%s5317_s8 + $0xb0] sm:$0xff] (!%p4037_p4), %v3613_v49  ;;  %v3642_v3 = vadd.f32 (!%p4037_p4), %v7388_v57, %v3566_v8  ;;  %v3568_v25 = vld [vmem:[#allocation2 + $0x1a8] sm:$0xff] (!%p4037_p4)  ;;  %v3569_v49 = vld [vmem:[#allocation2 + $0x1b0] sm:$0xff] (!%p4037_p4) }
 0x426   : > { %v3443_v38 = vadd.f32 %v3374_v19, %v2545_v24  ;;  %v3376_v27 = vpop.f32.mrb[61].mxu0  ;;  %v3538_v24 = vld [vmem:[#allocation2 + $0xb8] sm:$0xff] (!%p4037_p4)  ;;  %v3540_v19 = vld [vmem:[#allocation2 + $0xc8] sm:$0xff] (!%p4037_p4)  ;;  %3695 = vst [vmem:[%s5317_s8 + $0x140] sm:$0xff] (!%p4037_p4), %v3631_v48  ;;  %3696 = vst [vmem:[%s5317_s8 + $0x148] sm:$0xff] (!%p4037_p4), %v3632_v43 }
 0x427   : > { %v3444_v51 = vadd.f32 %v3376_v27, %v2546_v13  ;;  %v3378_v10 = vpop.f32.mrb[62].mxu0  ;;  %v3539_v13 = vld [vmem:[#allocation2 + $0xc0] sm:$0xff] (!%p4037_p4)  ;;  %v3616_v27 = vadd.f32 (!%p4037_p4), %v7388_v57, %v3540_v19  ;;  %3697 = vst [vmem:[%s5317_s8 + $0x150] sm:$0xff] (!%p4037_p4), %v3633_v37  ;;  %3698 = vst [vmem:[%s5317_s8 + $0x158] sm:$0xff] (!%p4037_p4), %v3634_v52  ;;  %v3645_v19 = vadd.f32 (!%p4037_p4), %v7384_v44, %v3569_v49 }
 0x428   : > { %3507 = vst [vmem:[#allocation2 + $0x1e0] sm:$0xff] %v3443_v38  ;;  %v3445_v41 = vadd.f32 %v3378_v10, %v2547_v58  ;;  %v3380_v40 = vpop.f32.mrb[63].mxu0  ;;  %v3614_v58 = vadd.f32 (!%p4037_p4), %v7388_v57, %v3538_v24  ;;  %v3615_v38 = vadd.f32 (!%p4037_p4), %v7384_v44, %v3539_v13  ;;  %v3543_v10 = vld [vmem:[#allocation2 + $0xe0] sm:$0xff] (!%p4037_p4)  ;;  %3699 = vst [vmem:[%s5317_s8 + $0x160] sm:$0xff] (!%p4037_p4), %v3635_v6  ;;  %v3570_v24 = vld [vmem:[#allocation2 + $0x1b8] sm:$0xff] (!%p4037_p4) }
 0x429   : > { %3508 = vst [vmem:[#allocation2 + $0x1e8] sm:$0xff] %v3444_v51  ;;  %v3446_v31 = vadd.f32 %v3380_v40, %v2548_v32  ;;  %v3541_v32 = vld [vmem:[#allocation2 + $0xd0] sm:$0xff] (!%p4037_p4)  ;;  %v3542_v51 = vld [vmem:[#allocation2 + $0xd8] sm:$0xff] (!%p4037_p4)  ;;  %3680 = vst [vmem:[%s5317_s8 + $0xc8] sm:$0xff] (!%p4037_p4), %v3616_v27  ;;  %v3644_v13 = vadd.f32 (!%p4037_p4), %v7388_v57, %v3568_v25 }
 0x42a   : > { %3509 = vst [vmem:[#allocation2 + $0x1f0] sm:$0xff] %v3445_v41  ;;  %v3617_v41 = vadd.f32 (!%p4037_p4), %v7384_v44, %v3541_v32  ;;  %v3618_v40 = vadd.f32 (!%p4037_p4), %v7388_v57, %v3542_v51  ;;  %3678 = vst [vmem:[%s5317_s8 + $0xb8] sm:$0xff] (!%p4037_p4), %v3614_v58  ;;  %v3646_v58 = vadd.f32 (!%p4037_p4), %v7388_v57, %v3570_v24  ;;  %v3572_v27 = vld [vmem:[#allocation2 + $0x1c8] sm:$0xff] (!%p4037_p4)  ;;  %v3573_v32 = vld [vmem:[#allocation2 + $0x1d0] sm:$0xff] (!%p4037_p4) }
 0x42b   : > { %3510 = vst [vmem:[#allocation2 + $0x1f8] sm:$0xff] %v3446_v31  ;;  %v3619_v31 = vadd.f32 (!%p4037_p4), %v7384_v44, %v3543_v10  ;;  %3679 = vst [vmem:[%s5317_s8 + $0xc0] sm:$0xff] (!%p4037_p4), %v3615_v38  ;;  %v3571_v38 = vld [vmem:[#allocation2 + $0x1c0] sm:$0xff] (!%p4037_p4)  ;;  %v3648_v10 = vadd.f32 (!%p4037_p4), %v7388_v57, %v3572_v27 }
 0x42c   : > { %3681 = vst [vmem:[%s5317_s8 + $0xd0] sm:$0xff] %v3617_v41  ;;  %3682 = vst [vmem:[%s5317_s8 + $0xd8] sm:$0xff] %v3618_v40  ;;  %v3647_v51 = vadd.f32 %v7384_v44, %v3571_v38  ;;  %v3649_v41 = vadd.f32 %v7384_v44, %v3573_v32  ;;  %v3574_v40 = vld [vmem:[#allocation2 + $0x1d8] sm:$0xff] }
 0x42d   : > { %3683 = vst [vmem:[%s5317_s8 + $0xe0] sm:$0xff] %v3619_v31  ;;  %3700 = vst [vmem:[%s5317_s8 + $0x168] sm:$0xff] %v3636_v56  ;;  %v3650_v5 = vadd.f32 %v7388_v57, %v3574_v40 }
 0x42e   : > { %3701 = vst [vmem:[%s5317_s8 + $0x170] sm:$0xff] %v3637_v35  ;;  %3702 = vst [vmem:[%s5317_s8 + $0x178] sm:$0xff] %v3638_v34 }
 0x42f   : > { %3703 = vst [vmem:[%s5317_s8 + $0x180] sm:$0xff] %v3639_v33  ;;  %3704 = vst [vmem:[%s5317_s8 + $0x188] sm:$0xff] %v3640_v63  ;;  %v3575_v31 = vld [vmem:[#allocation2 + $0x1e0] sm:$0xff] }
 0x430   : > { %3705 = vst [vmem:[%s5317_s8 + $0x190] sm:$0xff] %v3641_v29  ;;  %3706 = vst [vmem:[%s5317_s8 + $0x198] sm:$0xff] %v3642_v3  ;;  %v3576_v42 = vld [vmem:[#allocation2 + $0x1e8] sm:$0xff]  ;;  %v3651_v4 = vadd.f32 %v7384_v44, %v3575_v31 }
 0x431   : > { %3707 = vst [vmem:[%s5317_s8 + $0x1a0] sm:$0xff] %v3643_v15  ;;  %3708 = vst [vmem:[%s5317_s8 + $0x1a8] sm:$0xff] %v3644_v13  ;;  %v3652_v12 = vadd.f32 %v7388_v57, %v3576_v42  ;;  %v3577_v21 = vld [vmem:[#allocation2 + $0x1f0] sm:$0xff] }
 0x432   : > { %3709 = vst [vmem:[%s5317_s8 + $0x1b0] sm:$0xff] %v3645_v19  ;;  %3710 = vst [vmem:[%s5317_s8 + $0x1b8] sm:$0xff] %v3646_v58  ;;  %v3578_v54 = vld [vmem:[#allocation2 + $0x1f8] sm:$0xff]  ;;  %v3653_v23 = vadd.f32 %v7384_v44, %v3577_v21 }
 0x433   : > { %3711 = vst [vmem:[%s5317_s8 + $0x1c0] sm:$0xff] %v3647_v51  ;;  %3712 = vst [vmem:[%s5317_s8 + $0x1c8] sm:$0xff] %v3648_v10  ;;  %v3654_v22 = vadd.f32 %v7388_v57, %v3578_v54 }
 0x434   : > { %3713 = vst [vmem:[%s5317_s8 + $0x1d0] sm:$0xff] %v3649_v41  ;;  %3714 = vst [vmem:[%s5317_s8 + $0x1d8] sm:$0xff] %v3650_v5 }
 0x435   : > { %3715 = vst [vmem:[%s5317_s8 + $0x1e0] sm:$0xff] %v3651_v4  ;;  %3716 = vst [vmem:[%s5317_s8 + $0x1e8] sm:$0xff] %v3652_v12 }
 0x436   : > { %3717 = vst [vmem:[%s5317_s8 + $0x1f0] sm:$0xff] %v3653_v23  ;;  %3718 = vst [vmem:[%s5317_s8 + $0x1f8] sm:$0xff] %v3654_v22 }
 0x437 PF: > { %s7703_s24 = sld [smem:[#allocation18_spill]]  ;;  %s3734_s13 = sshll.u32 %s5317_s8, 4  ;;  %s7525_s13 = int_to_ptr.vmem [resolvable:$true] %s3734_s13 }
 0x438   : > { %s7704_s20 = sld [smem:[#allocation42_spill]]  ;;  %s3720_s6 = scalar_lea.sflag [#allocation5], %s5291_s17 }
 0x439   : > { %s4810_s14 = scalar_lea.vmem %s7525_s13, 8192  ;;  %p7706_p11 = scmp.ne.s32.totalorder %s7642_s12, 0 }
 0x43a   : > { %p4811_p12 = scmp.ne.s32.totalorder %s7525_s13, %s4810_s14  ;;  %s4952_s30 = smov [#allocation11]  }
 0x43b   : > { %s4814_s11 = sshll.u32 %s4952_s30, 4  ;;  %s4815_s11 = int_to_ptr.vmem [resolvable:$false] %s4814_s11 }
 0x43c   : > { %p4812_p5 = pnand %p4811_p12, %p7706_p11  ;;  %s4816_s4 = scalar_lea.vmem %s4815_s11, 16384 }
 0x43d   : > { %s4051_s5 = sshll.u32 %s7703_s24, 13  ;;  %p4817_p9 = scmp.lt.s32.totalorder %s7525_s13, %s4815_s11 }
 0x43e   : > { %s7705_s15 = smov %s7704_s20  ;;  %s7522_s16 = scalar_lea.hbm %s7704_s20, %s4051_s5 }
 0x43f   : > { %p4813_p3 = pneg %p4812_p5  ;;  %p4818_p2 = scmp.lt.s32.totalorder %s4816_s4, %s4810_s14 }
 0x441   : > { %p4819_p0 = por %p4818_p2, %p4817_p9 }
 0x443   : > { %p4820_p10 = pnand %p4819_p0, %p4813_p3 }
 0x445   : > { %4823 = shalt.err (!%p4820_p10)
}
 0x446   : > { %s4824_s27 = scalar_lea.hbm %s7522_s16, 8192  ;;  %s4828_s29 = scalar_lea.hbm %s7705_s15, 16384 }
 0x447   : > { %p4825_p7 = scmp.ne.s32.totalorder %s7522_s16, %s4824_s27  ;;  %p4829_p13 = scmp.lt.u32.totalorder %s7522_s16, %s7705_s15 }
 0x448   : > { %p4830_p6 = scmp.lt.u32.totalorder %s4828_s29, %s4824_s27  ;;  %p4832_p12 = scmp.lt.u32.totalorder %s4824_s27, %s7522_s16 }
 0x449   : > { %p4826_p8 = pnand %p4825_p7, %p7706_p11 }
 0x44a   : > { %p4831_p4 = por %p4830_p6, %p4829_p13 }
 0x44b   : > { %p4827_p1 = pneg %p4826_p8 }
 0x44c   : > { %p4833_p5 = por %p4832_p12, %p4831_p4 }
 0x44e   : > { %p4834_p3 = pnand %p4833_p5, %p4827_p1 }
 0x450   : > { %4837 = shalt.err (!%p4834_p3)
}
 0x451   : > { %s4953_s7 = smov 256   ;;  %s4954_s23 = smov 16  }
 0x452   : > { %4124 = dma.vmem_to_hbm [thread:$0]  (%p7706_p11), %s7525_s13, 8192, %s7522_s16, %s3720_s6, %s4953_s7, %s4953_s7, %s4954_s23  }
 0x453 PF: > { %s7707_s24 = sld [smem:[#allocation24_spill]]  ;;  %p4144_p9 = scmp.ge.s32.totalorder %s4940_s28, 2 }
 0x454   : > { %s3749_s5 = sand.u32 1, %s4912_s21  }
 0x455   : > { %s3750_s1 = scalar_lea.sflag [#allocation5], %s3749_s5 }
 0x459   : > { %p7708_p2 = scmp.ne.s32.totalorder %s7707_s24, 0 }
 0x45b   : > { %p4140_p0 = pnand %p4144_p9, %p7708_p2 }
 0x45d   : > { %4895 = dma.done.wait (!%p4140_p0), %s3750_s1, 8192  }
 0x45e   : > { %4897 = vsyncadd (!%p4140_p0), %s3750_s1, 4294959104  ;;  %s27_s28 = sadd.s32 1, %s4940_s28   ;;  %s7709_s20 = sld [smem:[#allocation16_spill]] }
 0x45f   : > { %p24_p10 = scmp.ge.s32.totalorder %s27_s28, 6   ;;  %s7710_s14 = sld [smem:[#allocation22_spill]] }
 0x460   : > { %s7711_s12 = sld [smem:[#allocation17_spill]]  ;;  %s7712_s23 = sld [smem:[#allocation23_spill]] }
 0x461   : > { %s7713_s25 = sld [smem:[#allocation19_spill]]  ;;  %s7714_s17 = sld [smem:[#allocation20_spill]] }
 0x462   : > { %s7715_s27 = sld [smem:[#allocation21_spill]]  ;;  %s7716_s18 = smov %s4904_s19 }
 0x463   : > { %s7719_s21 = smov %s4916_s22  ;;  %s7721_s24 = smov %s4932_s26 }
 0x464   : > { %s7717_s19 = smov %s7709_s20  ;;  %26 = sbr.rel (!%p24_p10) target bundleno = 17 (0x11), region = 130 }
 0x465   : > { %s7718_s20 = smov %s7710_s14 }
 0x466   : > { %s7720_s22 = smov %s7711_s12 }
 0x467   : > { %s7722_s26 = smov %s7714_s17 }
 0x46b   :  { %3755 = vsyncpa [#allocation4], 1 }
 0x46c   :  { %3757 = vsyncpa [#allocation4 + $0x1], 1 }
 0x46d   :  { %3758 = vsyncpa [#allocation7], 1 }
 0x46e   :  { %3760 = vsyncpa [#allocation7 + $0x1], 1 }
 0x46f   :  { %3761 = vsyncpa [#allocation10], 1 }
 0x470   :  { %3763 = vsyncpa [#allocation10 + $0x1], 1 }
 0x471   :  { %3764 = vsyncpa [#allocation5], 1 }
 0x472   :  { %3766 = vsyncpa [#allocation5 + $0x1], 1 }

</bundles_post_ra>
